<compile_context>
chip_gen: v7x
topology: tpu7x:2x2x1
jax: 0.10.0
libtpu: 0.0.40
codegen_flags: <defaults>
</compile_context>

<pallas_src>
import functools

import jax
import jax.numpy as jnp
from jax.experimental import pallas as pl
from jax.experimental.pallas import tpu as pltpu

# The PyTorch `par` dict (hyperparameters), chosen small & deterministic.
PAR = dict(
    n_input=4,
    n_hidden=32,
    n_output=8,
    batch_size=2,
    dt=10.0,
    membrane_time_constant=100.0,
    U=0.45,          # scalar version of par['U']
    U_std=0.3,
    alpha_std=0.05,  # scalar version of par['alpha_std']
    alpha_stf=0.05,  # scalar version of par['alpha_stf']
)


def _drnn_kernel(inp_ref, w_rec_ref, w_bias_ref,
                 h_out_ref, sx_out_ref, su_out_ref,
                 *, T, U, U_std, alpha_std, alpha_stf, dt_syn, dt_m):
    """One kernel invocation runs all T recurrence steps.

    inp_ref   : (T, B, NH)  precomputed x[t] @ W_in
    w_rec_ref : (NH, NH)
    w_bias_ref: (1, NH)
    h_out_ref : (T+1, B, NH)       (row 0 = initial state)
    sx_out_ref: (T+1, B, NH, NH)   (row 0 = initial state)
    su_out_ref: (T+1, B, NH, NH)   (row 0 = initial state)
    """
    B, NH = h_out_ref.shape[1], h_out_ref.shape[2]

    # Initial states, matching the PyTorch lists' element 0; write to row 0.
    h = jnp.zeros((B, NH), jnp.float32)
    sx = jnp.ones((B, NH, NH), jnp.float32)
    su = jnp.full((B, NH, NH), 1.0 + U_std, jnp.float32)
    h_out_ref[0] = h
    sx_out_ref[0] = sx
    su_out_ref[0] = su

    # Hoisted once per kernel call (not re-read / re-broadcast every step).
    w_rec_b = w_rec_ref[...][None, :, :]     # (1, NH, NH)
    bias = w_bias_ref[...]                   # (1, NH)

    # Fully-unrolled static time loop: T is small, so this is equivalent to
    # lax.fori_loop(..., unroll=True) but with static store indices.
    for t in range(T):
        inp_t = inp_ref[t]                   # (B, NH), already x[t] @ W_in

        # --- synaptic updates (use OLD syn_x, OLD syn_u, OLD h) --------------
        # syn_x = syn_x + a_std*(1-syn_x) - dt/1000 * syn_u*syn_x * repeat(h)
        sx_new = sx + alpha_std * (1.0 - sx) - dt_syn * (su * sx) * h[:, :, None]

        # stf drive, distributed:
        #   s[b,i] = sum_k U*(1-su[b,i,k])*h[b,k]
        #          = U*sum_k h[b,k] - U*sum_k su[b,i,k]*h[b,k]
        h_sum = jnp.sum(h, axis=-1)[:, None, None]                   # (B,1,1)
        su_h = jnp.sum(su * h[:, None, :], axis=-1, keepdims=True)   # (B,NH,1)
        su_new = su + alpha_stf * (U - su) + dt_syn * U * (h_sum - su_h)

        sx_new = jnp.clip(sx_new, 0.0, 1.0)
        su_new = jnp.clip(su_new, 0.0, 1.0)

        # --- hidden update (NEW clamped synapses, OLD h) ---------------------
        eff_w = sx_new * su_new * w_rec_b                # (B,NH,NH)
        rec = jnp.sum(h[:, :, None] * eff_w, axis=1)     # (B,NH)
        h = jnp.maximum((1.0 - dt_m) * h + dt_m * (rec + bias) + inp_t, 0.0)

        sx, su = sx_new, su_new
        h_out_ref[t + 1] = h
        sx_out_ref[t + 1] = sx
        su_out_ref[t + 1] = su


def drnn_forward(x, w_in, w_rec, w_bias, w_out, w_out_b, par=PAR):
    T = x.shape[0]
    B, NH, NO = par['batch_size'], par['n_hidden'], par['n_output']
    dt_syn = par['dt'] / 1000.0
    dt_m = par['dt'] / par['membrane_time_constant']

    x = x.astype(jnp.float32)
    # Input projection hoisted out of the recurrence: one big XLA matmul.
    inp_all = jnp.einsum('tbi,ih->tbh', x, w_in).astype(jnp.float32)  # (T,B,NH)

    kernel = functools.partial(
        _drnn_kernel,
        T=T, U=par['U'], U_std=par['U_std'],
        alpha_std=par['alpha_std'], alpha_stf=par['alpha_stf'],
        dt_syn=dt_syn, dt_m=dt_m)

    out_shape = (
        jax.ShapeDtypeStruct((T + 1, B, NH), jnp.float32),       # h   (incl. t=0)
        jax.ShapeDtypeStruct((T + 1, B, NH, NH), jnp.float32),   # syn_x (incl. t=0)
        jax.ShapeDtypeStruct((T + 1, B, NH, NH), jnp.float32),   # syn_u (incl. t=0)
    )
    h_all, sx_all, su_all = pl.pallas_call(
        kernel,
        out_shape=out_shape,
        grid=(1,),   # whole recurrence in one grid step; state lives in vregs
        in_specs=[
            pl.BlockSpec((T, B, NH), lambda i: (0, 0, 0)),       # inp_all
            pl.BlockSpec((NH, NH), lambda i: (0, 0)),            # W_rec
            pl.BlockSpec((1, NH), lambda i: (0, 0)),             # W_bias
        ],
        out_specs=(
            pl.BlockSpec((T + 1, B, NH), lambda i: (0, 0, 0)),
            pl.BlockSpec((T + 1, B, NH, NH), lambda i: (0, 0, 0, 0)),
            pl.BlockSpec((T + 1, B, NH, NH), lambda i: (0, 0, 0, 0)),
        ),
        compiler_params=pltpu.CompilerParams(
            dimension_semantics=("arbitrary",)),   # time recurrence is sequential
    )(inp_all, w_rec, w_bias.reshape(1, NH))

    # Readout hoisted out of the recurrence: one (T*B, NH) @ (NH, NO) matmul.
    y_seq = jax.nn.sigmoid(
        jnp.einsum('tbh,ho->tbo', h_all[1:], w_out) + w_out_b)      # (T,B,NO)

    return h_all, y_seq, sx_all, su_all


def drnn_reference(x, w_in, w_rec, w_bias, w_out, w_out_b, par=PAR):
    """Pure-JAX reference mirroring the PyTorch forward exactly."""
    T = x.shape[0]
    B, NH = par['batch_size'], par['n_hidden']
    dt_syn = par['dt'] / 1000.0
    dt_m = par['dt'] / par['membrane_time_constant']
    U, U_std = par['U'], par['U_std']
    a_std, a_stf = par['alpha_std'], par['alpha_stf']
    h = jnp.zeros((B, NH), jnp.float32)
    sx = jnp.ones((B, NH, NH), jnp.float32)
    su = jnp.full((B, NH, NH), 1.0 + U_std, jnp.float32)
    hs, ys, sxs, sus = [h], [], [sx], [su]
    for t in range(T):
        sx_new = sx + a_std * (1 - sx) - dt_syn * (su * sx) * h[:, :, None]
        s = jnp.sum(U * (1 - su) * h[:, None, :], axis=-1, keepdims=True)
        su_new = su + a_stf * (U - su) + dt_syn * s
        sx_new = jnp.clip(sx_new, 0.0, 1.0)
        su_new = jnp.clip(su_new, 0.0, 1.0)
        rec = jnp.einsum('bk,bkj->bj', h, sx_new * su_new * w_rec[None])
        h = jnp.maximum((1 - dt_m) * h + dt_m * (rec + w_bias) + x[t] @ w_in, 0.0)
        y = jax.nn.sigmoid(h @ w_out + w_out_b)
        sx, su = sx_new, su_new
        hs.append(h); ys.append(y); sxs.append(sx); sus.append(su)
    return jnp.stack(hs), jnp.stack(ys), jnp.stack(sxs), jnp.stack(sus)


def orthogonal_init(key, rows, cols):
    """Deterministic stand-in for torch.nn.init.orthogonal_."""
    a = jax.random.normal(key, (max(rows, cols), min(rows, cols)), jnp.float32)
    q, _ = jnp.linalg.qr(a)
    return (q[:rows, :cols] if rows >= cols else q[:cols, :rows].T).astype(jnp.float32)


if __name__ == "__main__":
    key = jax.random.PRNGKey(0)
    k_x, k_in, k_rec, k_out = jax.random.split(key, 4)

    T = 8
    x = jax.random.normal(k_x, (T, PAR['batch_size'], PAR['n_input']), jnp.float32)
    w_in = orthogonal_init(k_in, PAR['n_input'], PAR['n_hidden'])
    w_rec = orthogonal_init(k_rec, PAR['n_hidden'], PAR['n_hidden'])
    w_out = orthogonal_init(k_out, PAR['n_hidden'], PAR['n_output'])
    w_bias = jnp.zeros((PAR['n_hidden'],), jnp.float32)
    w_out_b = jnp.zeros((PAR['n_output'],), jnp.float32)

    outs = drnn_forward(x, w_in, w_rec, w_bias, w_out, w_out_b)
    outs = jax.block_until_ready(outs)

    refs = drnn_reference(x, w_in, w_rec, w_bias, w_out, w_out_b)
    names = ("h", "y", "syn_x", "syn_u")
    for name, got, ref in zip(names, outs, refs):
        assert got.shape == ref.shape, (name, got.shape, ref.shape)
        assert jnp.max(jnp.abs(got - ref)) < 1e-4, (
            name, float(jnp.max(jnp.abs(got - ref))))

    print("KERNEL_OK")
</pallas_src>

<mosaic_0001>
module attributes {stable_mosaic.version = 11 : i64} {
  func.func @_drnn_kernel(%arg0: i32, %arg1: memref<8x2x32xf32, #tpu.memory_space<vmem>>, %arg2: memref<32x32xf32, #tpu.memory_space<vmem>>, %arg3: memref<1x32xf32, #tpu.memory_space<vmem>>, %arg4: memref<9x2x32xf32, #tpu.memory_space<vmem>>, %arg5: memref<9x2x32x32xf32, #tpu.memory_space<vmem>>, %arg6: memref<9x2x32x32xf32, #tpu.memory_space<vmem>>) attributes {dimension_semantics = [#tpu.dimension_semantics<arbitrary>], iteration_bounds = array<i64: 1>, scalar_prefetch = 0 : i64, scratch_operands = 0 : i64, tpu.core_type = #tpu.core_type<tc>, window_params = [{pipeline_mode = #tpu.pipeline_mode<synchronous>, transform_indices = @transform_0, window_bounds = array<i64: 8, 2, 32>}, {pipeline_mode = #tpu.pipeline_mode<synchronous>, transform_indices = @transform_1, window_bounds = array<i64: 32, 32>}, {pipeline_mode = #tpu.pipeline_mode<synchronous>, transform_indices = @transform_2, window_bounds = array<i64: 1, 32>}, {pipeline_mode = #tpu.pipeline_mode<synchronous>, transform_indices = @transform_3, window_bounds = array<i64: 9, 2, 32>}, {pipeline_mode = #tpu.pipeline_mode<synchronous>, transform_indices = @transform_4, window_bounds = array<i64: 9, 2, 32, 32>}, {pipeline_mode = #tpu.pipeline_mode<synchronous>, transform_indices = @transform_5, window_bounds = array<i64: 9, 2, 32, 32>}]} {
    %cst = arith.constant 0.000000e+00 : f32
    %0 = vector.broadcast %cst : f32 to vector<2x32xf32>
    %cst_0 = arith.constant 1.000000e+00 : f32
    %1 = vector.broadcast %cst_0 : f32 to vector<2x32x32xf32>
    %cst_1 = arith.constant 1.300000e+00 : f32
    %2 = vector.broadcast %cst_1 : f32 to vector<2x32x32xf32>
    %c0 = arith.constant 0 : index
    %c0_2 = arith.constant 0 : index
    %c0_3 = arith.constant 0 : index
    %3 = vector.load %arg4[%c0, %c0_2, %c0_3] : memref<9x2x32xf32, #tpu.memory_space<vmem>>, vector<1x2x32xf32>
    %4 = vector.shape_cast %3 : vector<1x2x32xf32> to vector<2x32xf32>
    %5 = vector.shape_cast %0 : vector<2x32xf32> to vector<1x2x32xf32>
    tpu.vector_store %arg4[%c0, %c0_2, %c0_3], %5 {strides = array<i32>} : memref<9x2x32xf32, #tpu.memory_space<vmem>>, vector<1x2x32xf32>,
    %c0_4 = arith.constant 0 : index
    %c0_5 = arith.constant 0 : index
    %c0_6 = arith.constant 0 : index
    %c0_7 = arith.constant 0 : index
    %6 = vector.load %arg5[%c0_4, %c0_5, %c0_6, %c0_7] : memref<9x2x32x32xf32, #tpu.memory_space<vmem>>, vector<1x2x32x32xf32>
    %7 = vector.shape_cast %6 : vector<1x2x32x32xf32> to vector<2x32x32xf32>
    %8 = vector.shape_cast %1 : vector<2x32x32xf32> to vector<1x2x32x32xf32>
    tpu.vector_store %arg5[%c0_4, %c0_5, %c0_6, %c0_7], %8 {strides = array<i32>} : memref<9x2x32x32xf32, #tpu.memory_space<vmem>>, vector<1x2x32x32xf32>,
    %c0_8 = arith.constant 0 : index
    %c0_9 = arith.constant 0 : index
    %c0_10 = arith.constant 0 : index
    %c0_11 = arith.constant 0 : index
    %9 = vector.load %arg6[%c0_8, %c0_9, %c0_10, %c0_11] : memref<9x2x32x32xf32, #tpu.memory_space<vmem>>, vector<1x2x32x32xf32>
    %10 = vector.shape_cast %9 : vector<1x2x32x32xf32> to vector<2x32x32xf32>
    %11 = vector.shape_cast %2 : vector<2x32x32xf32> to vector<1x2x32x32xf32>
    tpu.vector_store %arg6[%c0_8, %c0_9, %c0_10, %c0_11], %11 {strides = array<i32>} : memref<9x2x32x32xf32, #tpu.memory_space<vmem>>, vector<1x2x32x32xf32>,
    %c0_12 = arith.constant 0 : index
    %c0_13 = arith.constant 0 : index
    %12 = vector.load %arg2[%c0_12, %c0_13] : memref<32x32xf32, #tpu.memory_space<vmem>>, vector<32x32xf32>
    %13 = vector.shape_cast %12 : vector<32x32xf32> to vector<1x32x32xf32>
    %c0_14 = arith.constant 0 : index
    %c0_15 = arith.constant 0 : index
    %14 = vector.load %arg3[%c0_14, %c0_15] : memref<1x32xf32, #tpu.memory_space<vmem>>, vector<1x32xf32>
    %c0_16 = arith.constant 0 : index
    %c0_17 = arith.constant 0 : index
    %c0_18 = arith.constant 0 : index
    %15 = vector.load %arg1[%c0_16, %c0_17, %c0_18] : memref<8x2x32xf32, #tpu.memory_space<vmem>>, vector<1x2x32xf32>
    %16 = vector.shape_cast %15 : vector<1x2x32xf32> to vector<2x32xf32>
    %cst_19 = arith.constant 1.000000e+00 : f32
    %17 = vector.broadcast %cst_19 : f32 to vector<2x32x32xf32>
    %18 = arith.subf %17, %1 : vector<2x32x32xf32>
    %cst_20 = arith.constant 5.000000e-02 : f32
    %19 = vector.broadcast %cst_20 : f32 to vector<2x32x32xf32>
    %20 = arith.mulf %19, %18 : vector<2x32x32xf32>
    %21 = arith.addf %1, %20 : vector<2x32x32xf32>
    %22 = arith.mulf %2, %1 : vector<2x32x32xf32>
    %cst_21 = arith.constant 0.00999999977 : f32
    %23 = vector.broadcast %cst_21 : f32 to vector<2x32x32xf32>
    %24 = arith.mulf %23, %22 : vector<2x32x32xf32>
    %25 = vector.shape_cast %0 : vector<2x32xf32> to vector<2x32x1xf32>
    %26 = vector.broadcast %25 : vector<2x32x1xf32> to vector<2x32x32xf32>
    %27 = arith.mulf %24, %26 : vector<2x32x32xf32>
    %28 = arith.subf %21, %27 : vector<2x32x32xf32>
    %cst_22 = arith.constant dense<0.000000e+00> : vector<2xf32>
    %29 = vector.multi_reduction <add>, %0, %cst_22 [1] : vector<2x32xf32> to vector<2xf32>
    %30 = vector.shape_cast %29 : vector<2xf32> to vector<2x1x1xf32>
    %31 = vector.shape_cast %0 : vector<2x32xf32> to vector<2x1x32xf32>
    %32 = vector.broadcast %31 : vector<2x1x32xf32> to vector<2x32x32xf32>
    %33 = arith.mulf %2, %32 : vector<2x32x32xf32>
    %cst_23 = arith.constant dense<0.000000e+00> : vector<2x32xf32>
    %34 = vector.multi_reduction <add>, %33, %cst_23 [2] : vector<2x32x32xf32> to vector<2x32xf32>
    %35 = vector.shape_cast %34 : vector<2x32xf32> to vector<2x32x1xf32>
    %cst_24 = arith.constant 4.500000e-01 : f32
    %36 = vector.broadcast %cst_24 : f32 to vector<2x32x32xf32>
    %37 = arith.subf %36, %2 : vector<2x32x32xf32>
    %cst_25 = arith.constant 5.000000e-02 : f32
    %38 = vector.broadcast %cst_25 : f32 to vector<2x32x32xf32>
    %39 = arith.mulf %38, %37 : vector<2x32x32xf32>
    %40 = arith.addf %2, %39 : vector<2x32x32xf32>
    %41 = vector.broadcast %30 : vector<2x1x1xf32> to vector<2x32x1xf32>
    %42 = arith.subf %41, %35 : vector<2x32x1xf32>
    %cst_26 = arith.constant 4.500000e-03 : f32
    %43 = vector.broadcast %cst_26 : f32 to vector<2x32x1xf32>
    %44 = arith.mulf %43, %42 : vector<2x32x1xf32>
    %45 = vector.broadcast %44 : vector<2x32x1xf32> to vector<2x32x32xf32>
    %46 = arith.addf %40, %45 : vector<2x32x32xf32>
    %cst_27 = arith.constant 0.000000e+00 : f32
    %cst_28 = arith.constant 1.000000e+00 : f32
    %47 = vector.broadcast %cst_27 : f32 to vector<2x32x32xf32>
    %48 = arith.maximumf %47, %28 : vector<2x32x32xf32>
    %49 = vector.broadcast %cst_28 : f32 to vector<2x32x32xf32>
    %50 = arith.minimumf %49, %48 : vector<2x32x32xf32>
    %cst_29 = arith.constant 0.000000e+00 : f32
    %cst_30 = arith.constant 1.000000e+00 : f32
    %51 = vector.broadcast %cst_29 : f32 to vector<2x32x32xf32>
    %52 = arith.maximumf %51, %46 : vector<2x32x32xf32>
    %53 = vector.broadcast %cst_30 : f32 to vector<2x32x32xf32>
    %54 = arith.minimumf %53, %52 : vector<2x32x32xf32>
    %55 = arith.mulf %50, %54 : vector<2x32x32xf32>
    %56 = vector.broadcast %13 : vector<1x32x32xf32> to vector<2x32x32xf32>
    %57 = arith.mulf %55, %56 : vector<2x32x32xf32>
    %58 = vector.shape_cast %0 : vector<2x32xf32> to vector<2x32x1xf32>
    %59 = vector.broadcast %58 : vector<2x32x1xf32> to vector<2x32x32xf32>
    %60 = arith.mulf %59, %57 : vector<2x32x32xf32>
    %cst_31 = arith.constant dense<0.000000e+00> : vector<2x32xf32>
    %61 = vector.multi_reduction <add>, %60, %cst_31 [1] : vector<2x32x32xf32> to vector<2x32xf32>
    %cst_32 = arith.constant 0.899999976 : f32
    %62 = vector.broadcast %cst_32 : f32 to vector<2x32xf32>
    %63 = arith.mulf %62, %0 : vector<2x32xf32>
    %64 = vector.broadcast %14 : vector<1x32xf32> to vector<2x32xf32>
    %65 = arith.addf %61, %64 : vector<2x32xf32>
    %cst_33 = arith.constant 1.000000e-01 : f32
    %66 = vector.broadcast %cst_33 : f32 to vector<2x32xf32>
    %67 = arith.mulf %66, %65 : vector<2x32xf32>
    %68 = arith.addf %63, %67 : vector<2x32xf32>
    %69 = arith.addf %68, %16 : vector<2x32xf32>
    %cst_34 = arith.constant 0.000000e+00 : f32
    %70 = vector.broadcast %cst_34 : f32 to vector<2x32xf32>
    %71 = arith.maximumf %69, %70 : vector<2x32xf32>
    %c1 = arith.constant 1 : index
    %c0_35 = arith.constant 0 : index
    %c0_36 = arith.constant 0 : index
    %72 = vector.load %arg4[%c1, %c0_35, %c0_36] : memref<9x2x32xf32, #tpu.memory_space<vmem>>, vector<1x2x32xf32>
    %73 = vector.shape_cast %72 : vector<1x2x32xf32> to vector<2x32xf32>
    %74 = vector.shape_cast %71 : vector<2x32xf32> to vector<1x2x32xf32>
    tpu.vector_store %arg4[%c1, %c0_35, %c0_36], %74 {strides = array<i32>} : memref<9x2x32xf32, #tpu.memory_space<vmem>>, vector<1x2x32xf32>,
    %c1_37 = arith.constant 1 : index
    %c0_38 = arith.constant 0 : index
    %c0_39 = arith.constant 0 : index
    %c0_40 = arith.constant 0 : index
    %75 = vector.load %arg5[%c1_37, %c0_38, %c0_39, %c0_40] : memref<9x2x32x32xf32, #tpu.memory_space<vmem>>, vector<1x2x32x32xf32>
    %76 = vector.shape_cast %75 : vector<1x2x32x32xf32> to vector<2x32x32xf32>
    %77 = vector.shape_cast %50 : vector<2x32x32xf32> to vector<1x2x32x32xf32>
    tpu.vector_store %arg5[%c1_37, %c0_38, %c0_39, %c0_40], %77 {strides = array<i32>} : memref<9x2x32x32xf32, #tpu.memory_space<vmem>>, vector<1x2x32x32xf32>,
    %c1_41 = arith.constant 1 : index
    %c0_42 = arith.constant 0 : index
    %c0_43 = arith.constant 0 : index
    %c0_44 = arith.constant 0 : index
    %78 = vector.load %arg6[%c1_41, %c0_42, %c0_43, %c0_44] : memref<9x2x32x32xf32, #tpu.memory_space<vmem>>, vector<1x2x32x32xf32>
    %79 = vector.shape_cast %78 : vector<1x2x32x32xf32> to vector<2x32x32xf32>
    %80 = vector.shape_cast %54 : vector<2x32x32xf32> to vector<1x2x32x32xf32>
    tpu.vector_store %arg6[%c1_41, %c0_42, %c0_43, %c0_44], %80 {strides = array<i32>} : memref<9x2x32x32xf32, #tpu.memory_space<vmem>>, vector<1x2x32x32xf32>,
    %c1_45 = arith.constant 1 : index
    %c0_46 = arith.constant 0 : index
    %c0_47 = arith.constant 0 : index
    %81 = vector.load %arg1[%c1_45, %c0_46, %c0_47] : memref<8x2x32xf32, #tpu.memory_space<vmem>>, vector<1x2x32xf32>
    %82 = vector.shape_cast %81 : vector<1x2x32xf32> to vector<2x32xf32>
    %cst_48 = arith.constant 1.000000e+00 : f32
    %83 = vector.broadcast %cst_48 : f32 to vector<2x32x32xf32>
    %84 = arith.subf %83, %50 : vector<2x32x32xf32>
    %cst_49 = arith.constant 5.000000e-02 : f32
    %85 = vector.broadcast %cst_49 : f32 to vector<2x32x32xf32>
    %86 = arith.mulf %85, %84 : vector<2x32x32xf32>
    %87 = arith.addf %50, %86 : vector<2x32x32xf32>
    %88 = arith.mulf %54, %50 : vector<2x32x32xf32>
    %cst_50 = arith.constant 0.00999999977 : f32
    %89 = vector.broadcast %cst_50 : f32 to vector<2x32x32xf32>
    %90 = arith.mulf %89, %88 : vector<2x32x32xf32>
    %91 = vector.shape_cast %71 : vector<2x32xf32> to vector<2x32x1xf32>
    %92 = vector.broadcast %91 : vector<2x32x1xf32> to vector<2x32x32xf32>
    %93 = arith.mulf %90, %92 : vector<2x32x32xf32>
    %94 = arith.subf %87, %93 : vector<2x32x32xf32>
    %cst_51 = arith.constant dense<0.000000e+00> : vector<2xf32>
    %95 = vector.multi_reduction <add>, %71, %cst_51 [1] : vector<2x32xf32> to vector<2xf32>
    %96 = vector.shape_cast %95 : vector<2xf32> to vector<2x1x1xf32>
    %97 = vector.shape_cast %71 : vector<2x32xf32> to vector<2x1x32xf32>
    %98 = vector.broadcast %97 : vector<2x1x32xf32> to vector<2x32x32xf32>
    %99 = arith.mulf %54, %98 : vector<2x32x32xf32>
    %cst_52 = arith.constant dense<0.000000e+00> : vector<2x32xf32>
    %100 = vector.multi_reduction <add>, %99, %cst_52 [2] : vector<2x32x32xf32> to vector<2x32xf32>
    %101 = vector.shape_cast %100 : vector<2x32xf32> to vector<2x32x1xf32>
    %cst_53 = arith.constant 4.500000e-01 : f32
    %102 = vector.broadcast %cst_53 : f32 to vector<2x32x32xf32>
    %103 = arith.subf %102, %54 : vector<2x32x32xf32>
    %cst_54 = arith.constant 5.000000e-02 : f32
    %104 = vector.broadcast %cst_54 : f32 to vector<2x32x32xf32>
    %105 = arith.mulf %104, %103 : vector<2x32x32xf32>
    %106 = arith.addf %54, %105 : vector<2x32x32xf32>
    %107 = vector.broadcast %96 : vector<2x1x1xf32> to vector<2x32x1xf32>
    %108 = arith.subf %107, %101 : vector<2x32x1xf32>
    %cst_55 = arith.constant 4.500000e-03 : f32
    %109 = vector.broadcast %cst_55 : f32 to vector<2x32x1xf32>
    %110 = arith.mulf %109, %108 : vector<2x32x1xf32>
    %111 = vector.broadcast %110 : vector<2x32x1xf32> to vector<2x32x32xf32>
    %112 = arith.addf %106, %111 : vector<2x32x32xf32>
    %cst_56 = arith.constant 0.000000e+00 : f32
    %cst_57 = arith.constant 1.000000e+00 : f32
    %113 = vector.broadcast %cst_56 : f32 to vector<2x32x32xf32>
    %114 = arith.maximumf %113, %94 : vector<2x32x32xf32>
    %115 = vector.broadcast %cst_57 : f32 to vector<2x32x32xf32>
    %116 = arith.minimumf %115, %114 : vector<2x32x32xf32>
    %cst_58 = arith.constant 0.000000e+00 : f32
    %cst_59 = arith.constant 1.000000e+00 : f32
    %117 = vector.broadcast %cst_58 : f32 to vector<2x32x32xf32>
    %118 = arith.maximumf %117, %112 : vector<2x32x32xf32>
    %119 = vector.broadcast %cst_59 : f32 to vector<2x32x32xf32>
    %120 = arith.minimumf %119, %118 : vector<2x32x32xf32>
    %121 = arith.mulf %116, %120 : vector<2x32x32xf32>
    %122 = vector.broadcast %13 : vector<1x32x32xf32> to vector<2x32x32xf32>
    %123 = arith.mulf %121, %122 : vector<2x32x32xf32>
    %124 = vector.shape_cast %71 : vector<2x32xf32> to vector<2x32x1xf32>
    %125 = vector.broadcast %124 : vector<2x32x1xf32> to vector<2x32x32xf32>
    %126 = arith.mulf %125, %123 : vector<2x32x32xf32>
    %cst_60 = arith.constant dense<0.000000e+00> : vector<2x32xf32>
    %127 = vector.multi_reduction <add>, %126, %cst_60 [1] : vector<2x32x32xf32> to vector<2x32xf32>
    %cst_61 = arith.constant 0.899999976 : f32
    %128 = vector.broadcast %cst_61 : f32 to vector<2x32xf32>
    %129 = arith.mulf %128, %71 : vector<2x32xf32>
    %130 = vector.broadcast %14 : vector<1x32xf32> to vector<2x32xf32>
    %131 = arith.addf %127, %130 : vector<2x32xf32>
    %cst_62 = arith.constant 1.000000e-01 : f32
    %132 = vector.broadcast %cst_62 : f32 to vector<2x32xf32>
    %133 = arith.mulf %132, %131 : vector<2x32xf32>
    %134 = arith.addf %129, %133 : vector<2x32xf32>
    %135 = arith.addf %134, %82 : vector<2x32xf32>
    %cst_63 = arith.constant 0.000000e+00 : f32
    %136 = vector.broadcast %cst_63 : f32 to vector<2x32xf32>
    %137 = arith.maximumf %135, %136 : vector<2x32xf32>
    %c2 = arith.constant 2 : index
    %c0_64 = arith.constant 0 : index
    %c0_65 = arith.constant 0 : index
    %138 = vector.load %arg4[%c2, %c0_64, %c0_65] : memref<9x2x32xf32, #tpu.memory_space<vmem>>, vector<1x2x32xf32>
    %139 = vector.shape_cast %138 : vector<1x2x32xf32> to vector<2x32xf32>
    %140 = vector.shape_cast %137 : vector<2x32xf32> to vector<1x2x32xf32>
    tpu.vector_store %arg4[%c2, %c0_64, %c0_65], %140 {strides = array<i32>} : memref<9x2x32xf32, #tpu.memory_space<vmem>>, vector<1x2x32xf32>,
    %c2_66 = arith.constant 2 : index
    %c0_67 = arith.constant 0 : index
    %c0_68 = arith.constant 0 : index
    %c0_69 = arith.constant 0 : index
    %141 = vector.load %arg5[%c2_66, %c0_67, %c0_68, %c0_69] : memref<9x2x32x32xf32, #tpu.memory_space<vmem>>, vector<1x2x32x32xf32>
    %142 = vector.shape_cast %141 : vector<1x2x32x32xf32> to vector<2x32x32xf32>
    %143 = vector.shape_cast %116 : vector<2x32x32xf32> to vector<1x2x32x32xf32>
    tpu.vector_store %arg5[%c2_66, %c0_67, %c0_68, %c0_69], %143 {strides = array<i32>} : memref<9x2x32x32xf32, #tpu.memory_space<vmem>>, vector<1x2x32x32xf32>,
    %c2_70 = arith.constant 2 : index
    %c0_71 = arith.constant 0 : index
    %c0_72 = arith.constant 0 : index
    %c0_73 = arith.constant 0 : index
    %144 = vector.load %arg6[%c2_70, %c0_71, %c0_72, %c0_73] : memref<9x2x32x32xf32, #tpu.memory_space<vmem>>, vector<1x2x32x32xf32>
    %145 = vector.shape_cast %144 : vector<1x2x32x32xf32> to vector<2x32x32xf32>
    %146 = vector.shape_cast %120 : vector<2x32x32xf32> to vector<1x2x32x32xf32>
    tpu.vector_store %arg6[%c2_70, %c0_71, %c0_72, %c0_73], %146 {strides = array<i32>} : memref<9x2x32x32xf32, #tpu.memory_space<vmem>>, vector<1x2x32x32xf32>,
    %c2_74 = arith.constant 2 : index
    %c0_75 = arith.constant 0 : index
    %c0_76 = arith.constant 0 : index
    %147 = vector.load %arg1[%c2_74, %c0_75, %c0_76] : memref<8x2x32xf32, #tpu.memory_space<vmem>>, vector<1x2x32xf32>
    %148 = vector.shape_cast %147 : vector<1x2x32xf32> to vector<2x32xf32>
    %cst_77 = arith.constant 1.000000e+00 : f32
    %149 = vector.broadcast %cst_77 : f32 to vector<2x32x32xf32>
    %150 = arith.subf %149, %116 : vector<2x32x32xf32>
    %cst_78 = arith.constant 5.000000e-02 : f32
    %151 = vector.broadcast %cst_78 : f32 to vector<2x32x32xf32>
    %152 = arith.mulf %151, %150 : vector<2x32x32xf32>
    %153 = arith.addf %116, %152 : vector<2x32x32xf32>
    %154 = arith.mulf %120, %116 : vector<2x32x32xf32>
    %cst_79 = arith.constant 0.00999999977 : f32
    %155 = vector.broadcast %cst_79 : f32 to vector<2x32x32xf32>
    %156 = arith.mulf %155, %154 : vector<2x32x32xf32>
    %157 = vector.shape_cast %137 : vector<2x32xf32> to vector<2x32x1xf32>
    %158 = vector.broadcast %157 : vector<2x32x1xf32> to vector<2x32x32xf32>
    %159 = arith.mulf %156, %158 : vector<2x32x32xf32>
    %160 = arith.subf %153, %159 : vector<2x32x32xf32>
    %cst_80 = arith.constant dense<0.000000e+00> : vector<2xf32>
    %161 = vector.multi_reduction <add>, %137, %cst_80 [1] : vector<2x32xf32> to vector<2xf32>
    %162 = vector.shape_cast %161 : vector<2xf32> to vector<2x1x1xf32>
    %163 = vector.shape_cast %137 : vector<2x32xf32> to vector<2x1x32xf32>
    %164 = vector.broadcast %163 : vector<2x1x32xf32> to vector<2x32x32xf32>
    %165 = arith.mulf %120, %164 : vector<2x32x32xf32>
    %cst_81 = arith.constant dense<0.000000e+00> : vector<2x32xf32>
    %166 = vector.multi_reduction <add>, %165, %cst_81 [2] : vector<2x32x32xf32> to vector<2x32xf32>
    %167 = vector.shape_cast %166 : vector<2x32xf32> to vector<2x32x1xf32>
    %cst_82 = arith.constant 4.500000e-01 : f32
    %168 = vector.broadcast %cst_82 : f32 to vector<2x32x32xf32>
    %169 = arith.subf %168, %120 : vector<2x32x32xf32>
    %cst_83 = arith.constant 5.000000e-02 : f32
    %170 = vector.broadcast %cst_83 : f32 to vector<2x32x32xf32>
    %171 = arith.mulf %170, %169 : vector<2x32x32xf32>
    %172 = arith.addf %120, %171 : vector<2x32x32xf32>
    %173 = vector.broadcast %162 : vector<2x1x1xf32> to vector<2x32x1xf32>
    %174 = arith.subf %173, %167 : vector<2x32x1xf32>
    %cst_84 = arith.constant 4.500000e-03 : f32
    %175 = vector.broadcast %cst_84 : f32 to vector<2x32x1xf32>
    %176 = arith.mulf %175, %174 : vector<2x32x1xf32>
    %177 = vector.broadcast %176 : vector<2x32x1xf32> to vector<2x32x32xf32>
    %178 = arith.addf %172, %177 : vector<2x32x32xf32>
    %cst_85 = arith.constant 0.000000e+00 : f32
    %cst_86 = arith.constant 1.000000e+00 : f32
    %179 = vector.broadcast %cst_85 : f32 to vector<2x32x32xf32>
    %180 = arith.maximumf %179, %160 : vector<2x32x32xf32>
    %181 = vector.broadcast %cst_86 : f32 to vector<2x32x32xf32>
    %182 = arith.minimumf %181, %180 : vector<2x32x32xf32>
    %cst_87 = arith.constant 0.000000e+00 : f32
    %cst_88 = arith.constant 1.000000e+00 : f32
    %183 = vector.broadcast %cst_87 : f32 to vector<2x32x32xf32>
    %184 = arith.maximumf %183, %178 : vector<2x32x32xf32>
    %185 = vector.broadcast %cst_88 : f32 to vector<2x32x32xf32>
    %186 = arith.minimumf %185, %184 : vector<2x32x32xf32>
    %187 = arith.mulf %182, %186 : vector<2x32x32xf32>
    %188 = vector.broadcast %13 : vector<1x32x32xf32> to vector<2x32x32xf32>
    %189 = arith.mulf %187, %188 : vector<2x32x32xf32>
    %190 = vector.shape_cast %137 : vector<2x32xf32> to vector<2x32x1xf32>
    %191 = vector.broadcast %190 : vector<2x32x1xf32> to vector<2x32x32xf32>
    %192 = arith.mulf %191, %189 : vector<2x32x32xf32>
    %cst_89 = arith.constant dense<0.000000e+00> : vector<2x32xf32>
    %193 = vector.multi_reduction <add>, %192, %cst_89 [1] : vector<2x32x32xf32> to vector<2x32xf32>
    %cst_90 = arith.constant 0.899999976 : f32
    %194 = vector.broadcast %cst_90 : f32 to vector<2x32xf32>
    %195 = arith.mulf %194, %137 : vector<2x32xf32>
    %196 = vector.broadcast %14 : vector<1x32xf32> to vector<2x32xf32>
    %197 = arith.addf %193, %196 : vector<2x32xf32>
    %cst_91 = arith.constant 1.000000e-01 : f32
    %198 = vector.broadcast %cst_91 : f32 to vector<2x32xf32>
    %199 = arith.mulf %198, %197 : vector<2x32xf32>
    %200 = arith.addf %195, %199 : vector<2x32xf32>
    %201 = arith.addf %200, %148 : vector<2x32xf32>
    %cst_92 = arith.constant 0.000000e+00 : f32
    %202 = vector.broadcast %cst_92 : f32 to vector<2x32xf32>
    %203 = arith.maximumf %201, %202 : vector<2x32xf32>
    %c3 = arith.constant 3 : index
    %c0_93 = arith.constant 0 : index
    %c0_94 = arith.constant 0 : index
    %204 = vector.load %arg4[%c3, %c0_93, %c0_94] : memref<9x2x32xf32, #tpu.memory_space<vmem>>, vector<1x2x32xf32>
    %205 = vector.shape_cast %204 : vector<1x2x32xf32> to vector<2x32xf32>
    %206 = vector.shape_cast %203 : vector<2x32xf32> to vector<1x2x32xf32>
    tpu.vector_store %arg4[%c3, %c0_93, %c0_94], %206 {strides = array<i32>} : memref<9x2x32xf32, #tpu.memory_space<vmem>>, vector<1x2x32xf32>,
    %c3_95 = arith.constant 3 : index
    %c0_96 = arith.constant 0 : index
    %c0_97 = arith.constant 0 : index
    %c0_98 = arith.constant 0 : index
    %207 = vector.load %arg5[%c3_95, %c0_96, %c0_97, %c0_98] : memref<9x2x32x32xf32, #tpu.memory_space<vmem>>, vector<1x2x32x32xf32>
    %208 = vector.shape_cast %207 : vector<1x2x32x32xf32> to vector<2x32x32xf32>
    %209 = vector.shape_cast %182 : vector<2x32x32xf32> to vector<1x2x32x32xf32>
    tpu.vector_store %arg5[%c3_95, %c0_96, %c0_97, %c0_98], %209 {strides = array<i32>} : memref<9x2x32x32xf32, #tpu.memory_space<vmem>>, vector<1x2x32x32xf32>,
    %c3_99 = arith.constant 3 : index
    %c0_100 = arith.constant 0 : index
    %c0_101 = arith.constant 0 : index
    %c0_102 = arith.constant 0 : index
    %210 = vector.load %arg6[%c3_99, %c0_100, %c0_101, %c0_102] : memref<9x2x32x32xf32, #tpu.memory_space<vmem>>, vector<1x2x32x32xf32>
    %211 = vector.shape_cast %210 : vector<1x2x32x32xf32> to vector<2x32x32xf32>
    %212 = vector.shape_cast %186 : vector<2x32x32xf32> to vector<1x2x32x32xf32>
    tpu.vector_store %arg6[%c3_99, %c0_100, %c0_101, %c0_102], %212 {strides = array<i32>} : memref<9x2x32x32xf32, #tpu.memory_space<vmem>>, vector<1x2x32x32xf32>,
    %c3_103 = arith.constant 3 : index
    %c0_104 = arith.constant 0 : index
    %c0_105 = arith.constant 0 : index
    %213 = vector.load %arg1[%c3_103, %c0_104, %c0_105] : memref<8x2x32xf32, #tpu.memory_space<vmem>>, vector<1x2x32xf32>
    %214 = vector.shape_cast %213 : vector<1x2x32xf32> to vector<2x32xf32>
    %cst_106 = arith.constant 1.000000e+00 : f32
    %215 = vector.broadcast %cst_106 : f32 to vector<2x32x32xf32>
    %216 = arith.subf %215, %182 : vector<2x32x32xf32>
    %cst_107 = arith.constant 5.000000e-02 : f32
    %217 = vector.broadcast %cst_107 : f32 to vector<2x32x32xf32>
    %218 = arith.mulf %217, %216 : vector<2x32x32xf32>
    %219 = arith.addf %182, %218 : vector<2x32x32xf32>
    %220 = arith.mulf %186, %182 : vector<2x32x32xf32>
    %cst_108 = arith.constant 0.00999999977 : f32
    %221 = vector.broadcast %cst_108 : f32 to vector<2x32x32xf32>
    %222 = arith.mulf %221, %220 : vector<2x32x32xf32>
    %223 = vector.shape_cast %203 : vector<2x32xf32> to vector<2x32x1xf32>
    %224 = vector.broadcast %223 : vector<2x32x1xf32> to vector<2x32x32xf32>
    %225 = arith.mulf %222, %224 : vector<2x32x32xf32>
    %226 = arith.subf %219, %225 : vector<2x32x32xf32>
    %cst_109 = arith.constant dense<0.000000e+00> : vector<2xf32>
    %227 = vector.multi_reduction <add>, %203, %cst_109 [1] : vector<2x32xf32> to vector<2xf32>
    %228 = vector.shape_cast %227 : vector<2xf32> to vector<2x1x1xf32>
    %229 = vector.shape_cast %203 : vector<2x32xf32> to vector<2x1x32xf32>
    %230 = vector.broadcast %229 : vector<2x1x32xf32> to vector<2x32x32xf32>
    %231 = arith.mulf %186, %230 : vector<2x32x32xf32>
    %cst_110 = arith.constant dense<0.000000e+00> : vector<2x32xf32>
    %232 = vector.multi_reduction <add>, %231, %cst_110 [2] : vector<2x32x32xf32> to vector<2x32xf32>
    %233 = vector.shape_cast %232 : vector<2x32xf32> to vector<2x32x1xf32>
    %cst_111 = arith.constant 4.500000e-01 : f32
    %234 = vector.broadcast %cst_111 : f32 to vector<2x32x32xf32>
    %235 = arith.subf %234, %186 : vector<2x32x32xf32>
    %cst_112 = arith.constant 5.000000e-02 : f32
    %236 = vector.broadcast %cst_112 : f32 to vector<2x32x32xf32>
    %237 = arith.mulf %236, %235 : vector<2x32x32xf32>
    %238 = arith.addf %186, %237 : vector<2x32x32xf32>
    %239 = vector.broadcast %228 : vector<2x1x1xf32> to vector<2x32x1xf32>
    %240 = arith.subf %239, %233 : vector<2x32x1xf32>
    %cst_113 = arith.constant 4.500000e-03 : f32
    %241 = vector.broadcast %cst_113 : f32 to vector<2x32x1xf32>
    %242 = arith.mulf %241, %240 : vector<2x32x1xf32>
    %243 = vector.broadcast %242 : vector<2x32x1xf32> to vector<2x32x32xf32>
    %244 = arith.addf %238, %243 : vector<2x32x32xf32>
    %cst_114 = arith.constant 0.000000e+00 : f32
    %cst_115 = arith.constant 1.000000e+00 : f32
    %245 = vector.broadcast %cst_114 : f32 to vector<2x32x32xf32>
    %246 = arith.maximumf %245, %226 : vector<2x32x32xf32>
    %247 = vector.broadcast %cst_115 : f32 to vector<2x32x32xf32>
    %248 = arith.minimumf %247, %246 : vector<2x32x32xf32>
    %cst_116 = arith.constant 0.000000e+00 : f32
    %cst_117 = arith.constant 1.000000e+00 : f32
    %249 = vector.broadcast %cst_116 : f32 to vector<2x32x32xf32>
    %250 = arith.maximumf %249, %244 : vector<2x32x32xf32>
    %251 = vector.broadcast %cst_117 : f32 to vector<2x32x32xf32>
    %252 = arith.minimumf %251, %250 : vector<2x32x32xf32>
    %253 = arith.mulf %248, %252 : vector<2x32x32xf32>
    %254 = vector.broadcast %13 : vector<1x32x32xf32> to vector<2x32x32xf32>
    %255 = arith.mulf %253, %254 : vector<2x32x32xf32>
    %256 = vector.shape_cast %203 : vector<2x32xf32> to vector<2x32x1xf32>
    %257 = vector.broadcast %256 : vector<2x32x1xf32> to vector<2x32x32xf32>
    %258 = arith.mulf %257, %255 : vector<2x32x32xf32>
    %cst_118 = arith.constant dense<0.000000e+00> : vector<2x32xf32>
    %259 = vector.multi_reduction <add>, %258, %cst_118 [1] : vector<2x32x32xf32> to vector<2x32xf32>
    %cst_119 = arith.constant 0.899999976 : f32
    %260 = vector.broadcast %cst_119 : f32 to vector<2x32xf32>
    %261 = arith.mulf %260, %203 : vector<2x32xf32>
    %262 = vector.broadcast %14 : vector<1x32xf32> to vector<2x32xf32>
    %263 = arith.addf %259, %262 : vector<2x32xf32>
    %cst_120 = arith.constant 1.000000e-01 : f32
    %264 = vector.broadcast %cst_120 : f32 to vector<2x32xf32>
    %265 = arith.mulf %264, %263 : vector<2x32xf32>
    %266 = arith.addf %261, %265 : vector<2x32xf32>
    %267 = arith.addf %266, %214 : vector<2x32xf32>
    %cst_121 = arith.constant 0.000000e+00 : f32
    %268 = vector.broadcast %cst_121 : f32 to vector<2x32xf32>
    %269 = arith.maximumf %267, %268 : vector<2x32xf32>
    %c4 = arith.constant 4 : index
    %c0_122 = arith.constant 0 : index
    %c0_123 = arith.constant 0 : index
    %270 = vector.load %arg4[%c4, %c0_122, %c0_123] : memref<9x2x32xf32, #tpu.memory_space<vmem>>, vector<1x2x32xf32>
    %271 = vector.shape_cast %270 : vector<1x2x32xf32> to vector<2x32xf32>
    %272 = vector.shape_cast %269 : vector<2x32xf32> to vector<1x2x32xf32>
    tpu.vector_store %arg4[%c4, %c0_122, %c0_123], %272 {strides = array<i32>} : memref<9x2x32xf32, #tpu.memory_space<vmem>>, vector<1x2x32xf32>,
    %c4_124 = arith.constant 4 : index
    %c0_125 = arith.constant 0 : index
    %c0_126 = arith.constant 0 : index
    %c0_127 = arith.constant 0 : index
    %273 = vector.load %arg5[%c4_124, %c0_125, %c0_126, %c0_127] : memref<9x2x32x32xf32, #tpu.memory_space<vmem>>, vector<1x2x32x32xf32>
    %274 = vector.shape_cast %273 : vector<1x2x32x32xf32> to vector<2x32x32xf32>
    %275 = vector.shape_cast %248 : vector<2x32x32xf32> to vector<1x2x32x32xf32>
    tpu.vector_store %arg5[%c4_124, %c0_125, %c0_126, %c0_127], %275 {strides = array<i32>} : memref<9x2x32x32xf32, #tpu.memory_space<vmem>>, vector<1x2x32x32xf32>,
    %c4_128 = arith.constant 4 : index
    %c0_129 = arith.constant 0 : index
    %c0_130 = arith.constant 0 : index
    %c0_131 = arith.constant 0 : index
    %276 = vector.load %arg6[%c4_128, %c0_129, %c0_130, %c0_131] : memref<9x2x32x32xf32, #tpu.memory_space<vmem>>, vector<1x2x32x32xf32>
    %277 = vector.shape_cast %276 : vector<1x2x32x32xf32> to vector<2x32x32xf32>
    %278 = vector.shape_cast %252 : vector<2x32x32xf32> to vector<1x2x32x32xf32>
    tpu.vector_store %arg6[%c4_128, %c0_129, %c0_130, %c0_131], %278 {strides = array<i32>} : memref<9x2x32x32xf32, #tpu.memory_space<vmem>>, vector<1x2x32x32xf32>,
    %c4_132 = arith.constant 4 : index
    %c0_133 = arith.constant 0 : index
    %c0_134 = arith.constant 0 : index
    %279 = vector.load %arg1[%c4_132, %c0_133, %c0_134] : memref<8x2x32xf32, #tpu.memory_space<vmem>>, vector<1x2x32xf32>
    %280 = vector.shape_cast %279 : vector<1x2x32xf32> to vector<2x32xf32>
    %cst_135 = arith.constant 1.000000e+00 : f32
    %281 = vector.broadcast %cst_135 : f32 to vector<2x32x32xf32>
    %282 = arith.subf %281, %248 : vector<2x32x32xf32>
    %cst_136 = arith.constant 5.000000e-02 : f32
    %283 = vector.broadcast %cst_136 : f32 to vector<2x32x32xf32>
    %284 = arith.mulf %283, %282 : vector<2x32x32xf32>
    %285 = arith.addf %248, %284 : vector<2x32x32xf32>
    %286 = arith.mulf %252, %248 : vector<2x32x32xf32>
    %cst_137 = arith.constant 0.00999999977 : f32
    %287 = vector.broadcast %cst_137 : f32 to vector<2x32x32xf32>
    %288 = arith.mulf %287, %286 : vector<2x32x32xf32>
    %289 = vector.shape_cast %269 : vector<2x32xf32> to vector<2x32x1xf32>
    %290 = vector.broadcast %289 : vector<2x32x1xf32> to vector<2x32x32xf32>
    %291 = arith.mulf %288, %290 : vector<2x32x32xf32>
    %292 = arith.subf %285, %291 : vector<2x32x32xf32>
    %cst_138 = arith.constant dense<0.000000e+00> : vector<2xf32>
    %293 = vector.multi_reduction <add>, %269, %cst_138 [1] : vector<2x32xf32> to vector<2xf32>
    %294 = vector.shape_cast %293 : vector<2xf32> to vector<2x1x1xf32>
    %295 = vector.shape_cast %269 : vector<2x32xf32> to vector<2x1x32xf32>
    %296 = vector.broadcast %295 : vector<2x1x32xf32> to vector<2x32x32xf32>
    %297 = arith.mulf %252, %296 : vector<2x32x32xf32>
    %cst_139 = arith.constant dense<0.000000e+00> : vector<2x32xf32>
    %298 = vector.multi_reduction <add>, %297, %cst_139 [2] : vector<2x32x32xf32> to vector<2x32xf32>
    %299 = vector.shape_cast %298 : vector<2x32xf32> to vector<2x32x1xf32>
    %cst_140 = arith.constant 4.500000e-01 : f32
    %300 = vector.broadcast %cst_140 : f32 to vector<2x32x32xf32>
    %301 = arith.subf %300, %252 : vector<2x32x32xf32>
    %cst_141 = arith.constant 5.000000e-02 : f32
    %302 = vector.broadcast %cst_141 : f32 to vector<2x32x32xf32>
    %303 = arith.mulf %302, %301 : vector<2x32x32xf32>
    %304 = arith.addf %252, %303 : vector<2x32x32xf32>
    %305 = vector.broadcast %294 : vector<2x1x1xf32> to vector<2x32x1xf32>
    %306 = arith.subf %305, %299 : vector<2x32x1xf32>
    %cst_142 = arith.constant 4.500000e-03 : f32
    %307 = vector.broadcast %cst_142 : f32 to vector<2x32x1xf32>
    %308 = arith.mulf %307, %306 : vector<2x32x1xf32>
    %309 = vector.broadcast %308 : vector<2x32x1xf32> to vector<2x32x32xf32>
    %310 = arith.addf %304, %309 : vector<2x32x32xf32>
    %cst_143 = arith.constant 0.000000e+00 : f32
    %cst_144 = arith.constant 1.000000e+00 : f32
    %311 = vector.broadcast %cst_143 : f32 to vector<2x32x32xf32>
    %312 = arith.maximumf %311, %292 : vector<2x32x32xf32>
    %313 = vector.broadcast %cst_144 : f32 to vector<2x32x32xf32>
    %314 = arith.minimumf %313, %312 : vector<2x32x32xf32>
    %cst_145 = arith.constant 0.000000e+00 : f32
    %cst_146 = arith.constant 1.000000e+00 : f32
    %315 = vector.broadcast %cst_145 : f32 to vector<2x32x32xf32>
    %316 = arith.maximumf %315, %310 : vector<2x32x32xf32>
    %317 = vector.broadcast %cst_146 : f32 to vector<2x32x32xf32>
    %318 = arith.minimumf %317, %316 : vector<2x32x32xf32>
    %319 = arith.mulf %314, %318 : vector<2x32x32xf32>
    %320 = vector.broadcast %13 : vector<1x32x32xf32> to vector<2x32x32xf32>
    %321 = arith.mulf %319, %320 : vector<2x32x32xf32>
    %322 = vector.shape_cast %269 : vector<2x32xf32> to vector<2x32x1xf32>
    %323 = vector.broadcast %322 : vector<2x32x1xf32> to vector<2x32x32xf32>
    %324 = arith.mulf %323, %321 : vector<2x32x32xf32>
    %cst_147 = arith.constant dense<0.000000e+00> : vector<2x32xf32>
    %325 = vector.multi_reduction <add>, %324, %cst_147 [1] : vector<2x32x32xf32> to vector<2x32xf32>
    %cst_148 = arith.constant 0.899999976 : f32
    %326 = vector.broadcast %cst_148 : f32 to vector<2x32xf32>
    %327 = arith.mulf %326, %269 : vector<2x32xf32>
    %328 = vector.broadcast %14 : vector<1x32xf32> to vector<2x32xf32>
    %329 = arith.addf %325, %328 : vector<2x32xf32>
    %cst_149 = arith.constant 1.000000e-01 : f32
    %330 = vector.broadcast %cst_149 : f32 to vector<2x32xf32>
    %331 = arith.mulf %330, %329 : vector<2x32xf32>
    %332 = arith.addf %327, %331 : vector<2x32xf32>
    %333 = arith.addf %332, %280 : vector<2x32xf32>
    %cst_150 = arith.constant 0.000000e+00 : f32
    %334 = vector.broadcast %cst_150 : f32 to vector<2x32xf32>
    %335 = arith.maximumf %333, %334 : vector<2x32xf32>
    %c5 = arith.constant 5 : index
    %c0_151 = arith.constant 0 : index
    %c0_152 = arith.constant 0 : index
    %336 = vector.load %arg4[%c5, %c0_151, %c0_152] : memref<9x2x32xf32, #tpu.memory_space<vmem>>, vector<1x2x32xf32>
    %337 = vector.shape_cast %336 : vector<1x2x32xf32> to vector<2x32xf32>
    %338 = vector.shape_cast %335 : vector<2x32xf32> to vector<1x2x32xf32>
    tpu.vector_store %arg4[%c5, %c0_151, %c0_152], %338 {strides = array<i32>} : memref<9x2x32xf32, #tpu.memory_space<vmem>>, vector<1x2x32xf32>,
    %c5_153 = arith.constant 5 : index
    %c0_154 = arith.constant 0 : index
    %c0_155 = arith.constant 0 : index
    %c0_156 = arith.constant 0 : index
    %339 = vector.load %arg5[%c5_153, %c0_154, %c0_155, %c0_156] : memref<9x2x32x32xf32, #tpu.memory_space<vmem>>, vector<1x2x32x32xf32>
    %340 = vector.shape_cast %339 : vector<1x2x32x32xf32> to vector<2x32x32xf32>
    %341 = vector.shape_cast %314 : vector<2x32x32xf32> to vector<1x2x32x32xf32>
    tpu.vector_store %arg5[%c5_153, %c0_154, %c0_155, %c0_156], %341 {strides = array<i32>} : memref<9x2x32x32xf32, #tpu.memory_space<vmem>>, vector<1x2x32x32xf32>,
    %c5_157 = arith.constant 5 : index
    %c0_158 = arith.constant 0 : index
    %c0_159 = arith.constant 0 : index
    %c0_160 = arith.constant 0 : index
    %342 = vector.load %arg6[%c5_157, %c0_158, %c0_159, %c0_160] : memref<9x2x32x32xf32, #tpu.memory_space<vmem>>, vector<1x2x32x32xf32>
    %343 = vector.shape_cast %342 : vector<1x2x32x32xf32> to vector<2x32x32xf32>
    %344 = vector.shape_cast %318 : vector<2x32x32xf32> to vector<1x2x32x32xf32>
    tpu.vector_store %arg6[%c5_157, %c0_158, %c0_159, %c0_160], %344 {strides = array<i32>} : memref<9x2x32x32xf32, #tpu.memory_space<vmem>>, vector<1x2x32x32xf32>,
    %c5_161 = arith.constant 5 : index
    %c0_162 = arith.constant 0 : index
    %c0_163 = arith.constant 0 : index
    %345 = vector.load %arg1[%c5_161, %c0_162, %c0_163] : memref<8x2x32xf32, #tpu.memory_space<vmem>>, vector<1x2x32xf32>
    %346 = vector.shape_cast %345 : vector<1x2x32xf32> to vector<2x32xf32>
    %cst_164 = arith.constant 1.000000e+00 : f32
    %347 = vector.broadcast %cst_164 : f32 to vector<2x32x32xf32>
    %348 = arith.subf %347, %314 : vector<2x32x32xf32>
    %cst_165 = arith.constant 5.000000e-02 : f32
    %349 = vector.broadcast %cst_165 : f32 to vector<2x32x32xf32>
    %350 = arith.mulf %349, %348 : vector<2x32x32xf32>
    %351 = arith.addf %314, %350 : vector<2x32x32xf32>
    %352 = arith.mulf %318, %314 : vector<2x32x32xf32>
    %cst_166 = arith.constant 0.00999999977 : f32
    %353 = vector.broadcast %cst_166 : f32 to vector<2x32x32xf32>
    %354 = arith.mulf %353, %352 : vector<2x32x32xf32>
    %355 = vector.shape_cast %335 : vector<2x32xf32> to vector<2x32x1xf32>
    %356 = vector.broadcast %355 : vector<2x32x1xf32> to vector<2x32x32xf32>
    %357 = arith.mulf %354, %356 : vector<2x32x32xf32>
    %358 = arith.subf %351, %357 : vector<2x32x32xf32>
    %cst_167 = arith.constant dense<0.000000e+00> : vector<2xf32>
    %359 = vector.multi_reduction <add>, %335, %cst_167 [1] : vector<2x32xf32> to vector<2xf32>
    %360 = vector.shape_cast %359 : vector<2xf32> to vector<2x1x1xf32>
    %361 = vector.shape_cast %335 : vector<2x32xf32> to vector<2x1x32xf32>
    %362 = vector.broadcast %361 : vector<2x1x32xf32> to vector<2x32x32xf32>
    %363 = arith.mulf %318, %362 : vector<2x32x32xf32>
    %cst_168 = arith.constant dense<0.000000e+00> : vector<2x32xf32>
    %364 = vector.multi_reduction <add>, %363, %cst_168 [2] : vector<2x32x32xf32> to vector<2x32xf32>
    %365 = vector.shape_cast %364 : vector<2x32xf32> to vector<2x32x1xf32>
    %cst_169 = arith.constant 4.500000e-01 : f32
    %366 = vector.broadcast %cst_169 : f32 to vector<2x32x32xf32>
    %367 = arith.subf %366, %318 : vector<2x32x32xf32>
    %cst_170 = arith.constant 5.000000e-02 : f32
    %368 = vector.broadcast %cst_170 : f32 to vector<2x32x32xf32>
    %369 = arith.mulf %368, %367 : vector<2x32x32xf32>
    %370 = arith.addf %318, %369 : vector<2x32x32xf32>
    %371 = vector.broadcast %360 : vector<2x1x1xf32> to vector<2x32x1xf32>
    %372 = arith.subf %371, %365 : vector<2x32x1xf32>
    %cst_171 = arith.constant 4.500000e-03 : f32
    %373 = vector.broadcast %cst_171 : f32 to vector<2x32x1xf32>
    %374 = arith.mulf %373, %372 : vector<2x32x1xf32>
    %375 = vector.broadcast %374 : vector<2x32x1xf32> to vector<2x32x32xf32>
    %376 = arith.addf %370, %375 : vector<2x32x32xf32>
    %cst_172 = arith.constant 0.000000e+00 : f32
    %cst_173 = arith.constant 1.000000e+00 : f32
    %377 = vector.broadcast %cst_172 : f32 to vector<2x32x32xf32>
    %378 = arith.maximumf %377, %358 : vector<2x32x32xf32>
    %379 = vector.broadcast %cst_173 : f32 to vector<2x32x32xf32>
    %380 = arith.minimumf %379, %378 : vector<2x32x32xf32>
    %cst_174 = arith.constant 0.000000e+00 : f32
    %cst_175 = arith.constant 1.000000e+00 : f32
    %381 = vector.broadcast %cst_174 : f32 to vector<2x32x32xf32>
    %382 = arith.maximumf %381, %376 : vector<2x32x32xf32>
    %383 = vector.broadcast %cst_175 : f32 to vector<2x32x32xf32>
    %384 = arith.minimumf %383, %382 : vector<2x32x32xf32>
    %385 = arith.mulf %380, %384 : vector<2x32x32xf32>
    %386 = vector.broadcast %13 : vector<1x32x32xf32> to vector<2x32x32xf32>
    %387 = arith.mulf %385, %386 : vector<2x32x32xf32>
    %388 = vector.shape_cast %335 : vector<2x32xf32> to vector<2x32x1xf32>
    %389 = vector.broadcast %388 : vector<2x32x1xf32> to vector<2x32x32xf32>
    %390 = arith.mulf %389, %387 : vector<2x32x32xf32>
    %cst_176 = arith.constant dense<0.000000e+00> : vector<2x32xf32>
    %391 = vector.multi_reduction <add>, %390, %cst_176 [1] : vector<2x32x32xf32> to vector<2x32xf32>
    %cst_177 = arith.constant 0.899999976 : f32
    %392 = vector.broadcast %cst_177 : f32 to vector<2x32xf32>
    %393 = arith.mulf %392, %335 : vector<2x32xf32>
    %394 = vector.broadcast %14 : vector<1x32xf32> to vector<2x32xf32>
    %395 = arith.addf %391, %394 : vector<2x32xf32>
    %cst_178 = arith.constant 1.000000e-01 : f32
    %396 = vector.broadcast %cst_178 : f32 to vector<2x32xf32>
    %397 = arith.mulf %396, %395 : vector<2x32xf32>
    %398 = arith.addf %393, %397 : vector<2x32xf32>
    %399 = arith.addf %398, %346 : vector<2x32xf32>
    %cst_179 = arith.constant 0.000000e+00 : f32
    %400 = vector.broadcast %cst_179 : f32 to vector<2x32xf32>
    %401 = arith.maximumf %399, %400 : vector<2x32xf32>
    %c6 = arith.constant 6 : index
    %c0_180 = arith.constant 0 : index
    %c0_181 = arith.constant 0 : index
    %402 = vector.load %arg4[%c6, %c0_180, %c0_181] : memref<9x2x32xf32, #tpu.memory_space<vmem>>, vector<1x2x32xf32>
    %403 = vector.shape_cast %402 : vector<1x2x32xf32> to vector<2x32xf32>
    %404 = vector.shape_cast %401 : vector<2x32xf32> to vector<1x2x32xf32>
    tpu.vector_store %arg4[%c6, %c0_180, %c0_181], %404 {strides = array<i32>} : memref<9x2x32xf32, #tpu.memory_space<vmem>>, vector<1x2x32xf32>,
    %c6_182 = arith.constant 6 : index
    %c0_183 = arith.constant 0 : index
    %c0_184 = arith.constant 0 : index
    %c0_185 = arith.constant 0 : index
    %405 = vector.load %arg5[%c6_182, %c0_183, %c0_184, %c0_185] : memref<9x2x32x32xf32, #tpu.memory_space<vmem>>, vector<1x2x32x32xf32>
    %406 = vector.shape_cast %405 : vector<1x2x32x32xf32> to vector<2x32x32xf32>
    %407 = vector.shape_cast %380 : vector<2x32x32xf32> to vector<1x2x32x32xf32>
    tpu.vector_store %arg5[%c6_182, %c0_183, %c0_184, %c0_185], %407 {strides = array<i32>} : memref<9x2x32x32xf32, #tpu.memory_space<vmem>>, vector<1x2x32x32xf32>,
    %c6_186 = arith.constant 6 : index
    %c0_187 = arith.constant 0 : index
    %c0_188 = arith.constant 0 : index
    %c0_189 = arith.constant 0 : index
    %408 = vector.load %arg6[%c6_186, %c0_187, %c0_188, %c0_189] : memref<9x2x32x32xf32, #tpu.memory_space<vmem>>, vector<1x2x32x32xf32>
    %409 = vector.shape_cast %408 : vector<1x2x32x32xf32> to vector<2x32x32xf32>
    %410 = vector.shape_cast %384 : vector<2x32x32xf32> to vector<1x2x32x32xf32>
    tpu.vector_store %arg6[%c6_186, %c0_187, %c0_188, %c0_189], %410 {strides = array<i32>} : memref<9x2x32x32xf32, #tpu.memory_space<vmem>>, vector<1x2x32x32xf32>,
    %c6_190 = arith.constant 6 : index
    %c0_191 = arith.constant 0 : index
    %c0_192 = arith.constant 0 : index
    %411 = vector.load %arg1[%c6_190, %c0_191, %c0_192] : memref<8x2x32xf32, #tpu.memory_space<vmem>>, vector<1x2x32xf32>
    %412 = vector.shape_cast %411 : vector<1x2x32xf32> to vector<2x32xf32>
    %cst_193 = arith.constant 1.000000e+00 : f32
    %413 = vector.broadcast %cst_193 : f32 to vector<2x32x32xf32>
    %414 = arith.subf %413, %380 : vector<2x32x32xf32>
    %cst_194 = arith.constant 5.000000e-02 : f32
    %415 = vector.broadcast %cst_194 : f32 to vector<2x32x32xf32>
    %416 = arith.mulf %415, %414 : vector<2x32x32xf32>
    %417 = arith.addf %380, %416 : vector<2x32x32xf32>
    %418 = arith.mulf %384, %380 : vector<2x32x32xf32>
    %cst_195 = arith.constant 0.00999999977 : f32
    %419 = vector.broadcast %cst_195 : f32 to vector<2x32x32xf32>
    %420 = arith.mulf %419, %418 : vector<2x32x32xf32>
    %421 = vector.shape_cast %401 : vector<2x32xf32> to vector<2x32x1xf32>
    %422 = vector.broadcast %421 : vector<2x32x1xf32> to vector<2x32x32xf32>
    %423 = arith.mulf %420, %422 : vector<2x32x32xf32>
    %424 = arith.subf %417, %423 : vector<2x32x32xf32>
    %cst_196 = arith.constant dense<0.000000e+00> : vector<2xf32>
    %425 = vector.multi_reduction <add>, %401, %cst_196 [1] : vector<2x32xf32> to vector<2xf32>
    %426 = vector.shape_cast %425 : vector<2xf32> to vector<2x1x1xf32>
    %427 = vector.shape_cast %401 : vector<2x32xf32> to vector<2x1x32xf32>
    %428 = vector.broadcast %427 : vector<2x1x32xf32> to vector<2x32x32xf32>
    %429 = arith.mulf %384, %428 : vector<2x32x32xf32>
    %cst_197 = arith.constant dense<0.000000e+00> : vector<2x32xf32>
    %430 = vector.multi_reduction <add>, %429, %cst_197 [2] : vector<2x32x32xf32> to vector<2x32xf32>
    %431 = vector.shape_cast %430 : vector<2x32xf32> to vector<2x32x1xf32>
    %cst_198 = arith.constant 4.500000e-01 : f32
    %432 = vector.broadcast %cst_198 : f32 to vector<2x32x32xf32>
    %433 = arith.subf %432, %384 : vector<2x32x32xf32>
    %cst_199 = arith.constant 5.000000e-02 : f32
    %434 = vector.broadcast %cst_199 : f32 to vector<2x32x32xf32>
    %435 = arith.mulf %434, %433 : vector<2x32x32xf32>
    %436 = arith.addf %384, %435 : vector<2x32x32xf32>
    %437 = vector.broadcast %426 : vector<2x1x1xf32> to vector<2x32x1xf32>
    %438 = arith.subf %437, %431 : vector<2x32x1xf32>
    %cst_200 = arith.constant 4.500000e-03 : f32
    %439 = vector.broadcast %cst_200 : f32 to vector<2x32x1xf32>
    %440 = arith.mulf %439, %438 : vector<2x32x1xf32>
    %441 = vector.broadcast %440 : vector<2x32x1xf32> to vector<2x32x32xf32>
    %442 = arith.addf %436, %441 : vector<2x32x32xf32>
    %cst_201 = arith.constant 0.000000e+00 : f32
    %cst_202 = arith.constant 1.000000e+00 : f32
    %443 = vector.broadcast %cst_201 : f32 to vector<2x32x32xf32>
    %444 = arith.maximumf %443, %424 : vector<2x32x32xf32>
    %445 = vector.broadcast %cst_202 : f32 to vector<2x32x32xf32>
    %446 = arith.minimumf %445, %444 : vector<2x32x32xf32>
    %cst_203 = arith.constant 0.000000e+00 : f32
    %cst_204 = arith.constant 1.000000e+00 : f32
    %447 = vector.broadcast %cst_203 : f32 to vector<2x32x32xf32>
    %448 = arith.maximumf %447, %442 : vector<2x32x32xf32>
    %449 = vector.broadcast %cst_204 : f32 to vector<2x32x32xf32>
    %450 = arith.minimumf %449, %448 : vector<2x32x32xf32>
    %451 = arith.mulf %446, %450 : vector<2x32x32xf32>
    %452 = vector.broadcast %13 : vector<1x32x32xf32> to vector<2x32x32xf32>
    %453 = arith.mulf %451, %452 : vector<2x32x32xf32>
    %454 = vector.shape_cast %401 : vector<2x32xf32> to vector<2x32x1xf32>
    %455 = vector.broadcast %454 : vector<2x32x1xf32> to vector<2x32x32xf32>
    %456 = arith.mulf %455, %453 : vector<2x32x32xf32>
    %cst_205 = arith.constant dense<0.000000e+00> : vector<2x32xf32>
    %457 = vector.multi_reduction <add>, %456, %cst_205 [1] : vector<2x32x32xf32> to vector<2x32xf32>
    %cst_206 = arith.constant 0.899999976 : f32
    %458 = vector.broadcast %cst_206 : f32 to vector<2x32xf32>
    %459 = arith.mulf %458, %401 : vector<2x32xf32>
    %460 = vector.broadcast %14 : vector<1x32xf32> to vector<2x32xf32>
    %461 = arith.addf %457, %460 : vector<2x32xf32>
    %cst_207 = arith.constant 1.000000e-01 : f32
    %462 = vector.broadcast %cst_207 : f32 to vector<2x32xf32>
    %463 = arith.mulf %462, %461 : vector<2x32xf32>
    %464 = arith.addf %459, %463 : vector<2x32xf32>
    %465 = arith.addf %464, %412 : vector<2x32xf32>
    %cst_208 = arith.constant 0.000000e+00 : f32
    %466 = vector.broadcast %cst_208 : f32 to vector<2x32xf32>
    %467 = arith.maximumf %465, %466 : vector<2x32xf32>
    %c7 = arith.constant 7 : index
    %c0_209 = arith.constant 0 : index
    %c0_210 = arith.constant 0 : index
    %468 = vector.load %arg4[%c7, %c0_209, %c0_210] : memref<9x2x32xf32, #tpu.memory_space<vmem>>, vector<1x2x32xf32>
    %469 = vector.shape_cast %468 : vector<1x2x32xf32> to vector<2x32xf32>
    %470 = vector.shape_cast %467 : vector<2x32xf32> to vector<1x2x32xf32>
    tpu.vector_store %arg4[%c7, %c0_209, %c0_210], %470 {strides = array<i32>} : memref<9x2x32xf32, #tpu.memory_space<vmem>>, vector<1x2x32xf32>,
    %c7_211 = arith.constant 7 : index
    %c0_212 = arith.constant 0 : index
    %c0_213 = arith.constant 0 : index
    %c0_214 = arith.constant 0 : index
    %471 = vector.load %arg5[%c7_211, %c0_212, %c0_213, %c0_214] : memref<9x2x32x32xf32, #tpu.memory_space<vmem>>, vector<1x2x32x32xf32>
    %472 = vector.shape_cast %471 : vector<1x2x32x32xf32> to vector<2x32x32xf32>
    %473 = vector.shape_cast %446 : vector<2x32x32xf32> to vector<1x2x32x32xf32>
    tpu.vector_store %arg5[%c7_211, %c0_212, %c0_213, %c0_214], %473 {strides = array<i32>} : memref<9x2x32x32xf32, #tpu.memory_space<vmem>>, vector<1x2x32x32xf32>,
    %c7_215 = arith.constant 7 : index
    %c0_216 = arith.constant 0 : index
    %c0_217 = arith.constant 0 : index
    %c0_218 = arith.constant 0 : index
    %474 = vector.load %arg6[%c7_215, %c0_216, %c0_217, %c0_218] : memref<9x2x32x32xf32, #tpu.memory_space<vmem>>, vector<1x2x32x32xf32>
    %475 = vector.shape_cast %474 : vector<1x2x32x32xf32> to vector<2x32x32xf32>
    %476 = vector.shape_cast %450 : vector<2x32x32xf32> to vector<1x2x32x32xf32>
    tpu.vector_store %arg6[%c7_215, %c0_216, %c0_217, %c0_218], %476 {strides = array<i32>} : memref<9x2x32x32xf32, #tpu.memory_space<vmem>>, vector<1x2x32x32xf32>,
    %c7_219 = arith.constant 7 : index
    %c0_220 = arith.constant 0 : index
    %c0_221 = arith.constant 0 : index
    %477 = vector.load %arg1[%c7_219, %c0_220, %c0_221] : memref<8x2x32xf32, #tpu.memory_space<vmem>>, vector<1x2x32xf32>
    %478 = vector.shape_cast %477 : vector<1x2x32xf32> to vector<2x32xf32>
    %cst_222 = arith.constant 1.000000e+00 : f32
    %479 = vector.broadcast %cst_222 : f32 to vector<2x32x32xf32>
    %480 = arith.subf %479, %446 : vector<2x32x32xf32>
    %cst_223 = arith.constant 5.000000e-02 : f32
    %481 = vector.broadcast %cst_223 : f32 to vector<2x32x32xf32>
    %482 = arith.mulf %481, %480 : vector<2x32x32xf32>
    %483 = arith.addf %446, %482 : vector<2x32x32xf32>
    %484 = arith.mulf %450, %446 : vector<2x32x32xf32>
    %cst_224 = arith.constant 0.00999999977 : f32
    %485 = vector.broadcast %cst_224 : f32 to vector<2x32x32xf32>
    %486 = arith.mulf %485, %484 : vector<2x32x32xf32>
    %487 = vector.shape_cast %467 : vector<2x32xf32> to vector<2x32x1xf32>
    %488 = vector.broadcast %487 : vector<2x32x1xf32> to vector<2x32x32xf32>
    %489 = arith.mulf %486, %488 : vector<2x32x32xf32>
    %490 = arith.subf %483, %489 : vector<2x32x32xf32>
    %cst_225 = arith.constant dense<0.000000e+00> : vector<2xf32>
    %491 = vector.multi_reduction <add>, %467, %cst_225 [1] : vector<2x32xf32> to vector<2xf32>
    %492 = vector.shape_cast %491 : vector<2xf32> to vector<2x1x1xf32>
    %493 = vector.shape_cast %467 : vector<2x32xf32> to vector<2x1x32xf32>
    %494 = vector.broadcast %493 : vector<2x1x32xf32> to vector<2x32x32xf32>
    %495 = arith.mulf %450, %494 : vector<2x32x32xf32>
    %cst_226 = arith.constant dense<0.000000e+00> : vector<2x32xf32>
    %496 = vector.multi_reduction <add>, %495, %cst_226 [2] : vector<2x32x32xf32> to vector<2x32xf32>
    %497 = vector.shape_cast %496 : vector<2x32xf32> to vector<2x32x1xf32>
    %cst_227 = arith.constant 4.500000e-01 : f32
    %498 = vector.broadcast %cst_227 : f32 to vector<2x32x32xf32>
    %499 = arith.subf %498, %450 : vector<2x32x32xf32>
    %cst_228 = arith.constant 5.000000e-02 : f32
    %500 = vector.broadcast %cst_228 : f32 to vector<2x32x32xf32>
    %501 = arith.mulf %500, %499 : vector<2x32x32xf32>
    %502 = arith.addf %450, %501 : vector<2x32x32xf32>
    %503 = vector.broadcast %492 : vector<2x1x1xf32> to vector<2x32x1xf32>
    %504 = arith.subf %503, %497 : vector<2x32x1xf32>
    %cst_229 = arith.constant 4.500000e-03 : f32
    %505 = vector.broadcast %cst_229 : f32 to vector<2x32x1xf32>
    %506 = arith.mulf %505, %504 : vector<2x32x1xf32>
    %507 = vector.broadcast %506 : vector<2x32x1xf32> to vector<2x32x32xf32>
    %508 = arith.addf %502, %507 : vector<2x32x32xf32>
    %cst_230 = arith.constant 0.000000e+00 : f32
    %cst_231 = arith.constant 1.000000e+00 : f32
    %509 = vector.broadcast %cst_230 : f32 to vector<2x32x32xf32>
    %510 = arith.maximumf %509, %490 : vector<2x32x32xf32>
    %511 = vector.broadcast %cst_231 : f32 to vector<2x32x32xf32>
    %512 = arith.minimumf %511, %510 : vector<2x32x32xf32>
    %cst_232 = arith.constant 0.000000e+00 : f32
    %cst_233 = arith.constant 1.000000e+00 : f32
    %513 = vector.broadcast %cst_232 : f32 to vector<2x32x32xf32>
    %514 = arith.maximumf %513, %508 : vector<2x32x32xf32>
    %515 = vector.broadcast %cst_233 : f32 to vector<2x32x32xf32>
    %516 = arith.minimumf %515, %514 : vector<2x32x32xf32>
    %517 = arith.mulf %512, %516 : vector<2x32x32xf32>
    %518 = vector.broadcast %13 : vector<1x32x32xf32> to vector<2x32x32xf32>
    %519 = arith.mulf %517, %518 : vector<2x32x32xf32>
    %520 = vector.shape_cast %467 : vector<2x32xf32> to vector<2x32x1xf32>
    %521 = vector.broadcast %520 : vector<2x32x1xf32> to vector<2x32x32xf32>
    %522 = arith.mulf %521, %519 : vector<2x32x32xf32>
    %cst_234 = arith.constant dense<0.000000e+00> : vector<2x32xf32>
    %523 = vector.multi_reduction <add>, %522, %cst_234 [1] : vector<2x32x32xf32> to vector<2x32xf32>
    %cst_235 = arith.constant 0.899999976 : f32
    %524 = vector.broadcast %cst_235 : f32 to vector<2x32xf32>
    %525 = arith.mulf %524, %467 : vector<2x32xf32>
    %526 = vector.broadcast %14 : vector<1x32xf32> to vector<2x32xf32>
    %527 = arith.addf %523, %526 : vector<2x32xf32>
    %cst_236 = arith.constant 1.000000e-01 : f32
    %528 = vector.broadcast %cst_236 : f32 to vector<2x32xf32>
    %529 = arith.mulf %528, %527 : vector<2x32xf32>
    %530 = arith.addf %525, %529 : vector<2x32xf32>
    %531 = arith.addf %530, %478 : vector<2x32xf32>
    %cst_237 = arith.constant 0.000000e+00 : f32
    %532 = vector.broadcast %cst_237 : f32 to vector<2x32xf32>
    %533 = arith.maximumf %531, %532 : vector<2x32xf32>
    %c8 = arith.constant 8 : index
    %c0_238 = arith.constant 0 : index
    %c0_239 = arith.constant 0 : index
    %534 = vector.load %arg4[%c8, %c0_238, %c0_239] : memref<9x2x32xf32, #tpu.memory_space<vmem>>, vector<1x2x32xf32>
    %535 = vector.shape_cast %534 : vector<1x2x32xf32> to vector<2x32xf32>
    %536 = vector.shape_cast %533 : vector<2x32xf32> to vector<1x2x32xf32>
    tpu.vector_store %arg4[%c8, %c0_238, %c0_239], %536 {strides = array<i32>} : memref<9x2x32xf32, #tpu.memory_space<vmem>>, vector<1x2x32xf32>,
    %c8_240 = arith.constant 8 : index
    %c0_241 = arith.constant 0 : index
    %c0_242 = arith.constant 0 : index
    %c0_243 = arith.constant 0 : index
    %537 = vector.load %arg5[%c8_240, %c0_241, %c0_242, %c0_243] : memref<9x2x32x32xf32, #tpu.memory_space<vmem>>, vector<1x2x32x32xf32>
    %538 = vector.shape_cast %537 : vector<1x2x32x32xf32> to vector<2x32x32xf32>
    %539 = vector.shape_cast %512 : vector<2x32x32xf32> to vector<1x2x32x32xf32>
    tpu.vector_store %arg5[%c8_240, %c0_241, %c0_242, %c0_243], %539 {strides = array<i32>} : memref<9x2x32x32xf32, #tpu.memory_space<vmem>>, vector<1x2x32x32xf32>,
    %c8_244 = arith.constant 8 : index
    %c0_245 = arith.constant 0 : index
    %c0_246 = arith.constant 0 : index
    %c0_247 = arith.constant 0 : index
    %540 = vector.load %arg6[%c8_244, %c0_245, %c0_246, %c0_247] : memref<9x2x32x32xf32, #tpu.memory_space<vmem>>, vector<1x2x32x32xf32>
    %541 = vector.shape_cast %540 : vector<1x2x32x32xf32> to vector<2x32x32xf32>
    %542 = vector.shape_cast %516 : vector<2x32x32xf32> to vector<1x2x32x32xf32>
    tpu.vector_store %arg6[%c8_244, %c0_245, %c0_246, %c0_247], %542 {strides = array<i32>} : memref<9x2x32x32xf32, #tpu.memory_space<vmem>>, vector<1x2x32x32xf32>,
    return
  }
  func.func @transform_0(%arg0: i32) -> (i32, i32, i32) {
    %c0_i32 = arith.constant 0 : i32
    %c0_i32_0 = arith.constant 0 : i32
    %c0_i32_1 = arith.constant 0 : i32
    %c0_i32_2 = arith.constant 0 : i32
    return %c0_i32, %c0_i32_0, %c0_i32_1 : i32, i32, i32
  }
  func.func @transform_1(%arg0: i32) -> (i32, i32) {
    %c0_i32 = arith.constant 0 : i32
    %c0_i32_0 = arith.constant 0 : i32
    %c0_i32_1 = arith.constant 0 : i32
    return %c0_i32, %c0_i32_0 : i32, i32
  }
  func.func @transform_2(%arg0: i32) -> (i32, i32) {
    %c0_i32 = arith.constant 0 : i32
    %c0_i32_0 = arith.constant 0 : i32
    %c0_i32_1 = arith.constant 0 : i32
    return %c0_i32, %c0_i32_0 : i32, i32
  }
  func.func @transform_3(%arg0: i32) -> (i32, i32, i32) {
    %c0_i32 = arith.constant 0 : i32
    %c0_i32_0 = arith.constant 0 : i32
    %c0_i32_1 = arith.constant 0 : i32
    %c0_i32_2 = arith.constant 0 : i32
    return %c0_i32, %c0_i32_0, %c0_i32_1 : i32, i32, i32
  }
  func.func @transform_4(%arg0: i32) -> (i32, i32, i32, i32) {
    %c0_i32 = arith.constant 0 : i32
    %c0_i32_0 = arith.constant 0 : i32
    %c0_i32_1 = arith.constant 0 : i32
    %c0_i32_2 = arith.constant 0 : i32
    %c0_i32_3 = arith.constant 0 : i32
    return %c0_i32, %c0_i32_0, %c0_i32_1, %c0_i32_2 : i32, i32, i32, i32
  }
  func.func @transform_5(%arg0: i32) -> (i32, i32, i32, i32) {
    %c0_i32 = arith.constant 0 : i32
    %c0_i32_0 = arith.constant 0 : i32
    %c0_i32_1 = arith.constant 0 : i32
    %c0_i32_2 = arith.constant 0 : i32
    %c0_i32_3 = arith.constant 0 : i32
    return %c0_i32, %c0_i32_0, %c0_i32_1, %c0_i32_2 : i32, i32, i32, i32
  }
}

</mosaic_0001>

<bundles_post_ra>
// kernel: tpu_custom_call.1
= control target key start
LH: loop header
LB: loop body
LE: loop exit
PB: predicated region body
PF: predicated region fallthrough
CT: control target
= control target key end

     0   :  { %11 = vsyncpa [#allocation3], 0  ;;  %s3404_s0 = inlined_call_operand.hbm [shape: f32[8,2,32], index: 0, kind: input, shape index: {}]   ;;  %s3405_s1 = inlined_call_operand.hbm [shape: f32[32,32], index: 1, kind: input, shape index: {}]   ;;  %s3406_s2 = inlined_call_operand.vmem [shape: f32[1,32], index: 2, kind: input, shape index: {}]   ;;  %s3407_s3 = inlined_call_operand.hbm [shape: f32[9,2,32], index: 3, kind: output, shape index: {0}]   ;;  %s3408_s4 = inlined_call_operand.hbm [shape: f32[9,2,32,32], index: 4, kind: output, shape index: {1}]   ;;  %s3409_s5 = inlined_call_operand.hbm [shape: f32[9,2,32,32], index: 5, kind: output, shape index: {2}]  }
   0x1   :  { %12 = vsyncpa [#allocation6], 0 }
   0x2   :  { %13 = vsyncpa [#allocation4], 0 }
   0x3   :  { %14 = vsyncpa [#allocation9], 0  ;;  %s1930_s18 = smov [#allocation2]   ;;  %s1812_s22 = scalar_lea.hbm %s3404_s0, 256 }
   0x4   :  { %s20_s19 = sshll.u32 %s1930_s18, 4  ;;  %p1813_p0 = scmp.ne.s32.totalorder %s3404_s0, %s1812_s22  ;;  %s21_s19 = int_to_ptr.vmem [resolvable:$true] %s20_s19 }
   0x5   :  { %p1816_p1 = scmp.lt.u32.totalorder %s1812_s22, %s3404_s0 }
   0x7   :  { %p1818_p2 = pnand %p1816_p1, %p1813_p0 }
   0x9   :  { %1821 = shalt.err (!%p1818_p2)
}
   0xa   :  { %s1822_s27 = scalar_lea.vmem %s21_s19, 256  ;;  %p1827_p4 = scmp.lt.s32.totalorder %s21_s19, %s21_s19 }
   0xb   :  { %p1823_p3 = scmp.ne.s32.totalorder %s21_s19, %s1822_s27  ;;  %p1828_p5 = scmp.lt.s32.totalorder %s1822_s27, %s1822_s27 }
   0xd   :  { %p1829_p6 = por %p1828_p5, %p1827_p4 }
   0xf   :  { %p1830_p7 = pnand %p1829_p6, %p1823_p3 }
  0x11   :  { %1833 = shalt.err (!%p1830_p7)
}
  0x12   :  { %s1931_s28 = smov 32   ;;  %s1932_s29 = smov 2  }
  0x13   :  { %26 = dma.hbm_to_vmem [thread:$0]  %s3404_s0, 256, %s21_s19, [#allocation3], %s1931_s28, %s1931_s28, %s1932_s29  }
  0x14   :  { %s1933_s7 = smov [#allocation5]   ;;  %s1834_s11 = scalar_lea.hbm %s3405_s1, 512 }
  0x15   :  { %s32_s8 = sshll.u32 %s1933_s7, 4  ;;  %p1835_p8 = scmp.ne.s32.totalorder %s3405_s1, %s1834_s11  ;;  %s33_s8 = int_to_ptr.vmem [resolvable:$true] %s32_s8 }
  0x16   :  { %p1838_p9 = scmp.lt.u32.totalorder %s1834_s11, %s3405_s1 }
  0x18   :  { %p1840_p10 = pnand %p1838_p9, %p1835_p8 }
  0x1a   :  { %1843 = shalt.err (!%p1840_p10)
}
  0x1b   :  { %s1844_s16 = scalar_lea.vmem %s33_s8, 512  ;;  %p1849_p12 = scmp.lt.s32.totalorder %s33_s8, %s33_s8 }
  0x1c   :  { %p1845_p11 = scmp.ne.s32.totalorder %s33_s8, %s1844_s16  ;;  %p1850_p13 = scmp.lt.s32.totalorder %s1844_s16, %s1844_s16 }
  0x1e   :  { %p1851_p0 = por %p1850_p13, %p1849_p12 }
  0x20   :  { %p1852_p1 = pnand %p1851_p0, %p1845_p11 }
  0x22   :  { %1855 = shalt.err (!%p1852_p1)
}
  0x23   :  { %s1934_s0 = smov 128   ;;  %s1935_s17 = smov 8  }
  0x24   :  { %38 = dma.hbm_to_vmem [thread:$0]  %s3405_s1, 512, %s33_s8, [#allocation6], %s1934_s0, %s1934_s0, %s1935_s17  }
  0x25   :  { %1922 = dma.done.wait [#allocation3], 256  }
  0x26   :  { %1923 = vsyncadd [#allocation3], 4294967040 }
  0x27   :  { %1924 = dma.done.wait [#allocation6], 512  }
  0x28   :  { %1925 = vsyncadd [#allocation6], 4294966784  ;;  %v1936_v0 = vmov 0.0   ;;  %vm47_vm0 = vcmask 254976   ;;  %v2003_v6 = vld [vmem:[#allocation5] sm:$0xff]  ;;  %vm49_vm1 = vcmask 261120   ;;  %v146_v31 = vlaneseq }
  0x29   :  { %72 = vadd.xlane.f32.xlu0 %v1936_v0  ;;  %48 = vst.msk [vmem:[#allocation7] sm:$0x3] %vm47_vm0, %v1936_v0  ;;  %v2005_v7 = vld [vmem:[#allocation5 + $0x8] sm:$0xff]  ;;  %v2007_v8 = vld [vmem:[#allocation5 + $0x10] sm:$0xff]  ;;  %v2009_v9 = vld [vmem:[#allocation5 + $0x18] sm:$0xff]  ;;  %vm120_vm2 = vcmask 1041409  }
  0x2a   :  { %v2044_v32 = vld [vmem:[%s3406_s2] ss:$0 sm:$0xff]  ;;  %v2047_v37 = vshrl.u32 %v146_v31, 7  ;;  %s1940_s26 = smov [#allocation10]  }
  0x2b   :  { %v71_v33 = vld [vmem:[#allocation2] sm:$0x3]  ;;  %s1769_s27 = sshll.u32 %s1940_s26, 4  ;;  %s3296_s27 = int_to_ptr.vmem [resolvable:$true] %s1769_s27 }
  0x2c   :  { %v110_v36 = vrot.slane %v71_v33, 1  ;;  %v2050_v40 = vsub.s32 0, %v2047_v37 }
  0xb6   :  { %v73_v1 = vpop.xlane.xlu0 %72 }
  0xb7   :  { %v74_v2 = vsub.f32 %v73_v1, %v73_v1 }
  0xb9   :  { %v75_v3 = vmul.f32 0.0045, %v74_v2 }
  0xbb   :  { %v76_v4 = vadd.f32 1.2574999, %v75_v3 }
  0xbd   :  { %v77_v5 = vmax.f32 %v76_v4, 0.0 }
  0xbf   :  { %v2011_v10 = vmin.f32 %v77_v5, 1.0 }
  0xc1   :  { %v79_v11 = vmul.f32 %v2011_v10, %v2003_v6  ;;  %v80_v12 = vmul.f32 %v2011_v10, %v2005_v7  ;;  %v81_v13 = vmul.f32 %v2011_v10, %v2007_v8  ;;  %v82_v14 = vmul.f32 %v2011_v10, %v2009_v9  ;;  %135 = vst.msk [vmem:[#allocation10 + $0x40] sm:$0xff] %vm49_vm1, %v2011_v10 }
  0xc2   :  { %136 = vst.msk [vmem:[#allocation10 + $0x48] sm:$0xff] %vm49_vm1, %v2011_v10  ;;  %137 = vst.msk [vmem:[#allocation10 + $0x50] sm:$0xff] %vm49_vm1, %v2011_v10  ;;  %v145_v53 = vmul.f32 0.01, %v2011_v10 }
  0xc3   :  { %138 = vst.msk [vmem:[#allocation10 + $0x58] sm:$0xff] %vm49_vm1, %v2011_v10  ;;  %139 = vst.msk [vmem:[#allocation10 + $0x60] sm:$0xff] %vm49_vm1, %v2011_v10  ;;  %v83_v15 = vmul.f32 0.0, %v79_v11  ;;  %v84_v16 = vmul.f32 0.0, %v80_v12  ;;  %v85_v17 = vmul.f32 0.0, %v81_v13  ;;  %v86_v18 = vmul.f32 0.0, %v82_v14 }
  0xc4   :  { %140 = vst.msk [vmem:[#allocation10 + $0x68] sm:$0xff] %vm49_vm1, %v2011_v10  ;;  %141 = vst.msk [vmem:[#allocation10 + $0x70] sm:$0xff] %vm49_vm1, %v2011_v10 }
  0xc5   :  { %142 = vst.msk [vmem:[#allocation10 + $0x78] sm:$0xff] %vm49_vm1, %v2011_v10  ;;  %v87_v19 = vsel %vm49_vm1, %v83_v15, 0.0  ;;  %v88_v20 = vsel %vm49_vm1, %v84_v16, 0.0  ;;  %v90_v22 = vsel %vm49_vm1, %v85_v17, 0.0  ;;  %v92_v24 = vsel %vm49_vm1, %v86_v18, 0.0 }
  0xc6   :  { %v89_v21 = vadd.f32 %v88_v20, %v87_v19 }
  0xc8   :  { %v91_v23 = vadd.f32 %v90_v22, %v89_v21 }
  0xca   :  { %v93_v25 = vadd.f32 %v92_v24, %v91_v23 }
  0xcc   :  { %v94_v26 = vrot.slane %v93_v25, 4 }
  0xce   :  { %v95_v27 = vadd.f32 %v94_v26, %v93_v25 }
  0xd0   :  { %v96_v28 = vrot.slane %v95_v27, 2 }
  0xd2   :  { %v97_v29 = vadd.f32 %v96_v28, %v95_v27 }
  0xd4   :  { %v98_v30 = vrot.slane %v97_v29, 1 }
  0xd6   :  { %v99_v34 = vadd.f32 %v98_v30, %v97_v29  ;;  %v2113_v29 = vsub.s32 1, %v2047_v37  ;;  %v222_v30 = vsub.f32 0.45, %v2011_v10 }
  0xd8   :  { %v106_v35 = vadd.f32 %v2044_v32, %v99_v34 }
  0xda   :  { %v107_v38 = vmul.f32 0.1, %v106_v35  ;;  %v223_v35 = vmul.f32 0.05, %v222_v30 }
  0xdc   :  { %v114_v39 = vadd.f32 %v110_v36, %v107_v38  ;;  %v113_v41 = vadd.f32 %v107_v38, %v71_v33 }
  0xde   :  { %v2052_v42 = vmax.f32 %v114_v39, 0.0  ;;  %v2056_v44 = vmax.f32 %v113_v41, 0.0  ;;  %v224_v41 = vadd.f32 %v223_v35, %v2011_v10 }
  0xe0   :  { %v168_v43 = vrot.slane %v2052_v42, %v2050_v40  ;;  %v119_v45 = vrot.slane %v2052_v42, 7  ;;  %v149_v47 = vrot.slane %v2056_v44, %v2050_v40 }
  0xe2   :  { %174 = vbcast.lane.b32.xlu1 %v168_v43, 264  ;;  %170 = vbcast.lane.b32.xlu0 %v168_v43, 256  ;;  %v121_v46 = vsel %vm120_vm2, %v119_v45, %v2056_v44  ;;  %v215_v49 = vmul.f32 %v168_v43, %v2011_v10  ;;  %v214_v51 = vmul.f32 %v149_v47, %v2011_v10 }
  0xe3   :  { %124 = vst.msk [vmem:[#allocation7 + $0x2] sm:$0x3] %vm47_vm0, %v121_v46  ;;  %v200_v48 = vsel %vm47_vm0, %v121_v46, 0.0 }
  0xe4   :  { %v219_v50 = vsel %vm49_vm1, %v215_v49, 0.0  ;;  %v216_v52 = vsel %vm49_vm1, %v214_v51, 0.0 }
  0xe6   :  { %178 = vbcast.lane.b32.xlu0 %v168_v43, 272  ;;  %151 = vbcast.lane.b32.xlu1 %v149_v47, 256 }
  0xea   :  { %155 = vbcast.lane.b32.xlu1 %v149_v47, 264 }
  0xee   :  { %159 = vbcast.lane.b32.xlu1 %v149_v47, 272 }
 0x105   :  { %201 = vadd.xlane.f32.xlu0 %v200_v48 }
 0x112   :  { %220 = vadd.xlane.f32.xlu1 %v219_v50 }
 0x116   :  { %217 = vadd.xlane.f32.xlu1 %v216_v52 }
 0x11b   :  { %182 = vbcast.lane.b32.xlu0 %v168_v43, 280 }
 0x127   :  { %163 = vbcast.lane.b32.xlu1 %v149_v47, 280 }
 0x154   :  { %v2070_v54 = vpop.permute.xlu1 %174  ;;  %v2072_v55 = vpop.permute.xlu0 %170 }
 0x155   :  { %v189_v56 = vmul.f32 %v2070_v54, %v145_v53  ;;  %v188_v57 = vmul.f32 %v2072_v55, %v145_v53 }
 0x157   :  { %v197_v58 = vsub.f32 1.0, %v189_v56  ;;  %v196_v59 = vsub.f32 1.0, %v188_v57 }
 0x158   :  { %v2076_v60 = vpop.permute.xlu0 %178  ;;  %v2078_v61 = vpop.permute.xlu1 %151 }
 0x159   :  { %v236_v62 = vmax.f32 %v197_v58, 0.0  ;;  %v235_v63 = vmax.f32 %v196_v59, 0.0  ;;  %v190_v0 = vmul.f32 %v2076_v60, %v145_v53  ;;  %v184_v1 = vmul.f32 %v2078_v61, %v145_v53 }
 0x15b   :  { %v2082_v2 = vmin.f32 %v236_v62, 1.0  ;;  %v2084_v3 = vmin.f32 %v235_v63, 1.0  ;;  %v198_v4 = vsub.f32 1.0, %v190_v0  ;;  %v192_v5 = vsub.f32 1.0, %v184_v1 }
 0x15c   :  { %v2086_v11 = vpop.permute.xlu1 %155 }
 0x15d   :  { %330 = vst.msk [vmem:[#allocation8 + $0xa8] sm:$0xff] %vm49_vm1, %v2082_v2  ;;  %329 = vst.msk [vmem:[#allocation8 + $0xa0] sm:$0xff] %vm49_vm1, %v2084_v3  ;;  %v237_v12 = vmax.f32 %v198_v4, 0.0  ;;  %v231_v13 = vmax.f32 %v192_v5, 0.0  ;;  %v185_v14 = vmul.f32 %v2086_v11, %v145_v53 }
 0x15f   :  { %v2093_v15 = vmin.f32 %v237_v12, 1.0  ;;  %v2095_v16 = vmin.f32 %v231_v13, 1.0  ;;  %v193_v17 = vsub.f32 1.0, %v185_v14 }
 0x160   :  { %v2097_v18 = vpop.permute.xlu1 %159 }
 0x161   :  { %331 = vst.msk [vmem:[#allocation8 + $0xb0] sm:$0xff] %vm49_vm1, %v2093_v15  ;;  %325 = vst.msk [vmem:[#allocation8 + $0x80] sm:$0xff] %vm49_vm1, %v2095_v16  ;;  %v232_v19 = vmax.f32 %v193_v17, 0.0  ;;  %v186_v20 = vmul.f32 %v2097_v18, %v145_v53 }
 0x163   :  { %v2104_v21 = vmin.f32 %v232_v19, 1.0  ;;  %v194_v22 = vsub.f32 1.0, %v186_v20 }
 0x165   :  { %326 = vst.msk [vmem:[#allocation8 + $0x88] sm:$0xff] %vm49_vm1, %v2104_v21  ;;  %v233_v23 = vmax.f32 %v194_v22, 0.0 }
 0x167   :  { %v2108_v24 = vmin.f32 %v233_v23, 1.0 }
 0x169   :  { %327 = vst.msk [vmem:[#allocation8 + $0x90] sm:$0xff] %vm49_vm1, %v2108_v24 }
 0x192   :  { %v202_v25 = vpop.xlane.xlu0 %201 }
 0x193   :  { %v211_v34 = vrot.slane %v202_v25, %v2113_v29  ;;  %v207_v39 = vrot.slane %v202_v25, %v2050_v40 }
 0x196   :  { %v183_v26 = vpop.permute.xlu0 %182 }
 0x197   :  { %v191_v27 = vmul.f32 %v183_v26, %v145_v53 }
 0x199   :  { %v199_v28 = vsub.f32 1.0, %v191_v27 }
 0x19b   :  { %v238_v31 = vmax.f32 %v199_v28, 0.0 }
 0x19d   :  { %v2116_v33 = vmin.f32 %v238_v31, 1.0 }
 0x19f   :  { %332 = vst.msk [vmem:[#allocation8 + $0xb8] sm:$0xff] %vm49_vm1, %v2116_v33  ;;  %v221_v36 = vpop.xlane.xlu1 %220 }
 0x1a0   :  { %v226_v38 = vsub.f32 %v211_v34, %v221_v36 }
 0x1a2   :  { %v228_v43 = vmul.f32 0.0045, %v226_v38 }
 0x1a3   :  { %v218_v37 = vpop.xlane.xlu1 %217 }
 0x1a4   :  { %v230_v45 = vadd.f32 %v228_v43, %v224_v41  ;;  %v225_v46 = vsub.f32 %v207_v39, %v218_v37 }
 0x1a6   :  { %v248_v47 = vmax.f32 %v230_v45, 0.0  ;;  %v227_v48 = vmul.f32 0.0045, %v225_v46 }
 0x1a7   :  { %v164_v49 = vpop.permute.xlu1 %163 }
 0x1a8   :  { %v2123_v50 = vmin.f32 %v248_v47, 1.0  ;;  %v229_v51 = vadd.f32 %v227_v48, %v224_v41  ;;  %v187_v52 = vmul.f32 %v164_v49, %v145_v53 }
 0x1aa   :  { %338 = vst.msk [vmem:[#allocation10 + $0xa0] sm:$0xff] %vm49_vm1, %v2123_v50  ;;  %339 = vst.msk [vmem:[#allocation10 + $0xa8] sm:$0xff] %vm49_vm1, %v2123_v50  ;;  %v247_v10 = vmax.f32 %v229_v51, 0.0  ;;  %v195_v56 = vsub.f32 1.0, %v187_v52  ;;  %v2135_v57 = vmul.f32 %v2123_v50, %v2084_v3  ;;  %v2139_v53 = vmul.f32 %v2123_v50, %v2082_v2 }
 0x1ab   :  { %340 = vst.msk [vmem:[#allocation10 + $0xb0] sm:$0xff] %vm49_vm1, %v2123_v50  ;;  %341 = vst.msk [vmem:[#allocation10 + $0xb8] sm:$0xff] %vm49_vm1, %v2123_v50  ;;  %v2143_v58 = vmul.f32 %v2123_v50, %v2093_v15  ;;  %v2147_v59 = vmul.f32 %v2123_v50, %v2116_v33 }
 0x1ac   :  { %v2149_v62 = vmin.f32 %v247_v10, 1.0  ;;  %v234_v63 = vmax.f32 %v195_v56, 0.0  ;;  %v263_v0 = vmul.f32 %v2135_v57, %v2003_v6  ;;  %v264_v1 = vmul.f32 %v2139_v53, %v2005_v7 }
 0x1ad   :  { %v265_v4 = vmul.f32 %v2143_v58, %v2007_v8  ;;  %v266_v5 = vmul.f32 %v2147_v59, %v2009_v9 }
 0x1ae   :  { %334 = vst.msk [vmem:[#allocation10 + $0x80] sm:$0xff] %vm49_vm1, %v2149_v62  ;;  %335 = vst.msk [vmem:[#allocation10 + $0x88] sm:$0xff] %vm49_vm1, %v2149_v62  ;;  %v2167_v12 = vmin.f32 %v234_v63, 1.0  ;;  %v2171_v13 = vmul.f32 %v2149_v62, %v2095_v16  ;;  %v2175_v14 = vmul.f32 %v2149_v62, %v2104_v21  ;;  %v2179_v17 = vmul.f32 %v2149_v62, %v2108_v24 }
 0x1af   :  { %336 = vst.msk [vmem:[#allocation10 + $0x90] sm:$0xff] %vm49_vm1, %v2149_v62  ;;  %337 = vst.msk [vmem:[#allocation10 + $0x98] sm:$0xff] %vm49_vm1, %v2149_v62  ;;  %v271_v19 = vmul.f32 %v263_v0, %v2072_v55  ;;  %v272_v20 = vmul.f32 %v264_v1, %v2070_v54  ;;  %v273_v22 = vmul.f32 %v265_v4, %v2076_v60 }
 0x1b0   :  { %v2186_v23 = vmul.f32 %v2149_v62, %v2167_v12  ;;  %v259_v25 = vmul.f32 %v2171_v13, %v2003_v6  ;;  %v260_v27 = vmul.f32 %v2175_v14, %v2005_v7  ;;  %v261_v28 = vmul.f32 %v2179_v17, %v2007_v8  ;;  %328 = vst.msk [vmem:[#allocation8 + $0x98] sm:$0xff] %vm49_vm1, %v2167_v12 }
 0x1b1   :  { %v274_v55 = vmul.f32 %v266_v5, %v183_v26  ;;  %v288_v54 = vsel %vm49_vm1, %v271_v19, 0.0  ;;  %v289_v60 = vsel %vm49_vm1, %v272_v20, 0.0  ;;  %v291_v26 = vsel %vm49_vm1, %v273_v22, 0.0  ;;  %v144_v19 = vld [vmem:[#allocation2 + $0x2] sm:$0x3] }
 0x1b2   :  { %v262_v30 = vmul.f32 %v2186_v23, %v2009_v9  ;;  %v267_v31 = vmul.f32 %v259_v25, %v2078_v61  ;;  %v268_v34 = vmul.f32 %v260_v27, %v2086_v11  ;;  %v269_v35 = vmul.f32 %v261_v28, %v2097_v18 }
 0x1b3   :  { %v290_v36 = vadd.f32 %v289_v60, %v288_v54  ;;  %v293_v46 = vsel %vm49_vm1, %v274_v55, 0.0  ;;  %v302_v27 = vmul.f32 0.9, %v2052_v42  ;;  %v310_v55 = vrot.slane %v144_v19, 1 }
 0x1b4   :  { %v270_v38 = vmul.f32 %v262_v30, %v164_v49  ;;  %v275_v39 = vsel %vm49_vm1, %v267_v31, 0.0  ;;  %v276_v41 = vsel %vm49_vm1, %v268_v34, 0.0  ;;  %v278_v45 = vsel %vm49_vm1, %v269_v35, 0.0 }
 0x1b5   :  { %v277_v43 = vadd.f32 %v276_v41, %v275_v39  ;;  %v292_v37 = vadd.f32 %v291_v26, %v290_v36  ;;  %v301_v54 = vmul.f32 0.9, %v2056_v44 }
 0x1b6   :  { %v280_v11 = vsel %vm49_vm1, %v270_v38, 0.0 }
 0x1b7   :  { %v279_v47 = vadd.f32 %v278_v45, %v277_v43  ;;  %v294_v61 = vadd.f32 %v293_v46, %v292_v37 }
 0x1b9   :  { %v281_v48 = vadd.f32 %v280_v11, %v279_v47  ;;  %v295_v18 = vrot.slane %v294_v61, 4  ;;  %v349_v47 = vsub.f32 1.0, %v2082_v2  ;;  %v344_v11 = vsub.f32 1.0, %v2095_v16 }
 0x1bb   :  { %v282_v51 = vrot.slane %v281_v48, 4  ;;  %v296_v49 = vadd.f32 %v295_v18, %v294_v61  ;;  %v348_v61 = vsub.f32 1.0, %v2084_v3  ;;  %v357_v18 = vmul.f32 0.05, %v349_v47 }
 0x1bd   :  { %v283_v52 = vadd.f32 %v282_v51, %v281_v48  ;;  %v297_v10 = vrot.slane %v296_v49, 2  ;;  %v345_v48 = vsub.f32 1.0, %v2104_v21  ;;  %v356_v51 = vmul.f32 0.05, %v348_v61 }
 0x1bf   :  { %v284_v56 = vrot.slane %v283_v52, 2  ;;  %v298_v63 = vadd.f32 %v297_v10, %v296_v49  ;;  %v373_v49 = vmul.f32 0.01, %v2139_v53 }
 0x1c1   :  { %v285_v0 = vadd.f32 %v284_v56, %v283_v52  ;;  %v299_v1 = vrot.slane %v298_v63, 1  ;;  %v372_v52 = vmul.f32 0.01, %v2135_v57 }
 0x1c3   :  { %v286_v4 = vrot.slane %v285_v0, 1  ;;  %v300_v5 = vadd.f32 %v299_v1, %v298_v63  ;;  %v352_v63 = vmul.f32 0.05, %v344_v11  ;;  %v350_v1 = vsub.f32 1.0, %v2093_v15 }
 0x1c5   :  { %v287_v20 = vadd.f32 %v286_v4, %v285_v0  ;;  %v304_v22 = vadd.f32 %v2044_v32, %v300_v5  ;;  %v353_v0 = vmul.f32 0.05, %v345_v48  ;;  %v346_v4 = vsub.f32 1.0, %v2108_v24 }
 0x1c6   :  { %v365_v5 = vadd.f32 %v357_v18, %v2082_v2  ;;  %v358_v2 = vmul.f32 0.05, %v350_v1 }
 0x1c7   :  { %v303_v25 = vadd.f32 %v2044_v32, %v287_v20  ;;  %v306_v28 = vmul.f32 0.1, %v304_v22  ;;  %v364_v20 = vadd.f32 %v356_v51, %v2084_v3  ;;  %v452_v51 = vsub.f32 0.45, %v2149_v62 }
 0x1c9   :  { %v305_v60 = vmul.f32 0.1, %v303_v25  ;;  %v308_v30 = vadd.f32 %v306_v28, %v302_v27  ;;  %v368_v25 = vmul.f32 0.01, %v2171_v13  ;;  %v369_v27 = vmul.f32 0.01, %v2175_v14 }
 0x1ca   :  { %v360_v28 = vadd.f32 %v352_v63, %v2095_v16  ;;  %v374_v13 = vmul.f32 0.01, %v2143_v58  ;;  %v370_v14 = vmul.f32 0.01, %v2179_v17  ;;  %v347_v63 = vsub.f32 1.0, %v2167_v12 }
 0x1cb   :  { %v307_v31 = vadd.f32 %v305_v60, %v301_v54  ;;  %v314_v34 = vadd.f32 %v310_v55, %v308_v30  ;;  %v361_v54 = vadd.f32 %v353_v0, %v2104_v21  ;;  %v354_v30 = vmul.f32 0.05, %v346_v4 }
 0x1cc   :  { %v351_v0 = vsub.f32 1.0, %v2116_v33  ;;  %v454_v4 = vmul.f32 0.05, %v452_v51 }
 0x1cd   :  { %v2213_v35 = vmax.f32 %v314_v34, 0.0  ;;  %v313_v36 = vadd.f32 %v307_v31, %v144_v19 }
 0x1cf   :  { %v398_v38 = vrot.slane %v2213_v35, %v2050_v40  ;;  %v2217_v39 = vmax.f32 %v313_v36, 0.0  ;;  %v319_v41 = vrot.slane %v2213_v35, 7 }
 0x1d1   :  { %404 = vbcast.lane.b32.xlu1 %v398_v38, 264  ;;  %400 = vbcast.lane.b32.xlu0 %v398_v38, 256  ;;  %v379_v42 = vrot.slane %v2217_v39, %v2050_v40  ;;  %v320_v44 = vsel %vm120_vm2, %v319_v41, %v2217_v39  ;;  %v445_v26 = vmul.f32 %v398_v38, %v2123_v50 }
 0x1d2   :  { %323 = vst.msk [vmem:[#allocation7 + $0x4] sm:$0x3] %vm47_vm0, %v320_v44  ;;  %v430_v37 = vsel %vm47_vm0, %v320_v44, 0.0 }
 0x1d3   :  { %v444_v43 = vmul.f32 %v379_v42, %v2149_v62  ;;  %v449_v46 = vsel %vm49_vm1, %v445_v26, 0.0  ;;  %v362_v26 = vadd.f32 %v354_v30, %v2108_v24 }
 0x1d5   :  { %381 = vbcast.lane.b32.xlu1 %v379_v42, 256  ;;  %385 = vbcast.lane.b32.xlu0 %v379_v42, 264  ;;  %v446_v45 = vsel %vm49_vm1, %v444_v43, 0.0 }
 0x1d9   :  { %408 = vbcast.lane.b32.xlu1 %v398_v38, 272  ;;  %389 = vbcast.lane.b32.xlu0 %v379_v42, 272 }
 0x1f8   :  { %431 = vadd.xlane.f32.xlu0 %v430_v37 }
 0x1fc   :  { %447 = vadd.xlane.f32.xlu0 %v446_v45 }
 0x1fd   :  { %450 = vadd.xlane.f32.xlu1 %v449_v46 }
 0x20e   :  { %412 = vbcast.lane.b32.xlu1 %v398_v38, 280 }
 0x212   :  { %393 = vbcast.lane.b32.xlu0 %v379_v42, 280  ;;  %v366_v42 = vadd.f32 %v358_v2, %v2093_v15  ;;  %v371_v2 = vmul.f32 0.01, %v2186_v23 }
 0x243   :  { %v2236_v10 = vpop.permute.xlu1 %404  ;;  %v2238_v56 = vpop.permute.xlu0 %400 }
 0x244   :  { %v419_v19 = vmul.f32 %v2236_v10, %v373_v49  ;;  %v418_v53 = vmul.f32 %v2238_v56, %v372_v52  ;;  %v453_v52 = vsub.f32 0.45, %v2123_v50 }
 0x246   :  { %v427_v22 = vsub.f32 %v365_v5, %v419_v19  ;;  %v426_v57 = vsub.f32 %v364_v20, %v418_v53  ;;  %v455_v20 = vmul.f32 0.05, %v453_v52 }
 0x247   :  { %v2249_v55 = vpop.permute.xlu1 %381  ;;  %v2252_v60 = vpop.permute.xlu0 %385 }
 0x248   :  { %v469_v31 = vmax.f32 %v427_v22, 0.0  ;;  %v468_v3 = vmax.f32 %v426_v57, 0.0  ;;  %v414_v34 = vmul.f32 %v2249_v55, %v368_v25  ;;  %v415_v36 = vmul.f32 %v2252_v60, %v369_v27 }
 0x249   :  { %v355_v57 = vmul.f32 0.05, %v347_v63  ;;  %v359_v27 = vmul.f32 0.05, %v351_v0  ;;  %v457_v30 = vadd.f32 %v455_v20, %v2123_v50 }
 0x24a   :  { %v2258_v38 = vmin.f32 %v469_v31, 1.0  ;;  %v2260_v16 = vmin.f32 %v468_v3, 1.0  ;;  %v422_v41 = vsub.f32 %v360_v28, %v414_v34  ;;  %v423_v21 = vsub.f32 %v361_v54, %v415_v36 }
 0x24b   :  { %v2263_v44 = vpop.permute.xlu1 %408  ;;  %v2266_v43 = vpop.permute.xlu0 %389  ;;  %v456_v28 = vadd.f32 %v454_v4, %v2149_v62  ;;  %v375_v34 = vmul.f32 0.01, %v2147_v59 }
 0x24c   :  { %563 = vst.msk [vmem:[#allocation8 + $0xe8] sm:$0xff] %vm49_vm1, %v2258_v38  ;;  %562 = vst.msk [vmem:[#allocation8 + $0xe0] sm:$0xff] %vm49_vm1, %v2260_v16  ;;  %v464_v58 = vmax.f32 %v422_v41, 0.0  ;;  %v465_v17 = vmax.f32 %v423_v21, 0.0  ;;  %v420_v37 = vmul.f32 %v2263_v44, %v374_v13  ;;  %v416_v45 = vmul.f32 %v2266_v43, %v370_v14 }
 0x24d   :  { %v363_v13 = vadd.f32 %v355_v57, %v2167_v12 }
 0x24e   :  { %v2274_v46 = vmin.f32 %v464_v58, 1.0  ;;  %v2276_v15 = vmin.f32 %v465_v17, 1.0  ;;  %v428_v47 = vsub.f32 %v366_v42, %v420_v37  ;;  %v424_v24 = vsub.f32 %v362_v26, %v416_v45 }
 0x24f   :  { %v367_v42 = vadd.f32 %v359_v27, %v2116_v33 }
 0x250   :  { %558 = vst.msk [vmem:[#allocation8 + $0xc0] sm:$0xff] %vm49_vm1, %v2274_v46  ;;  %559 = vst.msk [vmem:[#allocation8 + $0xc8] sm:$0xff] %vm49_vm1, %v2276_v15  ;;  %v470_v61 = vmax.f32 %v428_v47, 0.0  ;;  %v466_v11 = vmax.f32 %v424_v24, 0.0 }
 0x252   :  { %v2282_v48 = vmin.f32 %v470_v61, 1.0  ;;  %v2284_v18 = vmin.f32 %v466_v11, 1.0 }
 0x254   :  { %564 = vst.msk [vmem:[#allocation8 + $0xf0] sm:$0xff] %vm49_vm1, %v2282_v48  ;;  %560 = vst.msk [vmem:[#allocation8 + $0xd0] sm:$0xff] %vm49_vm1, %v2284_v18 }
 0x285   :  { %v432_v49 = vpop.xlane.xlu0 %431 }
 0x286   :  { %v437_v1 = vrot.slane %v432_v49, %v2050_v40  ;;  %v441_v5 = vrot.slane %v432_v49, %v2113_v29 }
 0x289   :  { %v448_v19 = vpop.xlane.xlu0 %447 }
 0x28a   :  { %v458_v53 = vsub.f32 %v437_v1, %v448_v19  ;;  %v451_v22 = vpop.xlane.xlu1 %450 }
 0x28b   :  { %v459_v25 = vsub.f32 %v441_v5, %v451_v22 }
 0x28c   :  { %v460_v54 = vmul.f32 0.0045, %v458_v53 }
 0x28d   :  { %v461_v31 = vmul.f32 0.0045, %v459_v25  ;;  %v394_v3 = vpop.permute.xlu0 %393 }
 0x28e   :  { %v462_v36 = vadd.f32 %v460_v54, %v456_v28  ;;  %v417_v14 = vmul.f32 %v394_v3, %v371_v2  ;;  %v413_v41 = vpop.permute.xlu1 %412 }
 0x28f   :  { %v463_v21 = vadd.f32 %v461_v31, %v457_v30  ;;  %v421_v26 = vmul.f32 %v413_v41, %v375_v34 }
 0x290   :  { %v480_v58 = vmax.f32 %v462_v36, 0.0  ;;  %v425_v62 = vsub.f32 %v363_v13, %v417_v14 }
 0x291   :  { %v481_v17 = vmax.f32 %v463_v21, 0.0  ;;  %v429_v37 = vsub.f32 %v367_v42, %v421_v26 }
 0x292   :  { %v2302_v23 = vmin.f32 %v480_v58, 1.0  ;;  %v467_v50 = vmax.f32 %v425_v62, 0.0 }
 0x293   :  { %v2304_v45 = vmin.f32 %v481_v17, 1.0  ;;  %v471_v47 = vmax.f32 %v429_v37, 0.0 }
 0x294   :  { %567 = vst.msk [vmem:[#allocation10 + $0xc0] sm:$0xff] %vm49_vm1, %v2302_v23  ;;  %568 = vst.msk [vmem:[#allocation10 + $0xc8] sm:$0xff] %vm49_vm1, %v2302_v23  ;;  %v2316_v33 = vmul.f32 %v2302_v23, %v2274_v46  ;;  %v2320_v59 = vmul.f32 %v2302_v23, %v2276_v15  ;;  %v2324_v12 = vmul.f32 %v2302_v23, %v2284_v18  ;;  %v2326_v24 = vmin.f32 %v467_v50, 1.0 }
 0x295   :  { %569 = vst.msk [vmem:[#allocation10 + $0xd0] sm:$0xff] %vm49_vm1, %v2302_v23  ;;  %570 = vst.msk [vmem:[#allocation10 + $0xd8] sm:$0xff] %vm49_vm1, %v2302_v23  ;;  %v2336_v61 = vmin.f32 %v471_v47, 1.0  ;;  %v2340_v11 = vmul.f32 %v2304_v45, %v2260_v16  ;;  %v2344_v51 = vmul.f32 %v2304_v45, %v2258_v38  ;;  %v2348_v49 = vmul.f32 %v2304_v45, %v2282_v48 }
 0x296   :  { %571 = vst.msk [vmem:[#allocation10 + $0xe0] sm:$0xff] %vm49_vm1, %v2304_v45  ;;  %572 = vst.msk [vmem:[#allocation10 + $0xe8] sm:$0xff] %vm49_vm1, %v2304_v45  ;;  %v492_v52 = vmul.f32 %v2316_v33, %v2003_v6  ;;  %v493_v63 = vmul.f32 %v2320_v59, %v2005_v7  ;;  %v494_v0 = vmul.f32 %v2324_v12, %v2007_v8 }
 0x297   :  { %573 = vst.msk [vmem:[#allocation10 + $0xf0] sm:$0xff] %vm49_vm1, %v2304_v45  ;;  %574 = vst.msk [vmem:[#allocation10 + $0xf8] sm:$0xff] %vm49_vm1, %v2304_v45  ;;  %v2358_v1 = vmul.f32 %v2302_v23, %v2326_v24  ;;  %v2364_v4 = vmul.f32 %v2304_v45, %v2336_v61  ;;  %v496_v5 = vmul.f32 %v2340_v11, %v2003_v6 }
 0x298   :  { %561 = vst.msk [vmem:[#allocation8 + $0xd8] sm:$0xff] %vm49_vm1, %v2326_v24  ;;  %v497_v19 = vmul.f32 %v2344_v51, %v2005_v7  ;;  %v498_v20 = vmul.f32 %v2348_v49, %v2007_v8  ;;  %565 = vst.msk [vmem:[#allocation8 + $0xf8] sm:$0xff] %vm49_vm1, %v2336_v61  ;;  %v500_v53 = vmul.f32 %v492_v52, %v2249_v55 }
 0x299   :  { %v501_v22 = vmul.f32 %v493_v63, %v2252_v60  ;;  %v502_v57 = vmul.f32 %v494_v0, %v2266_v43  ;;  %v495_v25 = vmul.f32 %v2358_v1, %v2009_v9  ;;  %v499_v6 = vmul.f32 %v2364_v4, %v2009_v9  ;;  %v343_v0 = vld [vmem:[#allocation2 + $0x4] sm:$0x3] }
 0x29a   :  { %v504_v7 = vmul.f32 %v496_v5, %v2238_v56  ;;  %v505_v27 = vmul.f32 %v497_v19, %v2236_v10  ;;  %v506_v8 = vmul.f32 %v498_v20, %v2263_v44  ;;  %v508_v28 = vsel %vm49_vm1, %v500_v53, 0.0 }
 0x29b   :  { %v509_v55 = vsel %vm49_vm1, %v501_v22, 0.0  ;;  %v503_v54 = vmul.f32 %v495_v25, %v394_v3  ;;  %v507_v2 = vmul.f32 %v499_v6, %v413_v41  ;;  %v511_v31 = vsel %vm49_vm1, %v502_v57, 0.0 }
 0x29c   :  { %v510_v60 = vadd.f32 %v509_v55, %v508_v28  ;;  %v521_v43 = vsel %vm49_vm1, %v504_v7, 0.0  ;;  %v522_v30 = vsel %vm49_vm1, %v505_v27, 0.0  ;;  %v524_v56 = vsel %vm49_vm1, %v506_v8, 0.0 }
 0x29d   :  { %v523_v9 = vadd.f32 %v522_v30, %v521_v43  ;;  %v513_v10 = vsel %vm49_vm1, %v503_v54, 0.0  ;;  %v526_v13 = vsel %vm49_vm1, %v507_v2, 0.0  ;;  %v534_v19 = vmul.f32 0.9, %v2217_v39 }
 0x29e   :  { %v512_v34 = vadd.f32 %v511_v31, %v510_v60  ;;  %v535_v53 = vmul.f32 0.9, %v2213_v35  ;;  %v543_v57 = vrot.slane %v343_v0, 1  ;;  %v582_v31 = vsub.f32 1.0, %v2258_v38 }
 0x29f   :  { %v525_v44 = vadd.f32 %v524_v56, %v523_v9  ;;  %v581_v9 = vsub.f32 1.0, %v2260_v16  ;;  %v583_v56 = vsub.f32 1.0, %v2282_v48 }
 0x2a0   :  { %v514_v36 = vadd.f32 %v513_v10, %v512_v34  ;;  %v577_v34 = vsub.f32 1.0, %v2274_v46  ;;  %v590_v10 = vmul.f32 0.05, %v582_v31 }
 0x2a1   :  { %v527_v14 = vadd.f32 %v526_v13, %v525_v44  ;;  %v589_v44 = vmul.f32 0.05, %v581_v9  ;;  %v605_v13 = vmul.f32 0.01, %v2340_v11  ;;  %v601_v11 = vmul.f32 0.01, %v2316_v33 }
 0x2a2   :  { %v515_v3 = vrot.slane %v514_v36, 4  ;;  %v602_v33 = vmul.f32 0.01, %v2320_v59 }
 0x2a3   :  { %v528_v21 = vrot.slane %v527_v14, 4 }
 0x2a4   :  { %v516_v41 = vadd.f32 %v515_v3, %v514_v36  ;;  %v606_v36 = vmul.f32 0.01, %v2344_v51 }
 0x2a5   :  { %v529_v42 = vadd.f32 %v528_v21, %v527_v14  ;;  %v585_v21 = vmul.f32 0.05, %v577_v34  ;;  %v584_v34 = vsub.f32 1.0, %v2336_v61 }
 0x2a6   :  { %v517_v26 = vrot.slane %v516_v41, 2 }
 0x2a7   :  { %v530_v58 = vrot.slane %v529_v42, 2 }
 0x2a8   :  { %v518_v62 = vadd.f32 %v517_v26, %v516_v41  ;;  %v591_v41 = vmul.f32 0.05, %v583_v56  ;;  %v598_v26 = vadd.f32 %v590_v10, %v2258_v38  ;;  %v592_v10 = vmul.f32 0.05, %v584_v34  ;;  %v2552_v34 = vld [vmem:[#allocation5 + $0x8] sm:$0xff] }
 0x2a9   :  { %v531_v17 = vadd.f32 %v530_v58, %v529_v42  ;;  %v578_v42 = vsub.f32 1.0, %v2276_v15 }
 0x2aa   :  { %v519_v37 = vrot.slane %v518_v62, 1 }
 0x2ab   :  { %v532_v50 = vrot.slane %v531_v17, 1  ;;  %v586_v38 = vmul.f32 0.05, %v578_v42  ;;  %v580_v42 = vsub.f32 1.0, %v2326_v24 }
 0x2ac   :  { %v520_v47 = vadd.f32 %v519_v37, %v518_v62  ;;  %v597_v62 = vadd.f32 %v589_v44, %v2260_v16 }
 0x2ad   :  { %v533_v52 = vadd.f32 %v532_v50, %v531_v17  ;;  %v607_v50 = vmul.f32 0.01, %v2348_v49 }
 0x2ae   :  { %v536_v63 = vadd.f32 %v2044_v32, %v520_v47  ;;  %v593_v47 = vadd.f32 %v585_v21, %v2274_v46  ;;  %v685_v21 = vsub.f32 0.45, %v2302_v23 }
 0x2af   :  { %v537_v5 = vadd.f32 %v2044_v32, %v533_v52 }
 0x2b0   :  { %v538_v20 = vmul.f32 0.1, %v536_v63  ;;  %v599_v63 = vadd.f32 %v591_v41, %v2282_v48  ;;  %v594_v48 = vadd.f32 %v586_v38, %v2276_v15  ;;  %v603_v15 = vmul.f32 0.01, %v2324_v12 }
 0x2b1   :  { %v539_v22 = vmul.f32 0.1, %v537_v5  ;;  %v579_v5 = vsub.f32 1.0, %v2284_v18  ;;  %v686_v41 = vsub.f32 0.45, %v2304_v45 }
 0x2b2   :  { %v540_v25 = vadd.f32 %v538_v20, %v534_v19 }
 0x2b3   :  { %v541_v6 = vadd.f32 %v539_v22, %v535_v53 }
 0x2b4   :  { %v546_v7 = vadd.f32 %v540_v25, %v343_v0 }
 0x2b5   :  { %v547_v27 = vadd.f32 %v543_v57, %v541_v6 }
 0x2b6   :  { %v2396_v8 = vmax.f32 %v546_v7, 0.0 }
 0x2b7   :  { %v2398_v28 = vmax.f32 %v547_v27, 0.0  ;;  %v587_v27 = vmul.f32 0.05, %v579_v5 }
 0x2b8   :  { %v612_v55 = vrot.slane %v2396_v8, %v2050_v40 }
 0x2b9   :  { %v631_v32 = vrot.slane %v2398_v28, %v2050_v40  ;;  %v552_v39 = vrot.slane %v2398_v28, 7 }
 0x2ba   :  { %v677_v35 = vmul.f32 %v612_v55, %v2302_v23 }
 0x2bb   :  { %637 = vbcast.lane.b32.xlu1 %v631_v32, 264  ;;  %633 = vbcast.lane.b32.xlu0 %v631_v32, 256  ;;  %v678_v54 = vmul.f32 %v631_v32, %v2304_v45  ;;  %v553_v60 = vsel %vm120_vm2, %v552_v39, %v2396_v8 }
 0x2bc   :  { %556 = vst.msk [vmem:[#allocation7 + $0x6] sm:$0x3] %vm47_vm0, %v553_v60  ;;  %v679_v43 = vsel %vm49_vm1, %v677_v35, 0.0  ;;  %v663_v30 = vsel %vm47_vm0, %v553_v60, 0.0  ;;  %v595_v60 = vadd.f32 %v587_v27, %v2284_v18  ;;  %v608_v18 = vmul.f32 0.01, %v2364_v4 }
 0x2bd   :  { %v682_v2 = vsel %vm49_vm1, %v678_v54, 0.0 }
 0x2bf   :  { %641 = vbcast.lane.b32.xlu0 %v631_v32, 272  ;;  %614 = vbcast.lane.b32.xlu1 %v612_v55, 256 }
 0x2c3   :  { %618 = vbcast.lane.b32.xlu1 %v612_v55, 264 }
 0x2c7   :  { %622 = vbcast.lane.b32.xlu1 %v612_v55, 272 }
 0x2de   :  { %683 = vadd.xlane.f32.xlu0 %v682_v2 }
 0x2e2   :  { %680 = vadd.xlane.f32.xlu0 %v679_v43 }
 0x2eb   :  { %664 = vadd.xlane.f32.xlu1 %v663_v30 }
 0x2f8   :  { %645 = vbcast.lane.b32.xlu0 %v631_v32, 280 }
 0x2fc   :  { %626 = vbcast.lane.b32.xlu1 %v612_v55, 280 }
 0x32d   :  { %v2419_v14 = vpop.permute.xlu1 %637  ;;  %v2421_v3 = vpop.permute.xlu0 %633 }
 0x32e   :  { %v652_v58 = vmul.f32 %v2419_v14, %v606_v36  ;;  %v651_v17 = vmul.f32 %v2421_v3, %v605_v13  ;;  %v600_v36 = vadd.f32 %v592_v10, %v2336_v61  ;;  %v2556_v10 = vld [vmem:[#allocation5 + $0x10] sm:$0xff] }
 0x330   :  { %v660_v37 = vsub.f32 %v598_v26, %v652_v58  ;;  %v659_v51 = vsub.f32 %v597_v62, %v651_v17  ;;  %v687_v62 = vmul.f32 0.05, %v685_v21  ;;  %v688_v17 = vmul.f32 0.05, %v686_v41 }
 0x331   :  { %v2431_v52 = vpop.permute.xlu1 %614  ;;  %v2434_v0 = vpop.permute.xlu0 %641 }
 0x332   :  { %v702_v16 = vmax.f32 %v660_v37, 0.0  ;;  %v701_v19 = vmax.f32 %v659_v51, 0.0  ;;  %v647_v20 = vmul.f32 %v2431_v52, %v601_v11  ;;  %v653_v53 = vmul.f32 %v2434_v0, %v607_v50 }
 0x333   :  { %v588_v11 = vmul.f32 0.05, %v580_v42  ;;  %v689_v38 = vadd.f32 %v687_v62, %v2302_v23  ;;  %v690_v5 = vadd.f32 %v688_v17, %v2304_v45 }
 0x334   :  { %v2440_v49 = vmin.f32 %v702_v16, 1.0  ;;  %v2442_v46 = vmin.f32 %v701_v19, 1.0  ;;  %v655_v22 = vsub.f32 %v593_v47, %v647_v20  ;;  %v661_v57 = vsub.f32 %v599_v63, %v653_v53 }
 0x335   :  { %v2445_v25 = vpop.permute.xlu1 %618  ;;  %v604_v63 = vmul.f32 0.01, %v2358_v1  ;;  %v596_v53 = vadd.f32 %v588_v11, %v2326_v24 }
 0x336   :  { %796 = vst.msk [vmem:[#allocation8 + $0x128] sm:$0xff] %vm49_vm1, %v2440_v49  ;;  %795 = vst.msk [vmem:[#allocation8 + $0x120] sm:$0xff] %vm49_vm1, %v2442_v46  ;;  %v697_v6 = vmax.f32 %v655_v22, 0.0  ;;  %v703_v7 = vmax.f32 %v661_v57, 0.0  ;;  %v648_v59 = vmul.f32 %v2445_v25, %v602_v33 }
 0x338   :  { %v2452_v55 = vmin.f32 %v697_v6, 1.0  ;;  %v2454_v32 = vmin.f32 %v703_v7, 1.0  ;;  %v656_v39 = vsub.f32 %v594_v48, %v648_v59 }
 0x339   :  { %v2457_v35 = vpop.permute.xlu1 %622 }
 0x33a   :  { %791 = vst.msk [vmem:[#allocation8 + $0x100] sm:$0xff] %vm49_vm1, %v2452_v55  ;;  %797 = vst.msk [vmem:[#allocation8 + $0x130] sm:$0xff] %vm49_vm1, %v2454_v32  ;;  %v698_v54 = vmax.f32 %v656_v39, 0.0  ;;  %v649_v2 = vmul.f32 %v2457_v35, %v603_v15 }
 0x33c   :  { %v2465_v43 = vmin.f32 %v698_v54, 1.0  ;;  %v657_v30 = vsub.f32 %v595_v60, %v649_v2 }
 0x33e   :  { %792 = vst.msk [vmem:[#allocation8 + $0x108] sm:$0xff] %vm49_vm1, %v2465_v43  ;;  %v699_v12 = vmax.f32 %v657_v30, 0.0 }
 0x340   :  { %v2469_v31 = vmin.f32 %v699_v12, 1.0  ;;  %v2548_v12 = vld [vmem:[#allocation5] sm:$0xff] }
 0x342   :  { %793 = vst.msk [vmem:[#allocation8 + $0x110] sm:$0xff] %vm49_vm1, %v2469_v31 }
 0x36b   :  { %v684_v9 = vpop.xlane.xlu0 %683 }
 0x36f   :  { %v681_v56 = vpop.xlane.xlu0 %680 }
 0x373   :  { %v2475_v44 = vpop.permute.xlu0 %645 }
 0x374   :  { %v654_v13 = vmul.f32 %v2475_v44, %v608_v18 }
 0x376   :  { %v662_v26 = vsub.f32 %v600_v36, %v654_v13  ;;  %v2560_v36 = vld [vmem:[#allocation5 + $0x18] sm:$0xff] }
 0x378   :  { %v704_v58 = vmax.f32 %v662_v26, 0.0  ;;  %v665_v37 = vpop.xlane.xlu1 %664 }
 0x379   :  { %v670_v51 = vrot.slane %v665_v37, %v2050_v40  ;;  %v674_v4 = vrot.slane %v665_v37, %v2113_v29 }
 0x37a   :  { %v2484_v50 = vmin.f32 %v704_v58, 1.0 }
 0x37b   :  { %v691_v61 = vsub.f32 %v670_v51, %v681_v56  ;;  %v692_v47 = vsub.f32 %v674_v4, %v684_v9 }
 0x37c   :  { %798 = vst.msk [vmem:[#allocation8 + $0x138] sm:$0xff] %vm49_vm1, %v2484_v50  ;;  %v627_v16 = vpop.permute.xlu1 %626 }
 0x37d   :  { %v693_v19 = vmul.f32 0.0045, %v691_v61  ;;  %v694_v20 = vmul.f32 0.0045, %v692_v47  ;;  %v650_v33 = vmul.f32 %v627_v16, %v604_v63 }
 0x37f   :  { %v695_v22 = vadd.f32 %v693_v19, %v689_v38  ;;  %v696_v57 = vadd.f32 %v694_v20, %v690_v5  ;;  %v658_v48 = vsub.f32 %v596_v53, %v650_v33 }
 0x381   :  { %v713_v6 = vmax.f32 %v695_v22, 0.0  ;;  %v714_v7 = vmax.f32 %v696_v57, 0.0  ;;  %v700_v59 = vmax.f32 %v658_v48, 0.0 }
 0x383   :  { %v2492_v1 = vmin.f32 %v713_v6, 1.0  ;;  %v2494_v27 = vmin.f32 %v714_v7, 1.0  ;;  %v2496_v39 = vmin.f32 %v700_v59, 1.0 }
 0x385   :  { %800 = vst.msk [vmem:[#allocation10 + $0x100] sm:$0xff] %vm49_vm1, %v2492_v1  ;;  %801 = vst.msk [vmem:[#allocation10 + $0x108] sm:$0xff] %vm49_vm1, %v2492_v1  ;;  %v2516_v23 = vmul.f32 %v2492_v1, %v2452_v55  ;;  %v2520_v45 = vmul.f32 %v2492_v1, %v2465_v43  ;;  %v2524_v24 = vmul.f32 %v2492_v1, %v2469_v31 }
 0x386   :  { %802 = vst.msk [vmem:[#allocation10 + $0x110] sm:$0xff] %vm49_vm1, %v2492_v1  ;;  %803 = vst.msk [vmem:[#allocation10 + $0x118] sm:$0xff] %vm49_vm1, %v2492_v1  ;;  %v2528_v15 = vmul.f32 %v2492_v1, %v2496_v39  ;;  %v2534_v54 = vmul.f32 %v2494_v27, %v2442_v46  ;;  %v2538_v60 = vmul.f32 %v2494_v27, %v2440_v49 }
 0x387   :  { %804 = vst.msk [vmem:[#allocation10 + $0x120] sm:$0xff] %vm49_vm1, %v2494_v27  ;;  %805 = vst.msk [vmem:[#allocation10 + $0x128] sm:$0xff] %vm49_vm1, %v2494_v27  ;;  %v2542_v2 = vmul.f32 %v2494_v27, %v2454_v32  ;;  %v2546_v30 = vmul.f32 %v2494_v27, %v2484_v50  ;;  %v725_v9 = vmul.f32 %v2548_v12, %v2516_v23 }
 0x388   :  { %806 = vst.msk [vmem:[#allocation10 + $0x130] sm:$0xff] %vm49_vm1, %v2494_v27  ;;  %807 = vst.msk [vmem:[#allocation10 + $0x138] sm:$0xff] %vm49_vm1, %v2494_v27  ;;  %v726_v56 = vmul.f32 %v2552_v34, %v2520_v45  ;;  %v727_v18 = vmul.f32 %v2556_v10, %v2524_v24  ;;  %v728_v13 = vmul.f32 %v2560_v36, %v2528_v15 }
 0x389   :  { %794 = vst.msk [vmem:[#allocation8 + $0x118] sm:$0xff] %vm49_vm1, %v2496_v39  ;;  %v729_v21 = vmul.f32 %v2548_v12, %v2534_v54  ;;  %v730_v41 = vmul.f32 %v2552_v34, %v2538_v60  ;;  %v731_v42 = vmul.f32 %v2556_v10, %v2542_v2  ;;  %v732_v26 = vmul.f32 %v2560_v36, %v2546_v30 }
 0x38a   :  { %v733_v58 = vmul.f32 %v725_v9, %v2431_v52  ;;  %v734_v62 = vmul.f32 %v726_v56, %v2445_v25  ;;  %v735_v17 = vmul.f32 %v727_v18, %v2457_v35  ;;  %v736_v11 = vmul.f32 %v728_v13, %v627_v16 }
 0x38b   :  { %v737_v37 = vmul.f32 %v729_v21, %v2421_v3  ;;  %v738_v51 = vmul.f32 %v730_v41, %v2419_v14  ;;  %v739_v4 = vmul.f32 %v731_v42, %v2434_v0  ;;  %v740_v38 = vmul.f32 %v732_v26, %v2475_v44  ;;  %v2590_v21 = vld [vmem:[%s3406_s2] ss:$0 sm:$0xff]  ;;  %v576_v42 = vld [vmem:[#allocation2 + $0x6] sm:$0x3] }
 0x38c   :  { %v741_v61 = vsel %vm49_vm1, %v733_v58, 0.0  ;;  %v742_v47 = vsel %vm49_vm1, %v734_v62, 0.0  ;;  %v744_v35 = vsel %vm49_vm1, %v735_v17, 0.0  ;;  %v746_v0 = vsel %vm49_vm1, %v736_v11, 0.0 }
 0x38d   :  { %v743_v63 = vadd.f32 %v742_v47, %v741_v61  ;;  %v754_v52 = vsel %vm49_vm1, %v737_v37, 0.0  ;;  %v755_v25 = vsel %vm49_vm1, %v738_v51, 0.0  ;;  %v757_v14 = vsel %vm49_vm1, %v739_v4, 0.0 }
 0x38e   :  { %v756_v5 = vadd.f32 %v755_v25, %v754_v52  ;;  %v759_v20 = vsel %vm49_vm1, %v740_v38, 0.0  ;;  %v767_v58 = vmul.f32 0.9, %v2396_v8  ;;  %v768_v17 = vmul.f32 0.9, %v2398_v28 }
 0x38f   :  { %v745_v3 = vadd.f32 %v744_v35, %v743_v63  ;;  %v776_v51 = vrot.slane %v576_v42, 1 }
 0x390   :  { %v758_v16 = vadd.f32 %v757_v14, %v756_v5 }
 0x391   :  { %v747_v19 = vadd.f32 %v746_v0, %v745_v3 }
 0x392   :  { %v760_v53 = vadd.f32 %v759_v20, %v758_v16  ;;  %v815_v16 = vsub.f32 1.0, %v2440_v49  ;;  %v810_v20 = vsub.f32 1.0, %v2452_v55 }
 0x393   :  { %v748_v33 = vrot.slane %v747_v19, 4 }
 0x394   :  { %v761_v22 = vrot.slane %v760_v53, 4 }
 0x395   :  { %v749_v44 = vadd.f32 %v748_v33, %v747_v19  ;;  %v814_v19 = vsub.f32 1.0, %v2442_v46  ;;  %v823_v33 = vmul.f32 0.05, %v815_v16 }
 0x396   :  { %v762_v57 = vadd.f32 %v761_v22, %v760_v53  ;;  %v811_v53 = vsub.f32 1.0, %v2465_v43 }
 0x397   :  { %v750_v48 = vrot.slane %v749_v44, 2  ;;  %v822_v22 = vmul.f32 0.05, %v814_v19 }
 0x398   :  { %v763_v6 = vrot.slane %v762_v57, 2 }
 0x399   :  { %v751_v7 = vadd.f32 %v750_v48, %v749_v44  ;;  %v839_v44 = vmul.f32 0.01, %v2538_v60 }
 0x39a   :  { %v764_v59 = vadd.f32 %v763_v6, %v762_v57  ;;  %v838_v57 = vmul.f32 0.01, %v2534_v54 }
 0x39b   :  { %v752_v9 = vrot.slane %v751_v7, 1 }
 0x39c   :  { %v765_v56 = vrot.slane %v764_v59, 1 }
 0x39d   :  { %v753_v18 = vadd.f32 %v752_v9, %v751_v7  ;;  %v818_v7 = vmul.f32 0.05, %v810_v20  ;;  %v816_v9 = vsub.f32 1.0, %v2454_v32 }
 0x39e   :  { %v766_v13 = vadd.f32 %v765_v56, %v764_v59  ;;  %v819_v59 = vmul.f32 0.05, %v811_v53  ;;  %v812_v56 = vsub.f32 1.0, %v2469_v31 }
 0x39f   :  { %v769_v41 = vadd.f32 %v2590_v21, %v753_v18  ;;  %v831_v18 = vadd.f32 %v823_v33, %v2440_v49  ;;  %v824_v49 = vmul.f32 0.05, %v816_v9 }
 0x3a0   :  { %v770_v26 = vadd.f32 %v2590_v21, %v766_v13 }
 0x3a1   :  { %v771_v62 = vmul.f32 0.1, %v769_v41  ;;  %v830_v41 = vadd.f32 %v822_v22, %v2442_v46  ;;  %v918_v22 = vsub.f32 0.45, %v2492_v1 }
 0x3a2   :  { %v772_v37 = vmul.f32 0.1, %v770_v26  ;;  %v834_v26 = vmul.f32 0.01, %v2516_v23  ;;  %v840_v23 = vmul.f32 0.01, %v2542_v2 }
 0x3a3   :  { %v773_v4 = vadd.f32 %v771_v62, %v767_v58  ;;  %v835_v58 = vmul.f32 0.01, %v2520_v45  ;;  %v826_v62 = vadd.f32 %v818_v7, %v2452_v55  ;;  %v836_v45 = vmul.f32 0.01, %v2524_v24 }
 0x3a4   :  { %v774_v11 = vadd.f32 %v772_v37, %v768_v17  ;;  %v827_v37 = vadd.f32 %v819_v59, %v2465_v43  ;;  %v813_v7 = vsub.f32 1.0, %v2496_v39  ;;  %v817_v59 = vsub.f32 1.0, %v2484_v50 }
 0x3a5   :  { %v779_v61 = vadd.f32 %v773_v4, %v576_v42  ;;  %v820_v4 = vmul.f32 0.05, %v812_v56  ;;  %v920_v56 = vmul.f32 0.05, %v918_v22 }
 0x3a6   :  { %v780_v47 = vadd.f32 %v776_v51, %v774_v11 }
 0x3a7   :  { %v2596_v63 = vmax.f32 %v779_v61, 0.0 }
 0x3a8   :  { %v2598_v38 = vmax.f32 %v780_v47, 0.0 }
 0x3a9   :  { %v845_v52 = vrot.slane %v2596_v63, %v2050_v40 }
 0x3aa   :  { %v864_v25 = vrot.slane %v2598_v38, %v2050_v40  ;;  %v785_v8 = vrot.slane %v2598_v38, 7 }
 0x3ab   :  { %v910_v28 = vmul.f32 %v845_v52, %v2492_v1 }
 0x3ac   :  { %870 = vbcast.lane.b32.xlu1 %v864_v25, 264  ;;  %866 = vbcast.lane.b32.xlu0 %v864_v25, 256  ;;  %v786_v35 = vsel %vm120_vm2, %v785_v8, %v2596_v63  ;;  %v911_v5 = vmul.f32 %v864_v25, %v2494_v27  ;;  %v832_v8 = vadd.f32 %v824_v49, %v2454_v32  ;;  %v837_v49 = vmul.f32 0.01, %v2528_v15 }
 0x3ad   :  { %789 = vst.msk [vmem:[#allocation7 + $0x8] sm:$0x3] %vm47_vm0, %v786_v35  ;;  %v896_v3 = vsel %vm47_vm0, %v786_v35, 0.0  ;;  %v912_v14 = vsel %vm49_vm1, %v910_v28, 0.0  ;;  %v828_v35 = vadd.f32 %v820_v4, %v2469_v31 }
 0x3ae   :  { %v915_v0 = vsel %vm49_vm1, %v911_v5, 0.0 }
 0x3b0   :  { %847 = vbcast.lane.b32.xlu1 %v845_v52, 256  ;;  %851 = vbcast.lane.b32.xlu0 %v845_v52, 264 }
 0x3b4   :  { %874 = vbcast.lane.b32.xlu1 %v864_v25, 272  ;;  %855 = vbcast.lane.b32.xlu0 %v845_v52, 272 }
 0x3d3   :  { %897 = vadd.xlane.f32.xlu0 %v896_v3 }
 0x3d7   :  { %913 = vadd.xlane.f32.xlu0 %v912_v14 }
 0x3d8   :  { %916 = vadd.xlane.f32.xlu1 %v915_v0 }
 0x3e9   :  { %878 = vbcast.lane.b32.xlu1 %v864_v25, 280 }
 0x3ed   :  { %859 = vbcast.lane.b32.xlu0 %v845_v52, 280 }
 0x41e   :  { %v2619_v48 = vpop.permute.xlu1 %870  ;;  %v2621_v6 = vpop.permute.xlu0 %866 }
 0x41f   :  { %v885_v13 = vmul.f32 %v2619_v48, %v839_v44  ;;  %v884_v60 = vmul.f32 %v2621_v6, %v838_v57  ;;  %v919_v57 = vsub.f32 0.45, %v2494_v27 }
 0x421   :  { %v893_v42 = vsub.f32 %v831_v18, %v885_v13  ;;  %v892_v54 = vsub.f32 %v830_v41, %v884_v60  ;;  %v921_v41 = vmul.f32 0.05, %v919_v57 }
 0x422   :  { %v2632_v17 = vpop.permute.xlu1 %847  ;;  %v2635_v51 = vpop.permute.xlu0 %851 }
 0x423   :  { %v935_v11 = vmax.f32 %v893_v42, 0.0  ;;  %v934_v46 = vmax.f32 %v892_v54, 0.0  ;;  %v880_v61 = vmul.f32 %v2632_v17, %v834_v26  ;;  %v881_v47 = vmul.f32 %v2635_v51, %v835_v58 }
 0x424   :  { %v821_v54 = vmul.f32 0.05, %v813_v7  ;;  %v825_v58 = vmul.f32 0.05, %v817_v59  ;;  %v923_v4 = vadd.f32 %v921_v41, %v2494_v27 }
 0x425   :  { %v2641_v52 = vmin.f32 %v935_v11, 1.0  ;;  %v2643_v55 = vmin.f32 %v934_v46, 1.0  ;;  %v888_v25 = vsub.f32 %v826_v62, %v880_v61  ;;  %v889_v43 = vsub.f32 %v827_v37, %v881_v47 }
 0x426   :  { %v2646_v28 = vpop.permute.xlu1 %874  ;;  %v2649_v5 = vpop.permute.xlu0 %855  ;;  %v922_v62 = vadd.f32 %v920_v56, %v2492_v1  ;;  %v841_v61 = vmul.f32 0.01, %v2546_v30 }
 0x427   :  { %1029 = vst.msk [vmem:[#allocation8 + $0x168] sm:$0xff] %vm49_vm1, %v2641_v52  ;;  %1028 = vst.msk [vmem:[#allocation8 + $0x160] sm:$0xff] %vm49_vm1, %v2643_v55  ;;  %v930_v24 = vmax.f32 %v888_v25, 0.0  ;;  %v931_v2 = vmax.f32 %v889_v43, 0.0  ;;  %v886_v3 = vmul.f32 %v2646_v28, %v840_v23  ;;  %v882_v14 = vmul.f32 %v2649_v5, %v836_v45 }
 0x428   :  { %v829_v23 = vadd.f32 %v821_v54, %v2496_v39 }
 0x429   :  { %v2657_v0 = vmin.f32 %v930_v24, 1.0  ;;  %v2659_v32 = vmin.f32 %v931_v2, 1.0  ;;  %v894_v16 = vsub.f32 %v832_v8, %v886_v3  ;;  %v890_v31 = vsub.f32 %v828_v35, %v882_v14 }
 0x42a   :  { %v833_v8 = vadd.f32 %v825_v58, %v2484_v50 }
 0x42b   :  { %1024 = vst.msk [vmem:[#allocation8 + $0x140] sm:$0xff] %vm49_vm1, %v2657_v0  ;;  %1025 = vst.msk [vmem:[#allocation8 + $0x148] sm:$0xff] %vm49_vm1, %v2659_v32  ;;  %v936_v19 = vmax.f32 %v894_v16, 0.0  ;;  %v932_v20 = vmax.f32 %v890_v31, 0.0 }
 0x42d   :  { %v2665_v53 = vmin.f32 %v936_v19, 1.0  ;;  %v2667_v33 = vmin.f32 %v932_v20, 1.0 }
 0x42f   :  { %1030 = vst.msk [vmem:[#allocation8 + $0x170] sm:$0xff] %vm49_vm1, %v2665_v53  ;;  %1026 = vst.msk [vmem:[#allocation8 + $0x150] sm:$0xff] %vm49_vm1, %v2667_v33 }
 0x460   :  { %v898_v44 = vpop.xlane.xlu0 %897 }
 0x461   :  { %v903_v9 = vrot.slane %v898_v44, %v2050_v40  ;;  %v907_v18 = vrot.slane %v898_v44, %v2113_v29 }
 0x464   :  { %v914_v13 = vpop.xlane.xlu0 %913 }
 0x465   :  { %v924_v60 = vsub.f32 %v903_v9, %v914_v13  ;;  %v917_v42 = vpop.xlane.xlu1 %916 }
 0x466   :  { %v925_v26 = vsub.f32 %v907_v18, %v917_v42 }
 0x467   :  { %v926_v37 = vmul.f32 0.0045, %v924_v60 }
 0x468   :  { %v927_v11 = vmul.f32 0.0045, %v925_v26  ;;  %v860_v46 = vpop.permute.xlu0 %859 }
 0x469   :  { %v928_v47 = vadd.f32 %v926_v37, %v922_v62  ;;  %v883_v45 = vmul.f32 %v860_v46, %v837_v49  ;;  %v879_v25 = vpop.permute.xlu1 %878 }
 0x46a   :  { %v929_v43 = vadd.f32 %v927_v11, %v923_v4  ;;  %v887_v35 = vmul.f32 %v879_v25, %v841_v61 }
 0x46b   :  { %v946_v24 = vmax.f32 %v928_v47, 0.0  ;;  %v891_v1 = vsub.f32 %v829_v23, %v883_v45 }
 0x46c   :  { %v947_v2 = vmax.f32 %v929_v43, 0.0  ;;  %v895_v3 = vsub.f32 %v833_v8, %v887_v35 }
 0x46d   :  { %v2685_v15 = vmin.f32 %v946_v24, 1.0  ;;  %v933_v27 = vmax.f32 %v891_v1, 0.0 }
 0x46e   :  { %v2687_v14 = vmin.f32 %v947_v2, 1.0  ;;  %v937_v16 = vmax.f32 %v895_v3, 0.0 }
 0x46f   :  { %1033 = vst.msk [vmem:[#allocation10 + $0x140] sm:$0xff] %vm49_vm1, %v2685_v15  ;;  %1034 = vst.msk [vmem:[#allocation10 + $0x148] sm:$0xff] %vm49_vm1, %v2685_v15  ;;  %v2699_v50 = vmul.f32 %v2685_v15, %v2657_v0  ;;  %v2703_v39 = vmul.f32 %v2685_v15, %v2659_v32  ;;  %v2707_v30 = vmul.f32 %v2685_v15, %v2667_v33  ;;  %v2709_v31 = vmin.f32 %v933_v27, 1.0 }
 0x470   :  { %1035 = vst.msk [vmem:[#allocation10 + $0x150] sm:$0xff] %vm49_vm1, %v2685_v15  ;;  %1036 = vst.msk [vmem:[#allocation10 + $0x158] sm:$0xff] %vm49_vm1, %v2685_v15  ;;  %v2719_v19 = vmin.f32 %v937_v16, 1.0  ;;  %v2723_v20 = vmul.f32 %v2687_v14, %v2643_v55  ;;  %v2727_v22 = vmul.f32 %v2687_v14, %v2641_v52  ;;  %v2731_v44 = vmul.f32 %v2687_v14, %v2665_v53 }
 0x471   :  { %1037 = vst.msk [vmem:[#allocation10 + $0x160] sm:$0xff] %vm49_vm1, %v2687_v14  ;;  %1038 = vst.msk [vmem:[#allocation10 + $0x168] sm:$0xff] %vm49_vm1, %v2687_v14  ;;  %v958_v57 = vmul.f32 %v2548_v12, %v2699_v50  ;;  %v959_v7 = vmul.f32 %v2552_v34, %v2703_v39  ;;  %v960_v59 = vmul.f32 %v2556_v10, %v2707_v30 }
 0x472   :  { %1039 = vst.msk [vmem:[#allocation10 + $0x170] sm:$0xff] %vm49_vm1, %v2687_v14  ;;  %1040 = vst.msk [vmem:[#allocation10 + $0x178] sm:$0xff] %vm49_vm1, %v2687_v14  ;;  %v2741_v9 = vmul.f32 %v2685_v15, %v2709_v31  ;;  %v2747_v56 = vmul.f32 %v2687_v14, %v2719_v19  ;;  %v962_v18 = vmul.f32 %v2548_v12, %v2723_v20 }
 0x473   :  { %1027 = vst.msk [vmem:[#allocation8 + $0x158] sm:$0xff] %vm49_vm1, %v2709_v31  ;;  %v963_v13 = vmul.f32 %v2552_v34, %v2727_v22  ;;  %v964_v41 = vmul.f32 %v2556_v10, %v2731_v44  ;;  %1031 = vst.msk [vmem:[#allocation8 + $0x178] sm:$0xff] %vm49_vm1, %v2719_v19  ;;  %v966_v60 = vmul.f32 %v958_v57, %v2632_v17 }
 0x474   :  { %v967_v42 = vmul.f32 %v959_v7, %v2635_v51  ;;  %v968_v54 = vmul.f32 %v960_v59, %v2649_v5  ;;  %v961_v26 = vmul.f32 %v2560_v36, %v2741_v9  ;;  %v965_v58 = vmul.f32 %v2560_v36, %v2747_v56 }
 0x475   :  { %v970_v62 = vmul.f32 %v962_v18, %v2621_v6  ;;  %v971_v37 = vmul.f32 %v963_v13, %v2619_v48  ;;  %v972_v49 = vmul.f32 %v964_v41, %v2646_v28  ;;  %v974_v4 = vsel %vm49_vm1, %v966_v60, 0.0  ;;  %v809_v60 = vld [vmem:[#allocation2 + $0x8] sm:$0x3] }
 0x476   :  { %v975_v17 = vsel %vm49_vm1, %v967_v42, 0.0  ;;  %v969_v11 = vmul.f32 %v961_v26, %v860_v46  ;;  %v973_v61 = vmul.f32 %v965_v58, %v879_v25  ;;  %v977_v23 = vsel %vm49_vm1, %v968_v54, 0.0 }
 0x477   :  { %v976_v51 = vadd.f32 %v975_v17, %v974_v4  ;;  %v987_v5 = vsel %vm49_vm1, %v970_v62, 0.0  ;;  %v988_v47 = vsel %vm49_vm1, %v971_v37, 0.0  ;;  %v990_v6 = vsel %vm49_vm1, %v972_v49, 0.0 }
 0x478   :  { %v989_v45 = vadd.f32 %v988_v47, %v987_v5  ;;  %v979_v48 = vsel %vm49_vm1, %v969_v11, 0.0  ;;  %v992_v35 = vsel %vm49_vm1, %v973_v61, 0.0  ;;  %v1000_v54 = vmul.f32 0.9, %v2596_v63 }
 0x479   :  { %v978_v43 = vadd.f32 %v977_v23, %v976_v51  ;;  %v1001_v58 = vmul.f32 0.9, %v2598_v38  ;;  %v1009_v37 = vrot.slane %v809_v60, 1 }
 0x47a   :  { %v991_v28 = vadd.f32 %v990_v6, %v989_v45 }
 0x47b   :  { %v980_v8 = vadd.f32 %v979_v48, %v978_v43 }
 0x47c   :  { %v993_v24 = vadd.f32 %v992_v35, %v991_v28  ;;  %v1048_v28 = vsub.f32 1.0, %v2641_v52  ;;  %v1043_v35 = vsub.f32 1.0, %v2657_v0 }
 0x47d   :  { %v981_v46 = vrot.slane %v980_v8, 4 }
 0x47e   :  { %v994_v1 = vrot.slane %v993_v24, 4 }
 0x47f   :  { %v982_v25 = vadd.f32 %v981_v46, %v980_v8  ;;  %v1047_v8 = vsub.f32 1.0, %v2643_v55  ;;  %v1056_v46 = vmul.f32 0.05, %v1048_v28 }
 0x480   :  { %v995_v2 = vadd.f32 %v994_v1, %v993_v24  ;;  %v1049_v24 = vsub.f32 1.0, %v2665_v53 }
 0x481   :  { %v983_v3 = vrot.slane %v982_v25, 2  ;;  %v1055_v1 = vmul.f32 0.05, %v1047_v8 }
 0x482   :  { %v996_v27 = vrot.slane %v995_v2, 2 }
 0x483   :  { %v984_v16 = vadd.f32 %v983_v3, %v982_v25  ;;  %v1072_v25 = vmul.f32 0.01, %v2727_v22 }
 0x484   :  { %v997_v57 = vadd.f32 %v996_v27, %v995_v2  ;;  %v1071_v2 = vmul.f32 0.01, %v2723_v20  ;;  %v1067_v20 = vmul.f32 0.01, %v2699_v50  ;;  %v1068_v50 = vmul.f32 0.01, %v2703_v39 }
 0x485   :  { %v985_v7 = vrot.slane %v984_v16, 1 }
 0x486   :  { %v998_v59 = vrot.slane %v997_v57, 1 }
 0x487   :  { %v986_v18 = vadd.f32 %v985_v7, %v984_v16  ;;  %v1051_v16 = vmul.f32 0.05, %v1043_v35  ;;  %v1044_v7 = vsub.f32 1.0, %v2659_v32 }
 0x488   :  { %v999_v13 = vadd.f32 %v998_v59, %v997_v57  ;;  %v1057_v57 = vmul.f32 0.05, %v1049_v24  ;;  %v1064_v59 = vadd.f32 %v1056_v46, %v2641_v52 }
 0x489   :  { %v1002_v41 = vadd.f32 %v2590_v21, %v986_v18  ;;  %v1052_v52 = vmul.f32 0.05, %v1044_v7 }
 0x48a   :  { %v1003_v42 = vadd.f32 %v2590_v21, %v999_v13  ;;  %v1063_v13 = vadd.f32 %v1055_v1, %v2643_v55 }
 0x48b   :  { %v1004_v26 = vmul.f32 0.1, %v1002_v41 }
 0x48c   :  { %v1005_v62 = vmul.f32 0.1, %v1003_v42  ;;  %v1073_v42 = vmul.f32 0.01, %v2731_v44 }
 0x48d   :  { %v1006_v49 = vadd.f32 %v1004_v26, %v1000_v54  ;;  %v1059_v54 = vadd.f32 %v1051_v16, %v2657_v0 }
 0x48e   :  { %v1007_v4 = vadd.f32 %v1005_v62, %v1001_v58  ;;  %v1065_v58 = vadd.f32 %v1057_v57, %v2665_v53  ;;  %v1060_v53 = vadd.f32 %v1052_v52, %v2659_v32  ;;  %v1069_v32 = vmul.f32 0.01, %v2707_v30 }
 0x48f   :  { %v1012_v17 = vadd.f32 %v1006_v49, %v809_v60 }
 0x490   :  { %v1013_v11 = vadd.f32 %v1009_v37, %v1007_v4  ;;  %v1045_v37 = vsub.f32 1.0, %v2667_v33 }
 0x491   :  { %v2779_v51 = vmax.f32 %v1012_v17, 0.0 }
 0x492   :  { %v2781_v61 = vmax.f32 %v1013_v11, 0.0 }
 0x493   :  { %v1078_v5 = vrot.slane %v2779_v51, %v2050_v40 }
 0x494   :  { %v1097_v47 = vrot.slane %v2781_v61, %v2050_v40  ;;  %v1018_v63 = vrot.slane %v2781_v61, 7 }
 0x495   :  { %v1143_v38 = vmul.f32 %v1078_v5, %v2685_v15 }
 0x496   :  { %1103 = vbcast.lane.b32.xlu1 %v1097_v47, 264  ;;  %1099 = vbcast.lane.b32.xlu0 %v1097_v47, 256  ;;  %v1144_v23 = vmul.f32 %v1097_v47, %v2687_v14  ;;  %v1019_v45 = vsel %vm120_vm2, %v1018_v63, %v2779_v51 }
 0x497   :  { %1022 = vst.msk [vmem:[#allocation7 + $0xa] sm:$0x3] %vm47_vm0, %v1019_v45  ;;  %v1145_v6 = vsel %vm49_vm1, %v1143_v38, 0.0  ;;  %v1129_v48 = vsel %vm47_vm0, %v1019_v45, 0.0 }
 0x498   :  { %v1148_v43 = vsel %vm49_vm1, %v1144_v23, 0.0  ;;  %v1053_v23 = vmul.f32 0.05, %v1045_v37 }
 0x49a   :  { %1107 = vbcast.lane.b32.xlu0 %v1097_v47, 272  ;;  %1080 = vbcast.lane.b32.xlu1 %v1078_v5, 256  ;;  %v1061_v8 = vadd.f32 %v1053_v23, %v2667_v33  ;;  %v1074_v33 = vmul.f32 0.01, %v2747_v56 }
 0x49e   :  { %1084 = vbcast.lane.b32.xlu1 %v1078_v5, 264 }
 0x4a2   :  { %1088 = vbcast.lane.b32.xlu1 %v1078_v5, 272 }
 0x4b9   :  { %1149 = vadd.xlane.f32.xlu0 %v1148_v43 }
 0x4bd   :  { %1146 = vadd.xlane.f32.xlu0 %v1145_v6 }
 0x4c6   :  { %1130 = vadd.xlane.f32.xlu1 %v1129_v48 }
 0x4d3   :  { %1111 = vbcast.lane.b32.xlu0 %v1097_v47, 280 }
 0x4d7   :  { %1092 = vbcast.lane.b32.xlu1 %v1078_v5, 280 }
 0x508   :  { %v2802_v3 = vpop.permute.xlu1 %1103  ;;  %v2804_v27 = vpop.permute.xlu0 %1099 }
 0x509   :  { %v1118_v18 = vmul.f32 %v2802_v3, %v1072_v25  ;;  %v1117_v41 = vmul.f32 %v2804_v27, %v1071_v2  ;;  %v1050_v2 = vsub.f32 1.0, %v2719_v19 }
 0x50b   :  { %v1126_v60 = vsub.f32 %v1064_v59, %v1118_v18  ;;  %v1125_v22 = vsub.f32 %v1063_v13, %v1117_v41  ;;  %v1058_v57 = vmul.f32 0.05, %v1050_v2  ;;  %v1151_v13 = vsub.f32 0.45, %v2685_v15 }
 0x50c   :  { %v2814_v26 = vpop.permute.xlu1 %1080  ;;  %v2817_v62 = vpop.permute.xlu0 %1107  ;;  %v1152_v41 = vsub.f32 0.45, %v2687_v14 }
 0x50d   :  { %v1168_v55 = vmax.f32 %v1126_v60, 0.0  ;;  %v1167_v49 = vmax.f32 %v1125_v22, 0.0  ;;  %v1113_v4 = vmul.f32 %v2814_v26, %v1067_v20  ;;  %v1119_v17 = vmul.f32 %v2817_v62, %v1073_v42 }
 0x50e   :  { %v1066_v59 = vadd.f32 %v1058_v57, %v2719_v19  ;;  %v1046_v60 = vsub.f32 1.0, %v2709_v31  ;;  %v1153_v42 = vmul.f32 0.05, %v1151_v13 }
 0x50f   :  { %v2823_v44 = vmin.f32 %v1168_v55, 1.0  ;;  %v2825_v0 = vmin.f32 %v1167_v49, 1.0  ;;  %v1121_v11 = vsub.f32 %v1059_v54, %v1113_v4  ;;  %v1127_v5 = vsub.f32 %v1065_v58, %v1119_v17 }
 0x510   :  { %v2828_v47 = vpop.permute.xlu1 %1084  ;;  %v1154_v54 = vmul.f32 0.05, %v1152_v41  ;;  %v1054_v37 = vmul.f32 0.05, %v1046_v60  ;;  %v1070_v4 = vmul.f32 0.01, %v2741_v9  ;;  %v1155_v17 = vadd.f32 %v1153_v42, %v2685_v15 }
 0x511   :  { %1262 = vst.msk [vmem:[#allocation8 + $0x1a8] sm:$0xff] %vm49_vm1, %v2823_v44  ;;  %1261 = vst.msk [vmem:[#allocation8 + $0x1a0] sm:$0xff] %vm49_vm1, %v2825_v0  ;;  %v1163_v63 = vmax.f32 %v1121_v11, 0.0  ;;  %v1169_v38 = vmax.f32 %v1127_v5, 0.0  ;;  %v1114_v39 = vmul.f32 %v2828_v47, %v1068_v50 }
 0x512   :  { %v1156_v50 = vadd.f32 %v1154_v54, %v2687_v14 }
 0x513   :  { %v2835_v45 = vmin.f32 %v1163_v63, 1.0  ;;  %v2837_v43 = vmin.f32 %v1169_v38, 1.0  ;;  %v1122_v6 = vsub.f32 %v1060_v53, %v1114_v39  ;;  %v1062_v63 = vadd.f32 %v1054_v37, %v2709_v31 }
 0x514   :  { %v2840_v48 = vpop.permute.xlu1 %1088 }
 0x515   :  { %1257 = vst.msk [vmem:[#allocation8 + $0x180] sm:$0xff] %vm49_vm1, %v2835_v45  ;;  %1263 = vst.msk [vmem:[#allocation8 + $0x1b0] sm:$0xff] %vm49_vm1, %v2837_v43  ;;  %v1164_v28 = vmax.f32 %v1122_v6, 0.0  ;;  %v1115_v35 = vmul.f32 %v2840_v48, %v1069_v32 }
 0x517   :  { %v2848_v24 = vmin.f32 %v1164_v28, 1.0  ;;  %v1123_v46 = vsub.f32 %v1061_v8, %v1115_v35 }
 0x519   :  { %1258 = vst.msk [vmem:[#allocation8 + $0x188] sm:$0xff] %vm49_vm1, %v2848_v24  ;;  %v1165_v30 = vmax.f32 %v1123_v46, 0.0 }
 0x51b   :  { %v2852_v1 = vmin.f32 %v1165_v30, 1.0 }
 0x51d   :  { %1259 = vst.msk [vmem:[#allocation8 + $0x190] sm:$0xff] %vm49_vm1, %v2852_v1 }
 0x546   :  { %v1150_v25 = vpop.xlane.xlu0 %1149 }
 0x54a   :  { %v1147_v16 = vpop.xlane.xlu0 %1146 }
 0x54e   :  { %v2858_v7 = vpop.permute.xlu0 %1111 }
 0x54f   :  { %v1120_v18 = vmul.f32 %v2858_v7, %v1074_v33 }
 0x551   :  { %v1128_v22 = vsub.f32 %v1066_v59, %v1120_v18 }
 0x553   :  { %v1170_v20 = vmax.f32 %v1128_v22, 0.0  ;;  %v1131_v58 = vpop.xlane.xlu1 %1130 }
 0x554   :  { %v1136_v52 = vrot.slane %v1131_v58, %v2050_v40  ;;  %v1140_v56 = vrot.slane %v1131_v58, %v2113_v29 }
 0x555   :  { %v2867_v55 = vmin.f32 %v1170_v20, 1.0 }
 0x556   :  { %v1157_v19 = vsub.f32 %v1136_v52, %v1147_v16  ;;  %v1158_v49 = vsub.f32 %v1140_v56, %v1150_v25 }
 0x557   :  { %1264 = vst.msk [vmem:[#allocation8 + $0x1b8] sm:$0xff] %vm49_vm1, %v2867_v55  ;;  %v1093_v11 = vpop.permute.xlu1 %1092 }
 0x558   :  { %v1159_v5 = vmul.f32 0.0045, %v1157_v19  ;;  %v1160_v53 = vmul.f32 0.0045, %v1158_v49  ;;  %v1116_v38 = vmul.f32 %v1093_v11, %v1070_v4 }
 0x55a   :  { %v1161_v39 = vadd.f32 %v1159_v5, %v1155_v17  ;;  %v1162_v23 = vadd.f32 %v1160_v53, %v1156_v50  ;;  %v1124_v6 = vsub.f32 %v1062_v63, %v1116_v38 }
 0x55c   :  { %v1179_v32 = vmax.f32 %v1161_v39, 0.0  ;;  %v1180_v28 = vmax.f32 %v1162_v23, 0.0  ;;  %v1166_v8 = vmax.f32 %v1124_v6, 0.0 }
 0x55e   :  { %v2875_v9 = vmin.f32 %v1179_v32, 1.0  ;;  %v2877_v35 = vmin.f32 %v1180_v28, 1.0  ;;  %v2879_v46 = vmin.f32 %v1166_v8, 1.0 }
 0x560   :  { %1266 = vst.msk [vmem:[#allocation10 + $0x180] sm:$0xff] %vm49_vm1, %v2875_v9  ;;  %1267 = vst.msk [vmem:[#allocation10 + $0x188] sm:$0xff] %vm49_vm1, %v2875_v9  ;;  %v2899_v15 = vmul.f32 %v2875_v9, %v2835_v45  ;;  %v2903_v14 = vmul.f32 %v2875_v9, %v2848_v24  ;;  %v2907_v31 = vmul.f32 %v2875_v9, %v2852_v1 }
 0x561   :  { %1268 = vst.msk [vmem:[#allocation10 + $0x190] sm:$0xff] %vm49_vm1, %v2875_v9  ;;  %1269 = vst.msk [vmem:[#allocation10 + $0x198] sm:$0xff] %vm49_vm1, %v2875_v9  ;;  %v2911_v30 = vmul.f32 %v2875_v9, %v2879_v46  ;;  %v2917_v25 = vmul.f32 %v2877_v35, %v2825_v0  ;;  %v2921_v2 = vmul.f32 %v2877_v35, %v2823_v44 }
 0x562   :  { %1270 = vst.msk [vmem:[#allocation10 + $0x1a0] sm:$0xff] %vm49_vm1, %v2877_v35  ;;  %1271 = vst.msk [vmem:[#allocation10 + $0x1a8] sm:$0xff] %vm49_vm1, %v2877_v35  ;;  %v2925_v16 = vmul.f32 %v2877_v35, %v2837_v43  ;;  %v2929_v57 = vmul.f32 %v2877_v35, %v2867_v55  ;;  %v1191_v33 = vmul.f32 %v2548_v12, %v2899_v15 }
 0x563   :  { %1272 = vst.msk [vmem:[#allocation10 + $0x1b0] sm:$0xff] %vm49_vm1, %v2877_v35  ;;  %1273 = vst.msk [vmem:[#allocation10 + $0x1b8] sm:$0xff] %vm49_vm1, %v2877_v35  ;;  %v1192_v59 = vmul.f32 %v2552_v34, %v2903_v14  ;;  %v1193_v18 = vmul.f32 %v2556_v10, %v2907_v31  ;;  %v1194_v13 = vmul.f32 %v2560_v36, %v2911_v30 }
 0x564   :  { %1260 = vst.msk [vmem:[#allocation8 + $0x198] sm:$0xff] %vm49_vm1, %v2879_v46  ;;  %v1195_v41 = vmul.f32 %v2548_v12, %v2917_v25  ;;  %v1196_v60 = vmul.f32 %v2552_v34, %v2921_v2  ;;  %v1197_v22 = vmul.f32 %v2556_v10, %v2925_v16  ;;  %v1198_v20 = vmul.f32 %v2560_v36, %v2929_v57 }
 0x565   :  { %v1199_v42 = vmul.f32 %v1191_v33, %v2814_v26  ;;  %v1200_v54 = vmul.f32 %v1192_v59, %v2828_v47  ;;  %v1201_v58 = vmul.f32 %v1193_v18, %v2840_v48  ;;  %v1202_v37 = vmul.f32 %v1194_v13, %v1093_v11  ;;  %v1042_v18 = vld [vmem:[#allocation2 + $0xa] sm:$0x3] }
 0x566   :  { %v1203_v52 = vmul.f32 %v1195_v41, %v2804_v27  ;;  %v1204_v56 = vmul.f32 %v1196_v60, %v2802_v3  ;;  %v1205_v12 = vmul.f32 %v1197_v22, %v2817_v62  ;;  %v1206_v36 = vmul.f32 %v1198_v20, %v2858_v7 }
 0x567   :  { %v1207_v34 = vsel %vm49_vm1, %v1199_v42, 0.0  ;;  %v1208_v10 = vsel %vm49_vm1, %v1200_v54, 0.0  ;;  %v1210_v48 = vsel %vm49_vm1, %v1201_v58, 0.0  ;;  %v1212_v62 = vsel %vm49_vm1, %v1202_v37, 0.0 }
 0x568   :  { %v1209_v19 = vadd.f32 %v1208_v10, %v1207_v34  ;;  %v1220_v26 = vsel %vm49_vm1, %v1203_v52, 0.0  ;;  %v1221_v47 = vsel %vm49_vm1, %v1204_v56, 0.0  ;;  %v1223_v3 = vsel %vm49_vm1, %v1205_v12, 0.0 }
 0x569   :  { %v1222_v49 = vadd.f32 %v1221_v47, %v1220_v26  ;;  %v1225_v50 = vsel %vm49_vm1, %v1206_v36, 0.0  ;;  %v1233_v41 = vmul.f32 0.9, %v2779_v51  ;;  %v1234_v22 = vmul.f32 0.9, %v2781_v61 }
 0x56a   :  { %v1211_v27 = vadd.f32 %v1210_v48, %v1209_v19  ;;  %v1242_v42 = vrot.slane %v1042_v18, 1  ;;  %v1281_v48 = vsub.f32 1.0, %v2823_v44 }
 0x56b   :  { %v1224_v4 = vadd.f32 %v1223_v3, %v1222_v49  ;;  %v1280_v49 = vsub.f32 1.0, %v2825_v0  ;;  %v1277_v3 = vsub.f32 1.0, %v2848_v24 }
 0x56c   :  { %v1213_v17 = vadd.f32 %v1212_v62, %v1211_v27  ;;  %v1276_v27 = vsub.f32 1.0, %v2835_v45  ;;  %v1289_v62 = vmul.f32 0.05, %v1281_v48  ;;  %v1384_v48 = vsub.f32 0.45, %v2875_v9 }
 0x56d   :  { %v1226_v11 = vadd.f32 %v1225_v50, %v1224_v4  ;;  %v1288_v4 = vmul.f32 0.05, %v1280_v49  ;;  %v1304_v50 = vmul.f32 0.01, %v2917_v25 }
 0x56e   :  { %v1214_v5 = vrot.slane %v1213_v17, 4 }
 0x56f   :  { %v1227_v53 = vrot.slane %v1226_v11, 4 }
 0x570   :  { %v1215_v7 = vadd.f32 %v1214_v5, %v1213_v17  ;;  %v1305_v17 = vmul.f32 0.01, %v2921_v2 }
 0x571   :  { %v1228_v63 = vadd.f32 %v1227_v53, %v1226_v11  ;;  %v1284_v53 = vmul.f32 0.05, %v1276_v27  ;;  %v1385_v27 = vsub.f32 0.45, %v2877_v35 }
 0x572   :  { %v1216_v38 = vrot.slane %v1215_v7, 2 }
 0x573   :  { %v1229_v39 = vrot.slane %v1228_v63, 2 }
 0x574   :  { %v1217_v23 = vadd.f32 %v1216_v38, %v1215_v7  ;;  %v1285_v7 = vmul.f32 0.05, %v1277_v3  ;;  %v1278_v38 = vsub.f32 1.0, %v2852_v1  ;;  %v1279_v3 = vsub.f32 1.0, %v2879_v46 }
 0x575   :  { %v1230_v6 = vadd.f32 %v1229_v39, %v1228_v63  ;;  %v1282_v63 = vsub.f32 1.0, %v2837_v43  ;;  %v1297_v39 = vadd.f32 %v1289_v62, %v2823_v44  ;;  %v1283_v62 = vsub.f32 1.0, %v2867_v55 }
 0x576   :  { %v1218_v32 = vrot.slane %v1217_v23, 1 }
 0x577   :  { %v1231_v28 = vrot.slane %v1230_v6, 1  ;;  %v1290_v44 = vmul.f32 0.05, %v1282_v63 }
 0x578   :  { %v1219_v8 = vadd.f32 %v1218_v32, %v1217_v23 }
 0x579   :  { %v1232_v33 = vadd.f32 %v1231_v28, %v1230_v6  ;;  %v1296_v6 = vadd.f32 %v1288_v4, %v2825_v0  ;;  %v1300_v28 = vmul.f32 0.01, %v2899_v15  ;;  %v1306_v15 = vmul.f32 0.01, %v2925_v16 }
 0x57a   :  { %v1235_v59 = vadd.f32 %v2590_v21, %v1219_v8  ;;  %v1301_v8 = vmul.f32 0.01, %v2903_v14  ;;  %v1302_v14 = vmul.f32 0.01, %v2907_v31 }
 0x57b   :  { %v1236_v13 = vadd.f32 %v2590_v21, %v1232_v33  ;;  %v1292_v33 = vadd.f32 %v1284_v53, %v2835_v45 }
 0x57c   :  { %v1237_v60 = vmul.f32 0.1, %v1235_v59 }
 0x57d   :  { %v1238_v20 = vmul.f32 0.1, %v1236_v13 }
 0x57e   :  { %v1239_v54 = vadd.f32 %v1237_v60, %v1233_v41  ;;  %v1286_v41 = vmul.f32 0.05, %v1278_v38 }
 0x57f   :  { %v1240_v58 = vadd.f32 %v1238_v20, %v1234_v22 }
 0x580   :  { %v1245_v52 = vadd.f32 %v1239_v54, %v1042_v18  ;;  %v1293_v18 = vadd.f32 %v1285_v7, %v2848_v24  ;;  %v1387_v7 = vmul.f32 0.05, %v1385_v27 }
 0x581   :  { %v1246_v56 = vadd.f32 %v1242_v42, %v1240_v58  ;;  %v1298_v58 = vadd.f32 %v1290_v44, %v2837_v43 }
 0x582   :  { %v2966_v12 = vmax.f32 %v1245_v52, 0.0 }
 0x583   :  { %v2968_v37 = vmax.f32 %v1246_v56, 0.0  ;;  %v1294_v56 = vadd.f32 %v1286_v41, %v2852_v1 }
 0x584   :  { %v1311_v34 = vrot.slane %v2966_v12, %v2050_v40 }
 0x585   :  { %v1330_v21 = vrot.slane %v2968_v37, %v2050_v40  ;;  %v1251_v51 = vrot.slane %v2968_v37, 7 }
 0x586   :  { %v1376_v61 = vmul.f32 %v1311_v34, %v2875_v9 }
 0x587   :  { %1336 = vbcast.lane.b32.xlu1 %v1330_v21, 264  ;;  %1332 = vbcast.lane.b32.xlu0 %v1330_v21, 256  ;;  %v1252_v10 = vsel %vm120_vm2, %v1251_v51, %v2966_v12  ;;  %v1377_v19 = vmul.f32 %v1330_v21, %v2877_v35 }
 0x588   :  { %1255 = vst.msk [vmem:[#allocation7 + $0xc] sm:$0x3] %vm47_vm0, %v1252_v10  ;;  %v1362_v36 = vsel %vm47_vm0, %v1252_v10, 0.0  ;;  %v1378_v26 = vsel %vm49_vm1, %v1376_v61, 0.0 }
 0x589   :  { %v1381_v47 = vsel %vm49_vm1, %v1377_v19, 0.0 }
 0x58b   :  { %1313 = vbcast.lane.b32.xlu1 %v1311_v34, 256  ;;  %1317 = vbcast.lane.b32.xlu0 %v1311_v34, 264 }
 0x58f   :  { %1340 = vbcast.lane.b32.xlu1 %v1330_v21, 272  ;;  %1321 = vbcast.lane.b32.xlu0 %v1311_v34, 272 }
 0x5ae   :  { %1363 = vadd.xlane.f32.xlu0 %v1362_v36 }
 0x5b2   :  { %1379 = vadd.xlane.f32.xlu0 %v1378_v26 }
 0x5b3   :  { %1382 = vadd.xlane.f32.xlu1 %v1381_v47 }
 0x5c4   :  { %1344 = vbcast.lane.b32.xlu1 %v1330_v21, 280 }
 0x5c8   :  { %1325 = vbcast.lane.b32.xlu0 %v1311_v34, 280 }
 0x5f9   :  { %v2989_v11 = vpop.permute.xlu1 %1336  ;;  %v2991_v5 = vpop.permute.xlu0 %1332 }
 0x5fa   :  { %v1351_v23 = vmul.f32 %v2989_v11, %v1305_v17  ;;  %v1350_v2 = vmul.f32 %v2991_v5, %v1304_v50  ;;  %v1386_v17 = vmul.f32 0.05, %v1384_v48 }
 0x5fc   :  { %v1359_v32 = vsub.f32 %v1297_v39, %v1351_v23  ;;  %v1358_v25 = vsub.f32 %v1296_v6, %v1350_v2  ;;  %v1287_v39 = vmul.f32 0.05, %v1279_v3  ;;  %v1291_v6 = vmul.f32 0.05, %v1283_v62 }
 0x5fd   :  { %v3002_v59 = vpop.permute.xlu1 %1313  ;;  %v3005_v13 = vpop.permute.xlu0 %1317  ;;  %v1388_v2 = vadd.f32 %v1386_v17, %v2875_v9 }
 0x5fe   :  { %v1401_v60 = vmax.f32 %v1359_v32, 0.0  ;;  %v1400_v0 = vmax.f32 %v1358_v25, 0.0  ;;  %v1346_v22 = vmul.f32 %v3002_v59, %v1300_v28  ;;  %v1347_v20 = vmul.f32 %v3005_v13, %v1301_v8 }
 0x5ff   :  { %v1303_v25 = vmul.f32 0.01, %v2911_v30  ;;  %v1389_v28 = vadd.f32 %v1387_v7, %v2877_v35  ;;  %v1295_v41 = vadd.f32 %v1287_v39, %v2879_v46 }
 0x600   :  { %v3011_v42 = vmin.f32 %v1401_v60, 1.0  ;;  %v3013_v45 = vmin.f32 %v1400_v0, 1.0  ;;  %v1354_v54 = vsub.f32 %v1292_v33, %v1346_v22  ;;  %v1355_v24 = vsub.f32 %v1293_v18, %v1347_v20 }
 0x601   :  { %v3016_v52 = vpop.permute.xlu1 %1340  ;;  %v3019_v34 = vpop.permute.xlu0 %1321  ;;  %v1307_v18 = vmul.f32 0.01, %v2929_v57  ;;  %v1299_v20 = vadd.f32 %v1291_v6, %v2867_v55 }
 0x602   :  { %1495 = vst.msk [vmem:[#allocation8 + $0x1e8] sm:$0xff] %vm49_vm1, %v3011_v42  ;;  %1494 = vst.msk [vmem:[#allocation8 + $0x1e0] sm:$0xff] %vm49_vm1, %v3013_v45  ;;  %v1396_v31 = vmax.f32 %v1354_v54, 0.0  ;;  %v1397_v16 = vmax.f32 %v1355_v24, 0.0  ;;  %v1352_v21 = vmul.f32 %v3016_v52, %v1306_v15  ;;  %v1348_v51 = vmul.f32 %v3019_v34, %v1302_v14 }
 0x604   :  { %v3027_v61 = vmin.f32 %v1396_v31, 1.0  ;;  %v3029_v43 = vmin.f32 %v1397_v16, 1.0  ;;  %v1360_v10 = vsub.f32 %v1298_v58, %v1352_v21  ;;  %v1356_v1 = vsub.f32 %v1294_v56, %v1348_v51 }
 0x606   :  { %1490 = vst.msk [vmem:[#allocation8 + $0x1c0] sm:$0xff] %vm49_vm1, %v3027_v61  ;;  %1491 = vst.msk [vmem:[#allocation8 + $0x1c8] sm:$0xff] %vm49_vm1, %v3029_v43  ;;  %v1402_v19 = vmax.f32 %v1360_v10, 0.0  ;;  %v1398_v36 = vmax.f32 %v1356_v1, 0.0  ;;  %v3103_v1 = vld [vmem:[#allocation5] sm:$0xff] }
 0x608   :  { %v3035_v26 = vmin.f32 %v1402_v19, 1.0  ;;  %v3037_v47 = vmin.f32 %v1398_v36, 1.0  ;;  %v3107_v36 = vld [vmem:[#allocation5 + $0x8] sm:$0xff] }
 0x60a   :  { %1496 = vst.msk [vmem:[#allocation8 + $0x1f0] sm:$0xff] %vm49_vm1, %v3035_v26  ;;  %1492 = vst.msk [vmem:[#allocation8 + $0x1d0] sm:$0xff] %vm49_vm1, %v3037_v47 }
 0x63b   :  { %v1364_v49 = vpop.xlane.xlu0 %1363 }
 0x63c   :  { %v1369_v4 = vrot.slane %v1364_v49, %v2050_v40  ;;  %v1373_v50 = vrot.slane %v1364_v49, %v2113_v29  ;;  %v3111_v49 = vld [vmem:[#allocation5 + $0x10] sm:$0xff] }
 0x63f   :  { %v1380_v53 = vpop.xlane.xlu0 %1379 }
 0x640   :  { %v1390_v63 = vsub.f32 %v1369_v4, %v1380_v53  ;;  %v1383_v38 = vpop.xlane.xlu1 %1382 }
 0x641   :  { %v1391_v23 = vsub.f32 %v1373_v50, %v1383_v38  ;;  %v3136_v38 = vld [vmem:[#allocation5 + $0x18] sm:$0xff] }
 0x642   :  { %v1392_v32 = vmul.f32 0.0045, %v1390_v63 }
 0x643   :  { %v1393_v8 = vmul.f32 0.0045, %v1391_v23  ;;  %v1326_v33 = vpop.permute.xlu0 %1325 }
 0x644   :  { %v1394_v44 = vadd.f32 %v1392_v32, %v1388_v2  ;;  %v1349_v60 = vmul.f32 %v1326_v33, %v1303_v25  ;;  %v1345_v0 = vpop.permute.xlu1 %1344 }
 0x645   :  { %v1395_v22 = vadd.f32 %v1393_v8, %v1389_v28  ;;  %v1353_v15 = vmul.f32 %v1345_v0, %v1307_v18 }
 0x646   :  { %v1412_v14 = vmax.f32 %v1394_v44, 0.0  ;;  %v1357_v9 = vsub.f32 %v1295_v41, %v1349_v60 }
 0x647   :  { %v1413_v54 = vmax.f32 %v1395_v22, 0.0  ;;  %v1361_v24 = vsub.f32 %v1299_v20, %v1353_v15 }
 0x648   :  { %v3055_v30 = vmin.f32 %v1412_v14, 1.0  ;;  %v1399_v35 = vmax.f32 %v1357_v9, 0.0 }
 0x649   :  { %v3057_v58 = vmin.f32 %v1413_v54, 1.0  ;;  %v1403_v56 = vmax.f32 %v1361_v24, 0.0 }
 0x64a   :  { %1499 = vst.msk [vmem:[#allocation10 + $0x1c0] sm:$0xff] %vm49_vm1, %v3055_v30  ;;  %1500 = vst.msk [vmem:[#allocation10 + $0x1c8] sm:$0xff] %vm49_vm1, %v3055_v30  ;;  %v3069_v55 = vmul.f32 %v3055_v30, %v3027_v61  ;;  %v3073_v46 = vmul.f32 %v3055_v30, %v3029_v43  ;;  %v3077_v57 = vmul.f32 %v3055_v30, %v3037_v47  ;;  %v3079_v31 = vmin.f32 %v1399_v35, 1.0 }
 0x64b   :  { %1501 = vst.msk [vmem:[#allocation10 + $0x1d0] sm:$0xff] %vm49_vm1, %v3055_v30  ;;  %1502 = vst.msk [vmem:[#allocation10 + $0x1d8] sm:$0xff] %vm49_vm1, %v3055_v30  ;;  %v3089_v16 = vmin.f32 %v1403_v56, 1.0  ;;  %v3093_v21 = vmul.f32 %v3057_v58, %v3013_v45  ;;  %v3097_v51 = vmul.f32 %v3057_v58, %v3011_v42  ;;  %v3101_v10 = vmul.f32 %v3057_v58, %v3035_v26 }
 0x64c   :  { %1503 = vst.msk [vmem:[#allocation10 + $0x1e0] sm:$0xff] %vm49_vm1, %v3057_v58  ;;  %1504 = vst.msk [vmem:[#allocation10 + $0x1e8] sm:$0xff] %vm49_vm1, %v3057_v58  ;;  %v1424_v19 = vmul.f32 %v3103_v1, %v3069_v55  ;;  %v1425_v48 = vmul.f32 %v3107_v36, %v3073_v46  ;;  %v1426_v27 = vmul.f32 %v3111_v49, %v3077_v57 }
 0x64d   :  { %1505 = vst.msk [vmem:[#allocation10 + $0x1f0] sm:$0xff] %vm49_vm1, %v3057_v58  ;;  %1506 = vst.msk [vmem:[#allocation10 + $0x1f8] sm:$0xff] %vm49_vm1, %v3057_v58  ;;  %v3117_v3 = vmul.f32 %v3055_v30, %v3079_v31  ;;  %v3123_v62 = vmul.f32 %v3057_v58, %v3089_v16  ;;  %v1428_v4 = vmul.f32 %v3103_v1, %v3093_v21 }
 0x64e   :  { %1493 = vst.msk [vmem:[#allocation8 + $0x1d8] sm:$0xff] %vm49_vm1, %v3079_v31  ;;  %v1429_v17 = vmul.f32 %v3107_v36, %v3097_v51  ;;  %v1430_v50 = vmul.f32 %v3111_v49, %v3101_v10  ;;  %1497 = vst.msk [vmem:[#allocation8 + $0x1f8] sm:$0xff] %vm49_vm1, %v3089_v16  ;;  %v1432_v53 = vmul.f32 %v1424_v19, %v3002_v59 }
 0x64f   :  { %v1433_v7 = vmul.f32 %v1425_v48, %v3005_v13  ;;  %v1434_v63 = vmul.f32 %v1426_v27, %v3019_v34  ;;  %v1427_v39 = vmul.f32 %v3136_v38, %v3117_v3  ;;  %v1431_v23 = vmul.f32 %v3136_v38, %v3123_v62 }
 0x650   :  { %v1436_v6 = vmul.f32 %v1428_v4, %v2991_v5  ;;  %v1437_v2 = vmul.f32 %v1429_v17, %v2989_v11  ;;  %v1438_v32 = vmul.f32 %v1430_v50, %v3016_v52  ;;  %v1440_v59 = vsel %vm49_vm1, %v1432_v53, 0.0  ;;  %v3156_v17 = vld [vmem:[%s3406_s2] ss:$0 sm:$0xff]  ;;  %v1275_v53 = vld [vmem:[#allocation2 + $0xc] sm:$0x3]  ;;  %s1939_s2 = smov [#allocation8]  }
 0x651   :  { %v1441_v13 = vsel %vm49_vm1, %v1433_v7, 0.0  ;;  %v1435_v25 = vmul.f32 %v1427_v39, %v1326_v33  ;;  %v1439_v28 = vmul.f32 %v1431_v23, %v1345_v0  ;;  %v1443_v44 = vsel %vm49_vm1, %v1434_v63, 0.0  ;;  %s1757_s25 = sshll.u32 %s1939_s2, 4  ;;  %s3294_s25 = int_to_ptr.vmem [resolvable:$true] %s1757_s25 }
 0x652   :  { %v1442_v34 = vadd.f32 %v1441_v13, %v1440_v59  ;;  %v1453_v8 = vsel %vm49_vm1, %v1436_v6, 0.0  ;;  %v1454_v18 = vsel %vm49_vm1, %v1437_v2, 0.0  ;;  %v1456_v5 = vsel %vm49_vm1, %v1438_v32, 0.0  ;;  %s1856_s30 = scalar_lea.vmem %s3294_s25, 9216  ;;  %p1861_p3 = scmp.lt.s32.totalorder %s3294_s25, %s3294_s25 }
 0x653   :  { %v1455_v41 = vadd.f32 %v1454_v18, %v1453_v8  ;;  %v1445_v11 = vsel %vm49_vm1, %v1435_v25, 0.0  ;;  %v1458_v20 = vsel %vm49_vm1, %v1439_v28, 0.0  ;;  %v1466_v63 = vmul.f32 0.9, %v2966_v12  ;;  %p1857_p2 = scmp.ne.s32.totalorder %s3294_s25, %s1856_s30  ;;  %p1862_p4 = scmp.lt.s32.totalorder %s1856_s30, %s1856_s30 }
 0x654   :  { %v1444_v60 = vadd.f32 %v1443_v44, %v1442_v34  ;;  %v1467_v23 = vmul.f32 0.9, %v2968_v37  ;;  %v1475_v2 = vrot.slane %v1275_v53, 1 }
 0x655   :  { %v1457_v52 = vadd.f32 %v1456_v5, %v1455_v41  ;;  %p1863_p5 = por %p1862_p4, %p1861_p3 }
 0x656   :  { %v1446_v22 = vadd.f32 %v1445_v11, %v1444_v60 }
 0x657   :  { %v1459_v15 = vadd.f32 %v1458_v20, %v1457_v52  ;;  %v1514_v52 = vsub.f32 1.0, %v3011_v42  ;;  %v1509_v20 = vsub.f32 1.0, %v3027_v61  ;;  %p1864_p6 = pnand %p1863_p5, %p1857_p2 }
 0x658   :  { %v1447_v33 = vrot.slane %v1446_v22, 4 }
 0x659   :  { %v1460_v14 = vrot.slane %v1459_v15, 4 }
 0x65a   :  { %v1448_v0 = vadd.f32 %v1447_v33, %v1446_v22  ;;  %v1513_v22 = vsub.f32 1.0, %v3013_v45  ;;  %v1522_v33 = vmul.f32 0.05, %v1514_v52  ;;  %v1535_v52 = vmul.f32 0.01, %v3077_v57 }
 0x65b   :  { %v1461_v9 = vadd.f32 %v1460_v14, %v1459_v15  ;;  %v1515_v15 = vsub.f32 1.0, %v3035_v26 }
 0x65c   :  { %v1449_v54 = vrot.slane %v1448_v0, 2  ;;  %v1521_v14 = vmul.f32 0.05, %v1513_v22 }
 0x65d   :  { %v1462_v24 = vrot.slane %v1461_v9, 2 }
 0x65e   :  { %v1450_v35 = vadd.f32 %v1449_v54, %v1448_v0  ;;  %v1538_v0 = vmul.f32 0.01, %v3097_v51  ;;  %v1510_v54 = vsub.f32 1.0, %v3029_v43 }
 0x65f   :  { %v1463_v56 = vadd.f32 %v1462_v24, %v1461_v9  ;;  %v1537_v9 = vmul.f32 0.01, %v3093_v21  ;;  %v1530_v21 = vadd.f32 %v1522_v33, %v3011_v42 }
 0x660   :  { %v1451_v19 = vrot.slane %v1450_v35, 1 }
 0x661   :  { %v1464_v48 = vrot.slane %v1463_v56, 1 }
 0x662   :  { %v1452_v27 = vadd.f32 %v1451_v19, %v1450_v35  ;;  %v1523_v19 = vmul.f32 0.05, %v1515_v15 }
 0x663   :  { %v1465_v4 = vadd.f32 %v1464_v48, %v1463_v56  ;;  %v1517_v56 = vmul.f32 0.05, %v1509_v20  ;;  %v1937_v48 = vmov 1.0  }
 0x664   :  { %v1468_v50 = vadd.f32 %v3156_v17, %v1452_v27  ;;  %50 = vst.msk [vmem:[#allocation8] sm:$0xff] %vm49_vm1, %v1937_v48  ;;  %51 = vst.msk [vmem:[#allocation8 + $0x8] sm:$0xff] %vm49_vm1, %v1937_v48  ;;  %v1529_v27 = vadd.f32 %v1521_v14, %v3013_v45 }
 0x665   :  { %v1469_v7 = vadd.f32 %v3156_v17, %v1465_v4  ;;  %52 = vst.msk [vmem:[#allocation8 + $0x10] sm:$0xff] %vm49_vm1, %v1937_v48  ;;  %53 = vst.msk [vmem:[#allocation8 + $0x18] sm:$0xff] %vm49_vm1, %v1937_v48 }
 0x666   :  { %v1470_v39 = vmul.f32 0.1, %v1468_v50  ;;  %54 = vst.msk [vmem:[#allocation8 + $0x20] sm:$0xff] %vm49_vm1, %v1937_v48  ;;  %55 = vst.msk [vmem:[#allocation8 + $0x28] sm:$0xff] %vm49_vm1, %v1937_v48  ;;  %v1938_v50 = vmov 1.3  }
 0x667   :  { %v1471_v6 = vmul.f32 0.1, %v1469_v7  ;;  %56 = vst.msk [vmem:[#allocation8 + $0x30] sm:$0xff] %vm49_vm1, %v1937_v48  ;;  %57 = vst.msk [vmem:[#allocation8 + $0x38] sm:$0xff] %vm49_vm1, %v1937_v48  ;;  %v1539_v7 = vmul.f32 0.01, %v3101_v10 }
 0x668   :  { %v1472_v32 = vadd.f32 %v1470_v39, %v1466_v63  ;;  %126 = vst.msk [vmem:[#allocation8 + $0x40] sm:$0xff] %vm49_vm1, %v1937_v48  ;;  %127 = vst.msk [vmem:[#allocation8 + $0x48] sm:$0xff] %vm49_vm1, %v1937_v48  ;;  %v1525_v63 = vadd.f32 %v1517_v56, %v3027_v61  ;;  %v1534_v10 = vmul.f32 0.01, %v3073_v46 }
 0x669   :  { %v1473_v59 = vadd.f32 %v1471_v6, %v1467_v23  ;;  %128 = vst.msk [vmem:[#allocation8 + $0x50] sm:$0xff] %vm49_vm1, %v1937_v48  ;;  %129 = vst.msk [vmem:[#allocation8 + $0x58] sm:$0xff] %vm49_vm1, %v1937_v48  ;;  %v1531_v23 = vadd.f32 %v1523_v19, %v3035_v26 }
 0x66a   :  { %v1478_v13 = vadd.f32 %v1472_v32, %v1275_v53  ;;  %130 = vst.msk [vmem:[#allocation8 + $0x60] sm:$0xff] %vm49_vm1, %v1937_v48  ;;  %131 = vst.msk [vmem:[#allocation8 + $0x68] sm:$0xff] %vm49_vm1, %v1937_v48  ;;  %v1533_v53 = vmul.f32 0.01, %v3069_v55  ;;  %v1511_v32 = vsub.f32 1.0, %v3037_v47 }
 0x66b   :  { %v1479_v25 = vadd.f32 %v1475_v2, %v1473_v59  ;;  %132 = vst.msk [vmem:[#allocation8 + $0x70] sm:$0xff] %vm49_vm1, %v1937_v48  ;;  %133 = vst.msk [vmem:[#allocation8 + $0x78] sm:$0xff] %vm49_vm1, %v1937_v48  ;;  %v1518_v2 = vmul.f32 0.05, %v1510_v54  ;;  %v1540_v48 = vmul.f32 0.01, %v3123_v62 }
 0x66c   :  { %v3162_v34 = vmax.f32 %v1478_v13, 0.0  ;;  %58 = vst.msk [vmem:[#allocation10] sm:$0xff] %vm49_vm1, %v1938_v50  ;;  %59 = vst.msk [vmem:[#allocation10 + $0x8] sm:$0xff] %vm49_vm1, %v1938_v50 }
 0x66d   :  { %v3164_v28 = vmax.f32 %v1479_v25, 0.0  ;;  %60 = vst.msk [vmem:[#allocation10 + $0x10] sm:$0xff] %vm49_vm1, %v1938_v50  ;;  %61 = vst.msk [vmem:[#allocation10 + $0x18] sm:$0xff] %vm49_vm1, %v1938_v50 }
 0x66e   :  { %v1544_v8 = vrot.slane %v3162_v34, %v2050_v40  ;;  %62 = vst.msk [vmem:[#allocation10 + $0x20] sm:$0xff] %vm49_vm1, %v1938_v50  ;;  %63 = vst.msk [vmem:[#allocation10 + $0x28] sm:$0xff] %vm49_vm1, %v1938_v50 }
 0x66f   :  { %v1563_v18 = vrot.slane %v3164_v28, %v2050_v40  ;;  %v1484_v12 = vrot.slane %v3164_v28, 7  ;;  %64 = vst.msk [vmem:[#allocation10 + $0x30] sm:$0xff] %vm49_vm1, %v1938_v50  ;;  %65 = vst.msk [vmem:[#allocation10 + $0x38] sm:$0xff] %vm49_vm1, %v1938_v50  ;;  %v1618_v50 = vsub.f32 0.45, %v3057_v58 }
 0x670   :  { %v1609_v37 = vmul.f32 %v1544_v8, %v3055_v30 }
 0x671   :  { %1569 = vbcast.lane.b32.xlu1 %v1563_v18, 264  ;;  %1565 = vbcast.lane.b32.xlu0 %v1563_v18, 256  ;;  %v1610_v44 = vmul.f32 %v1563_v18, %v3057_v58  ;;  %v1485_v41 = vsel %vm120_vm2, %v1484_v12, %v3162_v34  ;;  %v1526_v12 = vadd.f32 %v1518_v2, %v3029_v43 }
 0x672   :  { %1488 = vst.msk [vmem:[#allocation7 + $0xe] sm:$0x3] %vm47_vm0, %v1485_v41  ;;  %v1611_v5 = vsel %vm49_vm1, %v1609_v37, 0.0  ;;  %v1595_v11 = vsel %vm47_vm0, %v1485_v41, 0.0 }
 0x673   :  { %v1614_v60 = vsel %vm49_vm1, %v1610_v44, 0.0 }
 0x675   :  { %1573 = vbcast.lane.b32.xlu0 %v1563_v18, 272  ;;  %1546 = vbcast.lane.b32.xlu1 %v1544_v8, 256 }
 0x679   :  { %1550 = vbcast.lane.b32.xlu1 %v1544_v8, 264 }
 0x67d   :  { %1554 = vbcast.lane.b32.xlu1 %v1544_v8, 272 }
 0x694   :  { %1615 = vadd.xlane.f32.xlu0 %v1614_v60  ;;  %v1519_v60 = vmul.f32 0.05, %v1511_v32 }
 0x696   :  { %v1527_v15 = vadd.f32 %v1519_v60, %v3037_v47  ;;  %v1516_v47 = vsub.f32 1.0, %v3089_v16 }
 0x698   :  { %1612 = vadd.xlane.f32.xlu0 %v1611_v5  ;;  %v1524_v19 = vmul.f32 0.05, %v1516_v47 }
 0x6a1   :  { %1596 = vadd.xlane.f32.xlu1 %v1595_v11 }
 0x6ae   :  { %1577 = vbcast.lane.b32.xlu0 %v1563_v18, 280 }
 0x6b2   :  { %1558 = vbcast.lane.b32.xlu1 %v1544_v8, 280 }
 0x6e3   :  { %v3186_v24 = vpop.permute.xlu1 %1569  ;;  %v3188_v35 = vpop.permute.xlu0 %1565 }
 0x6e4   :  { %v1584_v51 = vmul.f32 %v3186_v24, %v1538_v0  ;;  %v1583_v4 = vmul.f32 %v3188_v35, %v1537_v9 }
 0x6e6   :  { %v1592_v42 = vsub.f32 %v1530_v21, %v1584_v51  ;;  %v1591_v45 = vsub.f32 %v1529_v27, %v1583_v4  ;;  %v1532_v51 = vadd.f32 %v1524_v19, %v3089_v16  ;;  %v1617_v4 = vsub.f32 0.45, %v3055_v30 }
 0x6e7   :  { %v3221_v39 = vpop.permute.xlu1 %1546  ;;  %v3224_v6 = vpop.permute.xlu0 %1573 }
 0x6e8   :  { %v3227_v59 = vmax.f32 %v1592_v42, 0.0  ;;  %v3229_v13 = vmax.f32 %v1591_v45, 0.0  ;;  %v1579_v25 = vmul.f32 %v3221_v39, %v1533_v53  ;;  %v1585_v55 = vmul.f32 %v3224_v6, %v1539_v7 }
 0x6e9   :  { %v1512_v42 = vsub.f32 1.0, %v3079_v31  ;;  %v1619_v7 = vmul.f32 0.05, %v1617_v4 }
 0x6ea   :  { %v1642_v61 = vmin.f32 %v3227_v59, 1.0  ;;  %v1641_v8 = vmin.f32 %v3229_v13, 1.0  ;;  %v1587_v26 = vsub.f32 %v1525_v63, %v1579_v25  ;;  %v1593_v18 = vsub.f32 %v1531_v23, %v1585_v55 }
 0x6eb   :  { %v3237_v37 = vpop.permute.xlu1 %1550  ;;  %v1620_v63 = vmul.f32 0.05, %v1618_v50  ;;  %v1520_v32 = vmul.f32 0.05, %v1512_v42 }
 0x6ec   :  { %1728 = vst.msk [vmem:[#allocation8 + $0x228] sm:$0xff] %vm49_vm1, %v1642_v61  ;;  %1727 = vst.msk [vmem:[#allocation8 + $0x220] sm:$0xff] %vm49_vm1, %v1641_v8  ;;  %v3245_v44 = vmax.f32 %v1587_v26, 0.0  ;;  %v3247_v46 = vmax.f32 %v1593_v18, 0.0  ;;  %v1580_v41 = vmul.f32 %v3237_v37, %v1534_v10  ;;  %v1536_v10 = vmul.f32 0.01, %v3117_v3 }
 0x6ed   :  { %v1621_v26 = vadd.f32 %v1619_v7, %v3055_v30  ;;  %v1622_v18 = vadd.f32 %v1620_v63, %v3057_v58 }
 0x6ee   :  { %v1637_v5 = vmin.f32 %v3245_v44, 1.0  ;;  %v1643_v43 = vmin.f32 %v3247_v46, 1.0  ;;  %v1588_v11 = vsub.f32 %v1526_v12, %v1580_v41 }
 0x6ef   :  { %v3253_v22 = vpop.permute.xlu1 %1554 }
 0x6f0   :  { %1723 = vst.msk [vmem:[#allocation8 + $0x200] sm:$0xff] %vm49_vm1, %v1637_v5  ;;  %1729 = vst.msk [vmem:[#allocation8 + $0x230] sm:$0xff] %vm49_vm1, %v1643_v43  ;;  %v3261_v20 = vmax.f32 %v1588_v11, 0.0  ;;  %v1581_v33 = vmul.f32 %v3253_v22, %v1535_v52 }
 0x6f2   :  { %v1638_v14 = vmin.f32 %v3261_v20, 1.0  ;;  %v1589_v0 = vsub.f32 %v1527_v15, %v1581_v33 }
 0x6f4   :  { %1724 = vst.msk [vmem:[#allocation8 + $0x208] sm:$0xff] %vm49_vm1, %v1638_v14  ;;  %v3269_v57 = vmax.f32 %v1589_v0, 0.0 }
 0x6f6   :  { %v1639_v9 = vmin.f32 %v3269_v57, 1.0 }
 0x6f8   :  { %1725 = vst.msk [vmem:[#allocation8 + $0x210] sm:$0xff] %vm49_vm1, %v1639_v9 }
 0x721   :  { %v1616_v54 = vpop.xlane.xlu0 %1615 }
 0x725   :  { %v1613_v56 = vpop.xlane.xlu0 %1612 }
 0x729   :  { %v3277_v21 = vpop.permute.xlu0 %1577 }
 0x72a   :  { %v1586_v27 = vmul.f32 %v3277_v21, %v1540_v48 }
 0x72c   :  { %v1594_v45 = vsub.f32 %v1532_v51, %v1586_v27 }
 0x72e   :  { %v1636_v53 = vmax.f32 %v1594_v45, 0.0  ;;  %v1597_v23 = vpop.xlane.xlu1 %1596 }
 0x72f   :  { %v1602_v2 = vrot.slane %v1597_v23, %v2050_v40  ;;  %v1606_v62 = vrot.slane %v1597_v23, %v2113_v29  ;;  %v1528_v40 = vadd.f32 %v1520_v32, %v3079_v31 }
 0x730   :  { %v1644_v25 = vmin.f32 %v1636_v53, 1.0 }
 0x731   :  { %v1623_v16 = vsub.f32 %v1602_v2, %v1613_v56  ;;  %v1624_v55 = vsub.f32 %v1606_v62, %v1616_v54 }
 0x732   :  { %1730 = vst.msk [vmem:[#allocation8 + $0x238] sm:$0xff] %vm49_vm1, %v1644_v25  ;;  %v3290_v12 = vpop.permute.xlu1 %1558 }
 0x733   :  { %v1625_v41 = vmul.f32 0.0045, %v1623_v16  ;;  %v1626_v60 = vmul.f32 0.0045, %v1624_v55  ;;  %v1582_v29 = vmul.f32 %v3290_v12, %v1536_v10 }
 0x735   :  { %v1627_v11 = vadd.f32 %v1625_v41, %v1621_v26  ;;  %v1628_v52 = vadd.f32 %v1626_v60, %v1622_v18  ;;  %v1590_v15 = vsub.f32 %v1528_v40, %v1582_v29 }
 0x737   :  { %v1645_v3 = vmax.f32 %v1627_v11, 0.0  ;;  %v1646_v33 = vmax.f32 %v1628_v52, 0.0  ;;  %v1632_v0 = vmax.f32 %v1590_v15, 0.0 }
 0x739   :  { %v1647_v30 = vmin.f32 %v1645_v3, 1.0  ;;  %v1648_v58 = vmin.f32 %v1646_v33, 1.0  ;;  %v1640_v54 = vmin.f32 %v1632_v0, 1.0 }
 0x73b   :  { %v1653_v31 = vmul.f32 %v1648_v58, %v1641_v8  ;;  %v1654_v47 = vmul.f32 %v1648_v58, %v1642_v61  ;;  %v1655_v56 = vmul.f32 %v1648_v58, %v1643_v43  ;;  %v1656_v19 = vmul.f32 %v1648_v58, %v1644_v25  ;;  %1732 = vst.msk [vmem:[#allocation10 + $0x200] sm:$0xff] %vm49_vm1, %v1647_v30 }
 0x73c   :  { %1733 = vst.msk [vmem:[#allocation10 + $0x208] sm:$0xff] %vm49_vm1, %v1647_v30  ;;  %1734 = vst.msk [vmem:[#allocation10 + $0x210] sm:$0xff] %vm49_vm1, %v1647_v30  ;;  %v1649_v59 = vmul.f32 %v1647_v30, %v1637_v5  ;;  %v1650_v13 = vmul.f32 %v1647_v30, %v1638_v14  ;;  %v1651_v61 = vmul.f32 %v1647_v30, %v1639_v9 }
 0x73d   :  { %1735 = vst.msk [vmem:[#allocation10 + $0x218] sm:$0xff] %vm49_vm1, %v1647_v30  ;;  %1736 = vst.msk [vmem:[#allocation10 + $0x220] sm:$0xff] %vm49_vm1, %v1648_v58  ;;  %v1652_v8 = vmul.f32 %v1647_v30, %v1640_v54 }
 0x73e   :  { %1737 = vst.msk [vmem:[#allocation10 + $0x228] sm:$0xff] %vm49_vm1, %v1648_v58  ;;  %1738 = vst.msk [vmem:[#allocation10 + $0x230] sm:$0xff] %vm49_vm1, %v1648_v58 }
 0x73f   :  { %1739 = vst.msk [vmem:[#allocation10 + $0x238] sm:$0xff] %vm49_vm1, %v1648_v58  ;;  %1726 = vst.msk [vmem:[#allocation8 + $0x218] sm:$0xff] %vm49_vm1, %v1640_v54 }
 0x740   :  { %1867 = shalt.err (!%p1864_p6)
}
 0x741   :  { %s1868_s8 = scalar_lea.hbm %s3408_s4, 9216 }
 0x742   :  { %p1869_p7 = scmp.ne.s32.totalorder %s3408_s4, %s1868_s8  ;;  %p1872_p8 = scmp.lt.u32.totalorder %s1868_s8, %s3408_s4 }
 0x744   :  { %p1874_p9 = pnand %p1872_p8, %p1869_p7 }
 0x746   :  { %1877 = shalt.err (!%p1874_p9)
}
 0x747   :  { %1763 = dma.vmem_to_hbm [thread:$0]  %s3294_s25, 9216, %s3408_s4, [#allocation9], %s1934_s0, %s1934_s0, %s1935_s17   ;;  %v1661_v44 = vmul.f32 %v3103_v1, %v1653_v31  ;;  %v1662_v46 = vmul.f32 %v3107_v36, %v1654_v47  ;;  %v1663_v5 = vmul.f32 %v3111_v49, %v1655_v56  ;;  %v1664_v43 = vmul.f32 %v3136_v38, %v1656_v19 }
 0x748   :  { %s1878_s15 = scalar_lea.vmem %s3296_s27, 9216  ;;  %p1883_p11 = scmp.lt.s32.totalorder %s3296_s27, %s3296_s27 }
 0x749   :  { %p1879_p10 = scmp.ne.s32.totalorder %s3296_s27, %s1878_s15  ;;  %p1884_p12 = scmp.lt.s32.totalorder %s1878_s15, %s1878_s15 }
 0x74b   :  { %p1885_p13 = por %p1884_p12, %p1883_p11 }
 0x74d   :  { %p1886_p0 = pnand %p1885_p13, %p1879_p10 }
 0x74f   :  { %1889 = shalt.err (!%p1886_p0)
}
 0x750   :  { %s1890_s4 = scalar_lea.hbm %s3409_s5, 9216 }
 0x751   :  { %p1891_p1 = scmp.ne.s32.totalorder %s3409_s5, %s1890_s4  ;;  %p1894_p2 = scmp.lt.u32.totalorder %s1890_s4, %s3409_s5 }
 0x753   :  { %p1896_p3 = pnand %p1894_p2, %p1891_p1 }
 0x755   :  { %1899 = shalt.err (!%p1896_p3)
}
 0x756   :  { %1775 = dma.vmem_to_hbm [thread:$0]  %s3296_s27, 9216, %s3409_s5, [#allocation9], %s1934_s0, %s1934_s0, %s1935_s17   ;;  %v1657_v20 = vmul.f32 %v3103_v1, %v1649_v59  ;;  %v1658_v14 = vmul.f32 %v3107_v36, %v1650_v13  ;;  %v1659_v57 = vmul.f32 %v3111_v49, %v1651_v61  ;;  %v1660_v9 = vmul.f32 %v3136_v38, %v1652_v8  ;;  %v1508_v40 = vld [vmem:[#allocation2 + $0xe] sm:$0x3] }
 0x757   :  { %v1669_v48 = vmul.f32 %v1661_v44, %v3188_v35  ;;  %v1670_v51 = vmul.f32 %v1662_v46, %v3186_v24  ;;  %v1671_v42 = vmul.f32 %v1663_v5, %v3224_v6  ;;  %v1672_v38 = vmul.f32 %v1664_v43, %v3277_v21  ;;  %s1941_s5 = smov [#allocation7]  }
 0x758   :  { %v1665_v27 = vmul.f32 %v1657_v20, %v3221_v39  ;;  %v1666_v4 = vmul.f32 %v1658_v14, %v3237_v37  ;;  %v1667_v50 = vmul.f32 %v1659_v57, %v3253_v22  ;;  %v1668_v49 = vmul.f32 %v1660_v9, %v3290_v12  ;;  %s1745_s0 = sshll.u32 %s1941_s5, 4  ;;  %s1746_s0 = int_to_ptr.vmem [resolvable:$true] %s1745_s0 }
 0x759   :  { %v1686_v1 = vsel %vm49_vm1, %v1669_v48, 0.0  ;;  %v1687_v36 = vsel %vm49_vm1, %v1670_v51, 0.0  ;;  %v1689_v22 = vsel %vm49_vm1, %v1671_v42, 0.0  ;;  %v1691_v63 = vsel %vm49_vm1, %v1672_v38, 0.0  ;;  %s1900_s17 = scalar_lea.vmem %s1746_s0, 288  ;;  %p1905_p5 = scmp.lt.s32.totalorder %s1746_s0, %s1746_s0 }
 0x75a   :  { %v1673_v35 = vsel %vm49_vm1, %v1665_v27, 0.0  ;;  %v1674_v24 = vsel %vm49_vm1, %v1666_v4, 0.0  ;;  %v1688_v39 = vadd.f32 %v1687_v36, %v1686_v1  ;;  %v1676_v37 = vsel %vm49_vm1, %v1667_v50, 0.0  ;;  %p1901_p4 = scmp.ne.s32.totalorder %s1746_s0, %s1900_s17  ;;  %p1906_p6 = scmp.lt.s32.totalorder %s1900_s17, %s1900_s17 }
 0x75b   :  { %v1675_v45 = vadd.f32 %v1674_v24, %v1673_v35  ;;  %v1678_v7 = vsel %vm49_vm1, %v1668_v49, 0.0  ;;  %v1700_v52 = vmul.f32 0.9, %v3164_v28  ;;  %v1699_v15 = vmul.f32 0.9, %v3162_v34 }
 0x75c   :  { %v1690_v6 = vadd.f32 %v1689_v22, %v1688_v39  ;;  %v1708_v3 = vrot.slane %v1508_v40, 1  ;;  %p1907_p7 = por %p1906_p6, %p1905_p5 }
 0x75d   :  { %v1677_v53 = vadd.f32 %v1676_v37, %v1675_v45 }
 0x75e   :  { %v1692_v2 = vadd.f32 %v1691_v63, %v1690_v6  ;;  %p1908_p8 = pnand %p1907_p7, %p1901_p4 }
 0x75f   :  { %v1679_v23 = vadd.f32 %v1678_v7, %v1677_v53 }
 0x760   :  { %v1693_v21 = vrot.slane %v1692_v2, 4 }
 0x761   :  { %v1680_v62 = vrot.slane %v1679_v23, 4 }
 0x762   :  { %v1694_v25 = vadd.f32 %v1693_v21, %v1692_v2 }
 0x763   :  { %v1681_v32 = vadd.f32 %v1680_v62, %v1679_v23 }
 0x764   :  { %v1695_v55 = vrot.slane %v1694_v25, 2 }
 0x765   :  { %v1682_v16 = vrot.slane %v1681_v32, 2 }
 0x766   :  { %v1696_v26 = vadd.f32 %v1695_v55, %v1694_v25 }
 0x767   :  { %v1683_v10 = vadd.f32 %v1682_v16, %v1681_v32 }
 0x768   :  { %v1697_v12 = vrot.slane %v1696_v26, 1 }
 0x769   :  { %v1684_v18 = vrot.slane %v1683_v10, 1 }
 0x76a   :  { %v1698_v60 = vadd.f32 %v1697_v12, %v1696_v26 }
 0x76b   :  { %v1685_v41 = vadd.f32 %v1684_v18, %v1683_v10 }
 0x76c   :  { %v1702_v11 = vadd.f32 %v3156_v17, %v1698_v60 }
 0x76d   :  { %v1701_v29 = vadd.f32 %v3156_v17, %v1685_v41 }
 0x76e   :  { %v1704_v0 = vmul.f32 0.1, %v1702_v11 }
 0x76f   :  { %v1703_v33 = vmul.f32 0.1, %v1701_v29 }
 0x770   :  { %v1706_v58 = vadd.f32 %v1704_v0, %v1700_v52 }
 0x771   :  { %v1705_v30 = vadd.f32 %v1703_v33, %v1699_v15 }
 0x772   :  { %v1712_v31 = vadd.f32 %v1708_v3, %v1706_v58 }
 0x773   :  { %v1711_v54 = vadd.f32 %v1705_v30, %v1508_v40 }
 0x774   :  { %v1714_v47 = vmax.f32 %v1712_v31, 0.0 }
 0x775   :  { %v1713_v56 = vmax.f32 %v1711_v54, 0.0 }
 0x776   :  { %v1717_v19 = vrot.slane %v1714_v47, 7 }
 0x778   :  { %v1718_v59 = vsel %vm120_vm2, %v1717_v19, %v1713_v56 }
 0x779   :  { %1721 = vst.msk [vmem:[#allocation7 + $0x10] sm:$0x3] %vm47_vm0, %v1718_v59 }
 0x77a   :  { %1911 = shalt.err (!%p1908_p8)
}
 0x77b   :  { %s1912_s25 = scalar_lea.hbm %s3407_s3, 288 }
 0x77c   :  { %p1913_p9 = scmp.ne.s32.totalorder %s3407_s3, %s1912_s25  ;;  %p1916_p10 = scmp.lt.u32.totalorder %s1912_s25, %s3407_s3 }
 0x77e   :  { %p1918_p11 = pnand %p1916_p10, %p1913_p9 }
 0x780   :  { %1921 = shalt.err (!%p1918_p11)
}
 0x781   :  { %1751 = dma.vmem_to_hbm [thread:$0]  %s1746_s0, 288, %s3407_s3, [#allocation4], %s1931_s28, %s1931_s28, %s1932_s29  }
 0x782   :  { %1926 = dma.done.wait [#allocation4], 288  }
 0x783   :  { %1927 = vsyncadd [#allocation4], 4294967008 }
 0x784   :  { %1928 = dma.done.wait [#allocation9], 18432  }
 0x785   :  { %1929 = vsyncadd [#allocation9], 4294948864 }
 0x786   :  { %1785 = vsyncpa [#allocation3], 1 }
 0x787   :  { %1786 = vsyncpa [#allocation6], 1 }
 0x788   :  { %1787 = vsyncpa [#allocation4], 1 }
 0x789   :  { %1788 = vsyncpa [#allocation9], 1 }

</bundles_post_ra>
